<compile_context>
chip_gen: v6e
topology: v6e:2x2x1
jax: 0.10.0
libtpu: 0.0.40
codegen_flags: <defaults>
</compile_context>

<pallas_src>
import functools

import jax
import jax.numpy as jnp
from jax import lax
from jax.experimental import pallas as pl
from jax.experimental.pallas import tpu as pltpu


# ---------------------------------------------------------------------------
# Pallas kernel 1: fc  --  y = x @ W + b   (N tiled, MXU GEMM + bias fused)
# ---------------------------------------------------------------------------
def _matmul_bias_kernel(x_ref, w_ref, b_ref, o_ref):
    acc = jnp.dot(x_ref[...], w_ref[...], preferred_element_type=jnp.float32)
    o_ref[...] = (acc + b_ref[...]).astype(o_ref.dtype)


def matmul_bias(x, w, b, block_n=1024):
    M, K = x.shape
    K2, N = w.shape
    assert K == K2
    block_n = min(block_n, N)
    assert N % block_n == 0 and block_n % 128 == 0, (N, block_n)
    b2d = b.reshape(1, N).astype(x.dtype)
    return pl.pallas_call(
        _matmul_bias_kernel,
        out_shape=jax.ShapeDtypeStruct((M, N), x.dtype),
        grid_spec=pltpu.PrefetchScalarGridSpec(
            num_scalar_prefetch=0,
            grid=(N // block_n,),
            in_specs=[
                pl.BlockSpec((M, K), lambda j: (0, 0)),
                pl.BlockSpec((K, block_n), lambda j: (0, j)),
                pl.BlockSpec((1, block_n), lambda j: (0, j)),
            ],
            out_specs=pl.BlockSpec((M, block_n), lambda j: (0, j)),
        ),
        compiler_params=pltpu.CompilerParams(
            dimension_semantics=("parallel",)),
    )(x, w, b2d)


# ---------------------------------------------------------------------------
# Pallas kernel 2: per-phase ConvTranspose GEMM (transposed / lane-dense)
#   out[p] = act(W[p] (C_out, 4*C_in) @ cols[p] (4*C_in, B*H*W) + b)
# ---------------------------------------------------------------------------
def _phase_conv_kernel(w_ref, c_ref, b_ref, o_ref, *, activation):
    acc = jnp.dot(w_ref[0], c_ref[0], preferred_element_type=jnp.float32)
    acc = acc + b_ref[...]
    if activation == "relu":
        acc = jnp.maximum(acc, 0.0)
    elif activation == "sigmoid":
        acc = jax.nn.sigmoid(acc)
    o_ref[0] = acc.astype(o_ref.dtype)


def phase_conv_bias_act(w_ph, cols_ph, b, activation):
    P, C_out, K = w_ph.shape
    P2, K2, M = cols_ph.shape
    assert P == P2 == 4 and K == K2
    b2d = b.reshape(C_out, 1).astype(cols_ph.dtype)
    kernel = functools.partial(_phase_conv_kernel, activation=activation)
    return pl.pallas_call(
        kernel,
        out_shape=jax.ShapeDtypeStruct((P, C_out, M), cols_ph.dtype),
        grid_spec=pltpu.PrefetchScalarGridSpec(
            num_scalar_prefetch=0,
            grid=(P,),
            in_specs=[
                pl.BlockSpec((1, C_out, K), lambda p: (p, 0, 0)),
                pl.BlockSpec((1, K, M), lambda p: (p, 0, 0)),
                pl.BlockSpec((C_out, 1), lambda p: (0, 0)),
            ],
            out_specs=pl.BlockSpec((1, C_out, M), lambda p: (p, 0, 0)),
        ),
        compiler_params=pltpu.CompilerParams(
            dimension_semantics=("parallel",)),
    )(w_ph, cols_ph, b2d)


# ---------------------------------------------------------------------------
# Stride-2 phase decomposition of ConvTranspose2d(k=4, s=2, p=1)
#   out[b, co, 2m+py, 2n+px] =
#       sum_{ci,dy,dx} x_pad[ci, b, m+py+dy, n+px+dx] * W[ci, co, 3-py-2dy, 3-px-2dx]
#   (x_pad = x zero-padded by 1 on each spatial side; phase p = 2*py + px)
# ---------------------------------------------------------------------------
def conv_transpose_phase_weights(w_pt):
    """PyTorch ConvTranspose2d weight (C_in, C_out, 4, 4) ->
    (4 phases, C_out, 4*C_in) GEMM matrices; K ordered (dy, dx, ci)."""
    C_in, C_out, kH, kW = w_pt.shape
    assert (kH, kW) == (4, 4)
    phases = []
    for py in range(2):
        for px in range(2):
            taps = [w_pt[:, :, 3 - py - 2 * dy, 3 - px - 2 * dx]
                    for dy in range(2) for dx in range(2)]        # each (C_in, C_out)
            w_p = jnp.stack(taps, axis=0).reshape(4 * C_in, C_out)
            phases.append(w_p.T)                                  # (C_out, 4*C_in)
    return jnp.stack(phases, axis=0)                              # (4, C_out, 4*C_in)


def phase_cols(x_cbhw):
    """x: channel-major (C, B, H, W) -> per-phase im2col (4, 4*C, B*H*W);
    K ordered (dy, dx, ci), matching conv_transpose_phase_weights."""
    C, B, H, W = x_cbhw.shape
    xp = jnp.pad(x_cbhw, ((0, 0), (0, 0), (1, 1), (1, 1)))
    phases = []
    for py in range(2):
        for px in range(2):
            taps = [lax.slice(xp, (0, 0, py + dy, px + dx),
                              (C, B, py + dy + H, px + dx + W))
                    for dy in range(2) for dx in range(2)]        # each (C, B, H, W)
            phases.append(jnp.stack(taps, axis=0).reshape(4 * C, B * H * W))
    return jnp.stack(phases, axis=0)                              # (4, 4*C, B*H*W)


def interleave_phases(out_ph, B, H, W, to_nchw):
    """out_ph: (4, C_out, B*H*W), phase p = 2*py+px -> output pixel (2m+py, 2n+px).
    Returns channel-major (C_out, B, 2H, 2W) or NCHW (B, C_out, 2H, 2W)."""
    C_out = out_ph.shape[1]
    y = out_ph.reshape(2, 2, C_out, B, H, W)          # (py, px, co, b, m, n)
    if to_nchw:
        y = y.transpose(3, 2, 4, 0, 5, 1)             # (b, co, m, py, n, px)
        return y.reshape(B, C_out, 2 * H, 2 * W)
    y = y.transpose(2, 3, 4, 0, 5, 1)                 # (co, b, m, py, n, px)
    return y.reshape(C_out, B, 2 * H, 2 * W)


# ---------------------------------------------------------------------------
# Forward pass (Pallas) and a pure-JAX reference
# ---------------------------------------------------------------------------
def prepare_params(params):
    """One-time layout conversion (do NOT run per forward call)."""
    return dict(
        fc_wT=params["fc_w"].T,                                  # (dim_in, 2048)
        fc_b=params["fc_b"],
        w1_ph=conv_transpose_phase_weights(params["w1"]),        # (4, 16, 128)
        b1=params["b1"],
        w2_ph=conv_transpose_phase_weights(params["w2"]),        # (4, 3, 64)
        b2=params["b2"],
    )


def cnn_decoder_simple_forward(x, p):
    B = x.shape[0]
    # fc:  x @ W^T + b  (weight already pre-transposed)
    h = matmul_bias(x, p["fc_wT"], p["fc_b"], block_n=1024)      # (B, 2048)
    # x.view(-1, 32, 8, 8) -> channel-major (32, B, 8, 8): tiny 16 KB relayout
    h = h.reshape(B, 32, 8, 8).transpose(1, 0, 2, 3)

    # reconv1 + ReLU (phase-decomposed, lane-dense output (4, 16, B*64))
    y1 = phase_conv_bias_act(p["w1_ph"], phase_cols(h), p["b1"], "relu")
    y1 = interleave_phases(y1, B, 8, 8, to_nchw=False)           # (16, B, 16, 16)

    # reconv2 + Sigmoid (output (4, 3, B*256)), then emit NCHW once at the end
    y2 = phase_conv_bias_act(p["w2_ph"], phase_cols(y1), p["b2"], "sigmoid")
    return interleave_phases(y2, B, 16, 16, to_nchw=True)        # (B, 3, 32, 32)


def _ref_conv_transpose(x, w_pt, b, stride=2, padding=1):
    kH, kW = w_pt.shape[2], w_pt.shape[3]
    w_conv = jnp.flip(w_pt, axis=(2, 3)).transpose(1, 0, 2, 3)   # (C_out,C_in,kH,kW)
    pad = kH - 1 - padding
    y = lax.conv_general_dilated(
        x, w_conv, window_strides=(1, 1),
        padding=[(pad, pad), (pad, pad)],
        lhs_dilation=(stride, stride),
        dimension_numbers=("NCHW", "OIHW", "NCHW"))
    return y + b.reshape(1, -1, 1, 1)


def cnn_decoder_simple_reference(x, params):
    B = x.shape[0]
    h = x @ params["fc_w"].T + params["fc_b"]
    h = h.reshape(B, 32, 8, 8)
    y1 = jax.nn.relu(_ref_conv_transpose(h, params["w1"], params["b1"]))
    y2 = jax.nn.sigmoid(_ref_conv_transpose(y1, params["w2"], params["b2"]))
    return y2


# ---------------------------------------------------------------------------
# Deterministic parameter init (synthetic; shapes from the module __init__)
# ---------------------------------------------------------------------------
def init_params(key, dim_in=512 * 2):
    keys = jax.random.split(key, 6)
    fc_w = jax.random.normal(keys[0], (32 * 8 * 8, dim_in), jnp.float32) * 0.02
    fc_b = jax.random.normal(keys[1], (32 * 8 * 8,), jnp.float32) * 0.02
    w1 = jax.random.normal(keys[2], (32, 16, 4, 4), jnp.float32) * 0.05
    b1 = jax.random.normal(keys[3], (16,), jnp.float32) * 0.05
    w2 = jax.random.normal(keys[4], (16, 3, 4, 4), jnp.float32) * 0.05
    b2 = jax.random.normal(keys[5], (3,), jnp.float32) * 0.05
    return dict(fc_w=fc_w, fc_b=fc_b, w1=w1, b1=b1, w2=w2, b2=b2)


if __name__ == "__main__":
    key = jax.random.PRNGKey(0)
    k_param, k_x = jax.random.split(key)
    params = init_params(k_param)
    prepared = jax.tree_util.tree_map(jnp.asarray, prepare_params(params))

    batch = 2
    dim_in = 512 * 2
    x = jax.random.normal(k_x, (batch, dim_in), jnp.float32)

    fwd = jax.jit(cnn_decoder_simple_forward)
    y = jax.block_until_ready(fwd(x, prepared))
    assert y.shape == (batch, 3, 32, 32), y.shape

    y_ref = jax.block_until_ready(cnn_decoder_simple_reference(x, params))
    assert jnp.allclose(y, y_ref, atol=1e-4, rtol=1e-4), (
        float(jnp.max(jnp.abs(y - y_ref))))

    print("KERNEL_OK")
</pallas_src>

<mosaic_0001>
module attributes {stable_mosaic.version = 11 : i64} {
  func.func @_matmul_bias_kernel(%arg0: i32, %arg1: memref<2x1024xf32, #tpu.memory_space<vmem>>, %arg2: memref<1024x1024xf32, #tpu.memory_space<vmem>>, %arg3: memref<1x1024xf32, #tpu.memory_space<vmem>>, %arg4: memref<2x1024xf32, #tpu.memory_space<vmem>>) attributes {dimension_semantics = [#tpu.dimension_semantics<parallel>], iteration_bounds = array<i64: 2>, scalar_prefetch = 0 : i64, scratch_operands = 0 : i64, tpu.core_type = #tpu.core_type<tc>, window_params = [{pipeline_mode = #tpu.pipeline_mode<synchronous>, transform_indices = @transform_0, window_bounds = array<i64: 2, 1024>}, {transform_indices = @transform_1, window_bounds = array<i64: 1024, 1024>}, {transform_indices = @transform_2, window_bounds = array<i64: 1, 1024>}, {transform_indices = @transform_3, window_bounds = array<i64: 2, 1024>}]} {
    %c0 = arith.constant 0 : index
    %c0_0 = arith.constant 0 : index
    %0 = vector.load %arg1[%c0, %c0_0] : memref<2x1024xf32, #tpu.memory_space<vmem>>, vector<2x1024xf32>
    %c0_1 = arith.constant 0 : index
    %c0_2 = arith.constant 0 : index
    %1 = vector.load %arg2[%c0_1, %c0_2] : memref<1024x1024xf32, #tpu.memory_space<vmem>>, vector<1024x1024xf32>
    %cst = arith.constant dense<0.000000e+00> : vector<2x1024xf32>
    %2 = tpu.matmul %0, %1, %cst {dimension_numbers = #tpu.dot_dimension_numbers<[1], [0], [0], [1], [0, 0, 1, 1], [], []>} : vector<2x1024xf32>, vector<1024x1024xf32>, vector<2x1024xf32> -> vector<2x1024xf32>
    %c0_3 = arith.constant 0 : index
    %c0_4 = arith.constant 0 : index
    %3 = vector.load %arg3[%c0_3, %c0_4] : memref<1x1024xf32, #tpu.memory_space<vmem>>, vector<1x1024xf32>
    %4 = vector.broadcast %3 : vector<1x1024xf32> to vector<2x1024xf32>
    %5 = arith.addf %2, %4 : vector<2x1024xf32>
    %c0_5 = arith.constant 0 : index
    %c0_6 = arith.constant 0 : index
    %6 = vector.load %arg4[%c0_5, %c0_6] : memref<2x1024xf32, #tpu.memory_space<vmem>>, vector<2x1024xf32>
    tpu.vector_store %arg4[%c0_5, %c0_6], %5 {strides = array<i32>} : memref<2x1024xf32, #tpu.memory_space<vmem>>, vector<2x1024xf32>,
    return
  }
  func.func @transform_0(%arg0: i32) -> (i32, i32) {
    %c0_i32 = arith.constant 0 : i32
    %c0_i32_0 = arith.constant 0 : i32
    %c0_i32_1 = arith.constant 0 : i32
    return %c0_i32, %c0_i32_0 : i32, i32
  }
  func.func @transform_1(%arg0: i32) -> (i32, i32) {
    %c0_i32 = arith.constant 0 : i32
    %c0_i32_0 = arith.constant 0 : i32
    return %c0_i32, %arg0 : i32, i32
  }
  func.func @transform_2(%arg0: i32) -> (i32, i32) {
    %c0_i32 = arith.constant 0 : i32
    %c0_i32_0 = arith.constant 0 : i32
    return %c0_i32, %arg0 : i32, i32
  }
  func.func @transform_3(%arg0: i32) -> (i32, i32) {
    %c0_i32 = arith.constant 0 : i32
    %c0_i32_0 = arith.constant 0 : i32
    return %c0_i32, %arg0 : i32, i32
  }
}

module attributes {stable_mosaic.version = 11 : i64} {
  func.func @_phase_conv_kernel(%arg0: i32, %arg1: memref<1x16x128xf32, #tpu.memory_space<vmem>>, %arg2: memref<1x128x128xf32, #tpu.memory_space<vmem>>, %arg3: memref<16x1xf32, #tpu.memory_space<vmem>>, %arg4: memref<1x16x128xf32, #tpu.memory_space<vmem>>) attributes {dimension_semantics = [#tpu.dimension_semantics<parallel>], iteration_bounds = array<i64: 4>, scalar_prefetch = 0 : i64, scratch_operands = 0 : i64, tpu.core_type = #tpu.core_type<tc>, window_params = [{transform_indices = @transform_0, window_bounds = array<i64: 1, 16, 128>}, {transform_indices = @transform_1, window_bounds = array<i64: 1, 128, 128>}, {pipeline_mode = #tpu.pipeline_mode<synchronous>, transform_indices = @transform_2, window_bounds = array<i64: 16, 1>}, {transform_indices = @transform_3, window_bounds = array<i64: 1, 16, 128>}]} {
    %c0 = arith.constant 0 : index
    %c0_0 = arith.constant 0 : index
    %c0_1 = arith.constant 0 : index
    %0 = vector.load %arg1[%c0, %c0_0, %c0_1] : memref<1x16x128xf32, #tpu.memory_space<vmem>>, vector<1x16x128xf32>
    %1 = vector.shape_cast %0 : vector<1x16x128xf32> to vector<16x128xf32>
    %c0_2 = arith.constant 0 : index
    %c0_3 = arith.constant 0 : index
    %c0_4 = arith.constant 0 : index
    %2 = vector.load %arg2[%c0_2, %c0_3, %c0_4] : memref<1x128x128xf32, #tpu.memory_space<vmem>>, vector<1x128x128xf32>
    %3 = vector.shape_cast %2 : vector<1x128x128xf32> to vector<128x128xf32>
    %cst = arith.constant dense<0.000000e+00> : vector<16x128xf32>
    %4 = tpu.matmul %1, %3, %cst {dimension_numbers = #tpu.dot_dimension_numbers<[1], [0], [0], [1], [0, 0, 1, 1], [], []>} : vector<16x128xf32>, vector<128x128xf32>, vector<16x128xf32> -> vector<16x128xf32>
    %c0_5 = arith.constant 0 : index
    %c0_6 = arith.constant 0 : index
    %5 = vector.load %arg3[%c0_5, %c0_6] : memref<16x1xf32, #tpu.memory_space<vmem>>, vector<16x1xf32>
    %6 = vector.broadcast %5 : vector<16x1xf32> to vector<16x128xf32>
    %7 = arith.addf %4, %6 : vector<16x128xf32>
    %cst_7 = arith.constant 0.000000e+00 : f32
    %8 = vector.broadcast %cst_7 : f32 to vector<16x128xf32>
    %9 = arith.maximumf %7, %8 : vector<16x128xf32>
    %c0_8 = arith.constant 0 : index
    %c0_9 = arith.constant 0 : index
    %c0_10 = arith.constant 0 : index
    %10 = vector.load %arg4[%c0_8, %c0_9, %c0_10] : memref<1x16x128xf32, #tpu.memory_space<vmem>>, vector<1x16x128xf32>
    %11 = vector.shape_cast %10 : vector<1x16x128xf32> to vector<16x128xf32>
    %12 = vector.shape_cast %9 : vector<16x128xf32> to vector<1x16x128xf32>
    tpu.vector_store %arg4[%c0_8, %c0_9, %c0_10], %12 {strides = array<i32>} : memref<1x16x128xf32, #tpu.memory_space<vmem>>, vector<1x16x128xf32>,
    return
  }
  func.func @transform_0(%arg0: i32) -> (i32, i32, i32) {
    %c0_i32 = arith.constant 0 : i32
    %c0_i32_0 = arith.constant 0 : i32
    %c0_i32_1 = arith.constant 0 : i32
    return %arg0, %c0_i32, %c0_i32_0 : i32, i32, i32
  }
  func.func @transform_1(%arg0: i32) -> (i32, i32, i32) {
    %c0_i32 = arith.constant 0 : i32
    %c0_i32_0 = arith.constant 0 : i32
    %c0_i32_1 = arith.constant 0 : i32
    return %arg0, %c0_i32, %c0_i32_0 : i32, i32, i32
  }
  func.func @transform_2(%arg0: i32) -> (i32, i32) {
    %c0_i32 = arith.constant 0 : i32
    %c0_i32_0 = arith.constant 0 : i32
    %c0_i32_1 = arith.constant 0 : i32
    return %c0_i32, %c0_i32_0 : i32, i32
  }
  func.func @transform_3(%arg0: i32) -> (i32, i32, i32) {
    %c0_i32 = arith.constant 0 : i32
    %c0_i32_0 = arith.constant 0 : i32
    %c0_i32_1 = arith.constant 0 : i32
    return %arg0, %c0_i32, %c0_i32_0 : i32, i32, i32
  }
}

module attributes {stable_mosaic.version = 11 : i64} {
  func.func @_phase_conv_kernel(%arg0: i32, %arg1: memref<1x3x64xf32, #tpu.memory_space<vmem>>, %arg2: memref<1x64x512xf32, #tpu.memory_space<vmem>>, %arg3: memref<3x1xf32, #tpu.memory_space<vmem>>, %arg4: memref<1x3x512xf32, #tpu.memory_space<vmem>>) attributes {dimension_semantics = [#tpu.dimension_semantics<parallel>], iteration_bounds = array<i64: 4>, scalar_prefetch = 0 : i64, scratch_operands = 0 : i64, tpu.core_type = #tpu.core_type<tc>, window_params = [{transform_indices = @transform_0, window_bounds = array<i64: 1, 3, 64>}, {transform_indices = @transform_1, window_bounds = array<i64: 1, 64, 512>}, {pipeline_mode = #tpu.pipeline_mode<synchronous>, transform_indices = @transform_2, window_bounds = array<i64: 3, 1>}, {transform_indices = @transform_3, window_bounds = array<i64: 1, 3, 512>}]} {
    %c0 = arith.constant 0 : index
    %c0_0 = arith.constant 0 : index
    %c0_1 = arith.constant 0 : index
    %0 = vector.load %arg1[%c0, %c0_0, %c0_1] : memref<1x3x64xf32, #tpu.memory_space<vmem>>, vector<1x3x64xf32>
    %1 = vector.shape_cast %0 : vector<1x3x64xf32> to vector<3x64xf32>
    %c0_2 = arith.constant 0 : index
    %c0_3 = arith.constant 0 : index
    %c0_4 = arith.constant 0 : index
    %2 = vector.load %arg2[%c0_2, %c0_3, %c0_4] : memref<1x64x512xf32, #tpu.memory_space<vmem>>, vector<1x64x512xf32>
    %3 = vector.shape_cast %2 : vector<1x64x512xf32> to vector<64x512xf32>
    %cst = arith.constant dense<0.000000e+00> : vector<3x512xf32>
    %4 = tpu.matmul %1, %3, %cst {dimension_numbers = #tpu.dot_dimension_numbers<[1], [0], [0], [1], [0, 0, 1, 1], [], []>} : vector<3x64xf32>, vector<64x512xf32>, vector<3x512xf32> -> vector<3x512xf32>
    %c0_5 = arith.constant 0 : index
    %c0_6 = arith.constant 0 : index
    %5 = vector.load %arg3[%c0_5, %c0_6] : memref<3x1xf32, #tpu.memory_space<vmem>>, vector<3x1xf32>
    %6 = vector.broadcast %5 : vector<3x1xf32> to vector<3x512xf32>
    %7 = arith.addf %4, %6 : vector<3x512xf32>
    %8 = arith.negf %7 : vector<3x512xf32>
    %9 = math.exp %8 : vector<3x512xf32>
    %cst_7 = arith.constant 1.000000e+00 : f32
    %10 = vector.broadcast %cst_7 : f32 to vector<3x512xf32>
    %11 = arith.addf %10, %9 : vector<3x512xf32>
    %12 = arith.divf %10, %11 : vector<3x512xf32>
    %c0_8 = arith.constant 0 : index
    %c0_9 = arith.constant 0 : index
    %c0_10 = arith.constant 0 : index
    %13 = vector.load %arg4[%c0_8, %c0_9, %c0_10] : memref<1x3x512xf32, #tpu.memory_space<vmem>>, vector<1x3x512xf32>
    %14 = vector.shape_cast %13 : vector<1x3x512xf32> to vector<3x512xf32>
    %15 = vector.shape_cast %12 : vector<3x512xf32> to vector<1x3x512xf32>
    tpu.vector_store %arg4[%c0_8, %c0_9, %c0_10], %15 {strides = array<i32>} : memref<1x3x512xf32, #tpu.memory_space<vmem>>, vector<1x3x512xf32>,
    return
  }
  func.func @transform_0(%arg0: i32) -> (i32, i32, i32) {
    %c0_i32 = arith.constant 0 : i32
    %c0_i32_0 = arith.constant 0 : i32
    %c0_i32_1 = arith.constant 0 : i32
    return %arg0, %c0_i32, %c0_i32_0 : i32, i32, i32
  }
  func.func @transform_1(%arg0: i32) -> (i32, i32, i32) {
    %c0_i32 = arith.constant 0 : i32
    %c0_i32_0 = arith.constant 0 : i32
    %c0_i32_1 = arith.constant 0 : i32
    return %arg0, %c0_i32, %c0_i32_0 : i32, i32, i32
  }
  func.func @transform_2(%arg0: i32) -> (i32, i32) {
    %c0_i32 = arith.constant 0 : i32
    %c0_i32_0 = arith.constant 0 : i32
    %c0_i32_1 = arith.constant 0 : i32
    return %c0_i32, %c0_i32_0 : i32, i32
  }
  func.func @transform_3(%arg0: i32) -> (i32, i32, i32) {
    %c0_i32 = arith.constant 0 : i32
    %c0_i32_0 = arith.constant 0 : i32
    %c0_i32_1 = arith.constant 0 : i32
    return %arg0, %c0_i32, %c0_i32_0 : i32, i32, i32
  }
}

</mosaic_0001>

<bundles_post_ra>
// kernel: cnn_decoder_simple_forward.3
= control target key start
LH: loop header
LB: loop body
LE: loop exit
PB: predicated region body
PF: predicated region fallthrough
CT: control target
= control target key end

     0   :  { %8 = vsyncpa [#allocation3], 0  ;;  %s4186_s0 = inlined_call_operand.hbm [shape: f32[2,1024], index: 0, kind: input, shape index: {}]   ;;  %s4187_s1 = inlined_call_operand.hbm [shape: f32[1024,2048], index: 1, kind: input, shape index: {}]   ;;  %s4188_s2 = inlined_call_operand.hbm [shape: f32[1,2048], index: 2, kind: input, shape index: {}]   ;;  %s4189_s3 = inlined_call_operand.vmem [shape: f32[2,2048], index: 3, kind: output, shape index: {}]  }
   0x1   :  { %9 = vsyncpa [#allocation5], 0 }
   0x2   :  { %11 = vsyncpa [#allocation5 + $0x1], 0  ;;  %s2866_s12 = smov 0   ;;  %s2868_s13 = smov 0  }
   0x3   :  { %s2870_s14 = smov 0   ;;  %s2872_s15 = smov 0  }
   0x4 LB: > { %s2887_s16 = sadd.s32 1, %s2837_s15   ;;  %s45_s17 = sadd.s32 1, %s2833_s14  ;;  %s2837_s15 = sphi %s2872_s15, %s4203_s15   ;;  %s2833_s14 = sphi %s2870_s14, %s4202_s14   ;;  %s2829_s13 = sphi %s2868_s13, %s4201_s13   ;;  %s2825_s12 = sphi %s2866_s12, %s4200_s12  }
   0x5   : > { %s42_s18 = ssub.s32 %s2837_s15, %s2887_s16  ;;  %p52_p0 = scmp.ne.s32.totalorder %s2833_s14, %s2829_s13 }
   0x6   : > { %p43_p1 = scmp.eq.s32.totalorder %s42_s18, 0  ;;  %p53_p2 = scmp.eq.s32.totalorder %s2837_s15, 0 }
   0x7   : > { %p2676_p3 = scmp.lt.s32.totalorder %s2837_s15, 2  ;;  %s145_s20 = sand.u32 1, %s2837_s15  }
   0x8   : > { %s2897_s19 = scalar_select %p43_p1, %s2833_s14, %s45_s17  }
   0x9   : > { %p54_p4 = por %p53_p2, %p52_p0  ;;  %s147_s21 = sand.u32 1, %s2833_s14  }
   0xa   : > { %s2640_s22 = sshll.u32 %s147_s21, 13  ;;  %s2654_s23 = sshll.u32 %s2837_s15, 10 }
   0xb   : > { %s2907_s26 = scalar_lea.hbm %s4187_s1, %s2654_s23  ;;  %s149_s27 = scalar_lea.vmem [#allocation4], %s2640_s22 }
   0xc   : > { %s156_s28 = sshll.u32 %s149_s27, 4  ;;  %p2909_p5 = pnand %p2676_p3, %p54_p4  ;;  %s2913_s28 = int_to_ptr.vmem [resolvable:$true] %s156_s28 }
   0xd   : > { %s2915_s30 = scalar_lea.sflag [#allocation5], %s145_s20  ;;  %s2717_s4 = scalar_lea.hbm %s2907_s26, 131072 }
   0xe   : > { %p2718_p6 = scmp.ne.s32.totalorder %s2907_s26, %s2717_s4  ;;  %p2719_p7 = pneg %p2909_p5 }
   0xf   : > { %s2722_s7 = scalar_lea.hbm %s4187_s1, 262144  ;;  %p2723_p10 = scmp.lt.s32.totalorder %s2907_s26, %s4187_s1 }
  0x10   : > { %p2720_p8 = pnand %p2719_p7, %p2718_p6  ;;  %p2724_p11 = scmp.lt.s32.totalorder %s2722_s7, %s2717_s4 }
  0x12   : > { %p2721_p9 = pneg %p2720_p8  ;;  %p2725_p12 = por %p2724_p11, %p2723_p10 }
  0x14   : > { %p2726_p13 = pnand %p2725_p12, %p2721_p9 }
  0x16   : > { %2729 = shalt.err (!%p2726_p13)
}
  0x17   : > { %s2730_s10 = scalar_lea.vmem %s2913_s28, 131072  ;;  %s2839_s11 = smov [#allocation4]  }
  0x18   : > { %p2731_p0 = scmp.ne.s32.totalorder %s2913_s28, %s2730_s10  ;;  %s2735_s17 = sshll.u32 %s2839_s11, 4  ;;  %s2736_s17 = int_to_ptr.vmem [resolvable:$false] %s2735_s17 }
  0x19   : > { %s2737_s18 = scalar_lea.vmem %s2736_s17, 262144  ;;  %p2738_p3 = scmp.lt.s32.totalorder %s2913_s28, %s2736_s17 }
  0x1a   : > { %p2733_p1 = pnand %p2731_p0, %p2719_p7  ;;  %p2739_p4 = scmp.lt.s32.totalorder %s2737_s18, %s2730_s10 }
  0x1c   : > { %p2734_p2 = pneg %p2733_p1  ;;  %p2740_p6 = por %p2739_p4, %p2738_p3 }
  0x1e   : > { %p2741_p8 = pnand %p2740_p6, %p2734_p2 }
  0x20   : > { %2744 = shalt.err (!%p2741_p8)
}
  0x21   : > { %s2840_s20 = smov 2048   ;;  %s2841_s22 = smov 1024  }
  0x22   : > { %s2842_s23 = smov 64   ;;  %s2943_s24 = sadd.s32 4294967295, %s2837_s15  }
  0x23   : > { %2671 = dma.hbm_to_vmem [thread:$0]  (!%p2909_p5), %s2907_s26, 131072, %s2913_s28, %s2915_s30, %s2840_s20, %s2841_s22, %s2842_s23  }
  0x24   : > { %p58_p9 = scmp.ne.s32.totalorder %s2829_s13, %s2825_s12  ;;  %p4190_p10 = scmp.eq.s32.totalorder %s2943_s24, 0 }
  0x25   : > { %p2637_p11 = scmp.ge.s32.totalorder %s2837_s15, 1  ;;  %p121_p12 = scmp.lt.s32.totalorder %s2837_s15, 3 }
  0x26   : > { %p2952_p13 = por %p4190_p10, %p58_p9  ;;  %s2843_s26 = smov [#allocation2]  }
  0x27   : > { %p2956_p0 = pnand %p2637_p11, %p121_p12  ;;  %s134_s28 = sshll.u32 %s2843_s26, 4  ;;  %s135_s28 = int_to_ptr.vmem [resolvable:$true] %s134_s28 }
  0x28   : > { %s4193_s25 = scalar_select %p2952_p13, 1, 0 }
  0x29   : > { %s2643_s4 = sshll.u32 %s147_s21, 3  ;;  %p2664_p1 = pneg %p2956_p0 }
  0x2a   : > { %s2655_s12 = sshll.u32 %s2837_s15, 7  ;;  %s170_s9 = scalar_lea.vmem [#allocation6], %s2643_s4 }
  0x2b   : > { %p2967_p2 = pnand %p2664_p1, %p4190_p10  ;;  %s2974_s8 = scalar_lea.hbm %s4188_s2, %s2655_s12 }
  0x2c   : > { %s178_s10 = sshll.u32 %s170_s9, 4  ;;  %s2756_s21 = scalar_lea.vmem %s135_s28, 256  ;;  %s2976_s10 = int_to_ptr.vmem [resolvable:$true] %s178_s10 }
  0x2d   : > { %p2747_p3 = pneg %p2967_p2  ;;  %p2757_p4 = scmp.ne.s32.totalorder %s135_s28, %s2756_s21 }
  0x2e   : > { %p2764_p9 = scmp.lt.s32.totalorder %s135_s28, %s135_s28  ;;  %p2765_p11 = scmp.lt.s32.totalorder %s2756_s21, %s2756_s21 }
  0x2f   : > { %p2759_p6 = pnand %p2757_p4, %p2747_p3 }
  0x30   : > { %p2766_p12 = por %p2765_p11, %p2764_p9 }
  0x31   : > { %p2760_p8 = pneg %p2759_p6 }
  0x33   : > { %p2767_p1 = pnand %p2766_p12, %p2760_p8 }
  0x35   : > { %2770 = shalt.err (!%p2767_p1)
}
  0x36   : > { %2667 = dma.hbm_to_vmem [thread:$0]  (!%p2967_p2), %s4186_s0, 256, %s135_s28, [#allocation3]  }
  0x37   : > { %s2771_s17 = scalar_lea.hbm %s2974_s8, 128  ;;  %s2776_s22 = scalar_lea.hbm %s4188_s2, 256 }
  0x38   : > { %p2772_p10 = scmp.ne.s32.totalorder %s2974_s8, %s2771_s17  ;;  %p2777_p6 = scmp.lt.s32.totalorder %s2974_s8, %s4188_s2 }
  0x39   : > { %p2778_p8 = scmp.lt.s32.totalorder %s2776_s22, %s2771_s17 }
  0x3a   : > { %p2774_p3 = pnand %p2772_p10, %p2719_p7 }
  0x3b   : > { %p2779_p9 = por %p2778_p8, %p2777_p6 }
  0x3c   : > { %p2775_p4 = pneg %p2774_p3 }
  0x3e   : > { %p2780_p11 = pnand %p2779_p9, %p2775_p4 }
  0x40   : > { %2783 = shalt.err (!%p2780_p11)
}
  0x41   : > { %s2784_s28 = scalar_lea.vmem %s2976_s10, 128  ;;  %s2844_s4 = smov [#allocation6]  }
  0x42   : > { %p2785_p2 = scmp.ne.s32.totalorder %s2976_s10, %s2784_s28  ;;  %s2789_s12 = sshll.u32 %s2844_s4, 4  ;;  %s2790_s12 = int_to_ptr.vmem [resolvable:$false] %s2789_s12 }
  0x43   : > { %s2791_s5 = scalar_lea.vmem %s2790_s12, 256  ;;  %p2792_p1 = scmp.lt.s32.totalorder %s2976_s10, %s2790_s12 }
  0x44   : > { %p2787_p10 = pnand %p2785_p2, %p2719_p7  ;;  %p2793_p3 = scmp.lt.s32.totalorder %s2791_s5, %s2784_s28 }
  0x46   : > { %p2788_p12 = pneg %p2787_p10  ;;  %p2794_p13 = por %p2793_p3, %p2792_p1 }
  0x48   : > { %p2795_p6 = pnand %p2794_p13, %p2788_p12 }
  0x4a   : > { %2798 = shalt.err (!%p2795_p6)
}
  0x4b   : > { %2674 = dma.hbm_to_vmem [thread:$0]  (!%p2909_p5), %s2974_s8, 128, %s2976_s10, %s2915_s30  }
  0x4c   : > { %187 = sbr.rel (%p2956_p0) target bundleno = 821 (0x335), region = 32  ;;  %p4196_p7 = scmp.eq.s32.totalorder (!%p2956_p0), %s2943_s24, 0 }
  0x51   : > { %2816 = dma.done.wait (%p4196_p7), [#allocation3], 256   ;;  %p4197_p4 = pmov %p4196_p7 }
  0x52   : > { %s193_s6 = sand.u32 1, %s2943_s24   ;;  %s195_s7 = sand.u32 1, %s2829_s13  }
  0x53   : > { %2818 = vsyncadd (%p4197_p4), [#allocation3], 4294967040  ;;  %s2648_s29 = sshll.u32 %s195_s7, 13  ;;  %s194_s9 = scalar_lea.sflag [#allocation5], %s193_s6 }
  0x54   : > { %s3018_s21 = scalar_lea.vmem [#allocation4], %s2648_s29  ;;  %p4198_p5 = scmp.ne.s32.totalorder %s4193_s25, 0 }
  0x56   : > { %2820 = dma.done.wait (%p4198_p5), %s194_s9, 131200  }
  0x57   : > { %2822 = vsyncadd (%p4198_p5), %s194_s9, 4294836096  ;;  %v365_v0 = vld [vmem:[%s3018_s21 + $0x3c8] sm:$0xff]  ;;  %v364_v2 = vld [vmem:[%s3018_s21 + $0x3c0] sm:$0xff]  ;;  %s3929_s30 = sshll.u32 %s195_s7, 3  ;;  %s2650_s27 = sshll.u32 %s2943_s24, 3 }
  0x58   : > { %v621_v1 = vld [vmem:[%s3018_s21 + $0xbc8] sm:$0xff]  ;;  %1354 = vmatprep.subr.mxu0 %v365_v0  ;;  %v620_v3 = vld [vmem:[%s3018_s21 + $0xbc0] sm:$0xff]  ;;  %s206_s25 = scalar_lea.vmem [#allocation6], %s3929_s30  ;;  %p4000_p13 = scmp.lt.s32.totalorder %s2650_s27, 15 }
  0x59   : > { %1425 = vmatprep.subr.mxu1 %v621_v1  ;;  %v357_v4 = vld [vmem:[%s3018_s21 + $0x388] sm:$0xff]  ;;  %1355 = vmatpush1.msra.mxu0 %v364_v2  ;;  %v356_v6 = vld [vmem:[%s3018_s21 + $0x380] sm:$0xff] }
  0x5a   : > { %v613_v5 = vld [vmem:[%s3018_s21 + $0xb88] sm:$0xff]  ;;  %1426 = vmatpush1.msra.mxu1 %v620_v3  ;;  %v612_v7 = vld [vmem:[%s3018_s21 + $0xb80] sm:$0xff]  ;;  %1356 = vmatprep.subr.mxu0 %v357_v4  ;;  %s4205_s27 = smov (!%p4000_p13, %s2650_s27), 15 }
  0x5b   : > { %v349_v8 = vld [vmem:[%s3018_s21 + $0x348] sm:$0xff]  ;;  %1427 = vmatprep.subr.mxu1 %v613_v5  ;;  %v348_v10 = vld [vmem:[%s3018_s21 + $0x340] sm:$0xff]  ;;  %1357 = vmatpush1.msra.mxu0 %v356_v6  ;;  %s2651_s24 = sshll.u32 %s4205_s27, 1 }
  0x5c   : > { %v605_v9 = vld [vmem:[%s3018_s21 + $0xb48] sm:$0xff]  ;;  %v604_v11 = vld [vmem:[%s3018_s21 + $0xb40] sm:$0xff]  ;;  %1428 = vmatpush1.msra.mxu1 %v612_v7  ;;  %1358 = vmatprep.subr.mxu0 %v349_v8  ;;  %s4037_s11 = scalar_lea.vmem %s4189_s3, %s2651_s24 }
  0x5d   : > { %v341_v12 = vld [vmem:[%s3018_s21 + $0x308] sm:$0xff]  ;;  %1429 = vmatprep.subr.mxu1 %v605_v9  ;;  %v340_v14 = vld [vmem:[%s3018_s21 + $0x300] sm:$0xff]  ;;  %1359 = vmatpush1.msra.mxu0 %v348_v10 }
  0x5e   : > { %v597_v13 = vld [vmem:[%s3018_s21 + $0xb08] sm:$0xff]  ;;  %v596_v15 = vld [vmem:[%s3018_s21 + $0xb00] sm:$0xff]  ;;  %1430 = vmatpush1.msra.mxu1 %v604_v11  ;;  %1360 = vmatprep.subr.mxu0 %v341_v12 }
  0x5f   : > { %v333_v16 = vld [vmem:[%s3018_s21 + $0x2c8] sm:$0xff]  ;;  %1431 = vmatprep.subr.mxu1 %v597_v13  ;;  %v332_v18 = vld [vmem:[%s3018_s21 + $0x2c0] sm:$0xff]  ;;  %1361 = vmatpush1.msra.mxu0 %v340_v14 }
  0x60   : > { %v589_v17 = vld [vmem:[%s3018_s21 + $0xac8] sm:$0xff]  ;;  %v588_v19 = vld [vmem:[%s3018_s21 + $0xac0] sm:$0xff]  ;;  %1432 = vmatpush1.msra.mxu1 %v596_v15  ;;  %1362 = vmatprep.subr.mxu0 %v333_v16 }
  0x61   : > { %v325_v20 = vld [vmem:[%s3018_s21 + $0x288] sm:$0xff]  ;;  %1433 = vmatprep.subr.mxu1 %v589_v17  ;;  %v324_v22 = vld [vmem:[%s3018_s21 + $0x280] sm:$0xff]  ;;  %1363 = vmatpush1.msra.mxu0 %v332_v18 }
  0x62   : > { %v581_v21 = vld [vmem:[%s3018_s21 + $0xa88] sm:$0xff]  ;;  %v580_v23 = vld [vmem:[%s3018_s21 + $0xa80] sm:$0xff]  ;;  %1434 = vmatpush1.msra.mxu1 %v588_v19  ;;  %1364 = vmatprep.subr.mxu0 %v325_v20 }
  0x63   : > { %v317_v24 = vld [vmem:[%s3018_s21 + $0x248] sm:$0xff]  ;;  %1435 = vmatprep.subr.mxu1 %v581_v21  ;;  %v316_v26 = vld [vmem:[%s3018_s21 + $0x240] sm:$0xff]  ;;  %1365 = vmatpush1.msra.mxu0 %v324_v22 }
  0x64   : > { %v573_v25 = vld [vmem:[%s3018_s21 + $0xa48] sm:$0xff]  ;;  %v572_v27 = vld [vmem:[%s3018_s21 + $0xa40] sm:$0xff]  ;;  %1436 = vmatpush1.msra.mxu1 %v580_v23  ;;  %1366 = vmatprep.subr.mxu0 %v317_v24 }
  0x65   : > { %v309_v28 = vld [vmem:[%s3018_s21 + $0x208] sm:$0xff]  ;;  %1437 = vmatprep.subr.mxu1 %v573_v25  ;;  %v308_v30 = vld [vmem:[%s3018_s21 + $0x200] sm:$0xff]  ;;  %1367 = vmatpush1.msra.mxu0 %v316_v26 }
  0x66   : > { %v565_v29 = vld [vmem:[%s3018_s21 + $0xa08] sm:$0xff]  ;;  %v564_v31 = vld [vmem:[%s3018_s21 + $0xa00] sm:$0xff]  ;;  %1438 = vmatpush1.msra.mxu1 %v572_v27  ;;  %1368 = vmatprep.subr.mxu0 %v309_v28 }
  0x67   : > { %v301_v32 = vld [vmem:[%s3018_s21 + $0x1c8] sm:$0xff]  ;;  %1439 = vmatprep.subr.mxu1 %v565_v29  ;;  %v300_v34 = vld [vmem:[%s3018_s21 + $0x1c0] sm:$0xff]  ;;  %1369 = vmatpush1.msra.mxu0 %v308_v30  ;;  %v1270_v30 = vlaneseq }
  0x68   : > { %v557_v33 = vld [vmem:[%s3018_s21 + $0x9c8] sm:$0xff]  ;;  %v556_v35 = vld [vmem:[%s3018_s21 + $0x9c0] sm:$0xff]  ;;  %1440 = vmatpush1.msra.mxu1 %v564_v31  ;;  %1370 = vmatprep.subr.mxu0 %v301_v32  ;;  %v2845_v31 = vmov 1983009808  }
  0x69   : > { %v293_v36 = vld [vmem:[%s3018_s21 + $0x188] sm:$0xff]  ;;  %1441 = vmatprep.subr.mxu1 %v557_v33  ;;  %v292_v38 = vld [vmem:[%s3018_s21 + $0x180] sm:$0xff]  ;;  %1371 = vmatpush1.msra.mxu0 %v300_v34  ;;  %v1314_v32 = vunpack.c.l.s4 %v2845_v31 }
  0x6a   : > { %v549_v37 = vld [vmem:[%s3018_s21 + $0x988] sm:$0xff]  ;;  %v548_v39 = vld [vmem:[%s3018_s21 + $0x980] sm:$0xff]  ;;  %1442 = vmatpush1.msra.mxu1 %v556_v35  ;;  %1372 = vmatprep.subr.mxu0 %v293_v36 }
  0x6b   : > { %v285_v40 = vld [vmem:[%s3018_s21 + $0x148] sm:$0xff]  ;;  %1443 = vmatprep.subr.mxu1 %v549_v37  ;;  %v284_v42 = vld [vmem:[%s3018_s21 + $0x140] sm:$0xff]  ;;  %1373 = vmatpush1.msra.mxu0 %v292_v38 }
  0x6c   : > { %v541_v41 = vld [vmem:[%s3018_s21 + $0x948] sm:$0xff]  ;;  %v540_v43 = vld [vmem:[%s3018_s21 + $0x940] sm:$0xff]  ;;  %1444 = vmatpush1.msra.mxu1 %v548_v39  ;;  %1374 = vmatprep.subr.mxu0 %v285_v40 }
  0x6d   : > { %v277_v44 = vld [vmem:[%s3018_s21 + $0x108] sm:$0xff]  ;;  %1445 = vmatprep.subr.mxu1 %v541_v41  ;;  %v276_v46 = vld [vmem:[%s3018_s21 + $0x100] sm:$0xff]  ;;  %1375 = vmatpush1.msra.mxu0 %v284_v42  ;;  %v3126_v41 = vshrl.u32 %v1270_v30, 7  ;;  %v1315_v42 = vunpack.c.0.s8 %v1314_v32 }
  0x6e   : > { %v533_v45 = vld [vmem:[%s3018_s21 + $0x908] sm:$0xff]  ;;  %v532_v47 = vld [vmem:[%s3018_s21 + $0x900] sm:$0xff]  ;;  %1446 = vmatpush1.msra.mxu1 %v540_v43  ;;  %1376 = vmatprep.subr.mxu0 %v277_v44 }
  0x6f   : > { %v269_v48 = vld [vmem:[%s3018_s21 + $0xc8] sm:$0xff]  ;;  %1447 = vmatprep.subr.mxu1 %v533_v45  ;;  %v268_v50 = vld [vmem:[%s3018_s21 + $0xc0] sm:$0xff]  ;;  %1377 = vmatpush1.msra.mxu0 %v276_v46 }
  0x70   : > { %v525_v49 = vld [vmem:[%s3018_s21 + $0x8c8] sm:$0xff]  ;;  %v524_v51 = vld [vmem:[%s3018_s21 + $0x8c0] sm:$0xff]  ;;  %1448 = vmatpush1.msra.mxu1 %v532_v47  ;;  %1378 = vmatprep.subr.mxu0 %v269_v48 }
  0x71   : > { %v261_v52 = vld [vmem:[%s3018_s21 + $0x88] sm:$0xff]  ;;  %1449 = vmatprep.subr.mxu1 %v525_v49  ;;  %v260_v54 = vld [vmem:[%s3018_s21 + $0x80] sm:$0xff]  ;;  %1379 = vmatpush1.msra.mxu0 %v268_v50  ;;  %v242_v49 = vld [vmem:[#allocation2] sm:$0xff] }
  0x72   : > { %v517_v53 = vld [vmem:[%s3018_s21 + $0x888] sm:$0xff]  ;;  %v516_v55 = vld [vmem:[%s3018_s21 + $0x880] sm:$0xff]  ;;  %1450 = vmatpush1.msra.mxu1 %v524_v51  ;;  %1380 = vmatprep.subr.mxu0 %v261_v52  ;;  %v3137_v52 = vsub.s32 %v1315_v42, %v3126_v41 }
  0x73   : > { %v253_v56 = vld [vmem:[%s3018_s21 + $0x48] sm:$0xff]  ;;  %1451 = vmatprep.subr.mxu1 %v517_v53  ;;  %v252_v58 = vld [vmem:[%s3018_s21 + $0x40] sm:$0xff]  ;;  %1381 = vmatpush1.msra.mxu0 %v260_v54 }
  0x74   : > { %v509_v57 = vld [vmem:[%s3018_s21 + $0x848] sm:$0xff]  ;;  %v508_v59 = vld [vmem:[%s3018_s21 + $0x840] sm:$0xff]  ;;  %1452 = vmatpush1.msra.mxu1 %v516_v55  ;;  %1382 = vmatprep.subr.mxu0 %v253_v56 }
  0x75   : > { %v245_v60 = vld [vmem:[%s3018_s21 + $0x8] sm:$0xff]  ;;  %1453 = vmatprep.subr.mxu1 %v509_v57  ;;  %v244_v62 = vld [vmem:[%s3018_s21] sm:$0xff]  ;;  %1383 = vmatpush1.msra.mxu0 %v252_v58  ;;  %v1312_v57 = vcombine.high %v242_v49, %v242_v49 }
  0x76   : > { %v501_v61 = vld [vmem:[%s3018_s21 + $0x808] sm:$0xff]  ;;  %v500_v63 = vld [vmem:[%s3018_s21 + $0x800] sm:$0xff]  ;;  %1454 = vmatpush1.msra.mxu1 %v508_v59  ;;  %1384 = vmatprep.subr.mxu0 %v245_v60 }
  0x77   : > { %v493_v0 = vld [vmem:[%s3018_s21 + $0x7c8] sm:$0xff]  ;;  %1455 = vmatprep.subr.mxu1 %v501_v61  ;;  %v492_v2 = vld [vmem:[%s3018_s21 + $0x7c0] sm:$0xff]  ;;  %1385 = vmatpush1.msra.mxu0 %v244_v62  ;;  %v3148_v62 = vrot.slane %v242_v49, %v3137_v52 }
  0x78   : > { %v749_v1 = vld [vmem:[%s3018_s21 + $0xfc8] sm:$0xff]  ;;  %v748_v3 = vld [vmem:[%s3018_s21 + $0xfc0] sm:$0xff]  ;;  %1456 = vmatpush1.msra.mxu1 %v500_v63  ;;  %1386 = vmatprep.subr.mxu0 %v493_v0 }
  0x79   : > { %v485_v4 = vld [vmem:[%s3018_s21 + $0x788] sm:$0xff]  ;;  %1457 = vmatprep.subr.mxu1 %v749_v1  ;;  %v484_v6 = vld [vmem:[%s3018_s21 + $0x780] sm:$0xff]  ;;  %1387 = vmatpush2.msra.mxu0 %v492_v2 }
  0x7a   : > { %v741_v5 = vld [vmem:[%s3018_s21 + $0xf88] sm:$0xff]  ;;  %v740_v7 = vld [vmem:[%s3018_s21 + $0xf80] sm:$0xff]  ;;  %1458 = vmatpush2.msra.mxu1 %v748_v3  ;;  %1388 = vmatprep.subr.mxu0 %v485_v4  ;;  %v3155_v3 = vrot.slane %v1312_v57, %v3137_v52 }
  0x7b   : > { %v477_v8 = vld [vmem:[%s3018_s21 + $0x748] sm:$0xff]  ;;  %1459 = vmatprep.subr.mxu1 %v741_v5  ;;  %v476_v10 = vld [vmem:[%s3018_s21 + $0x740] sm:$0xff]  ;;  %1389 = vmatpush2.msra.mxu0 %v484_v6 }
  0x7c   : > { %v733_v9 = vld [vmem:[%s3018_s21 + $0xf48] sm:$0xff]  ;;  %v732_v11 = vld [vmem:[%s3018_s21 + $0xf40] sm:$0xff]  ;;  %1460 = vmatpush2.msra.mxu1 %v740_v7  ;;  %1390 = vmatprep.subr.mxu0 %v477_v8  ;;  %v3163_v8 = vcombine.high %v3148_v62, %v3148_v62 }
  0x7d   : > { %v469_v12 = vld [vmem:[%s3018_s21 + $0x708] sm:$0xff]  ;;  %1461 = vmatprep.subr.mxu1 %v733_v9  ;;  %v468_v14 = vld [vmem:[%s3018_s21 + $0x700] sm:$0xff]  ;;  %1391 = vmatpush2.msra.mxu0 %v476_v10 }
  0x7e   : > { %v725_v13 = vld [vmem:[%s3018_s21 + $0xf08] sm:$0xff]  ;;  %v724_v15 = vld [vmem:[%s3018_s21 + $0xf00] sm:$0xff]  ;;  %1462 = vmatpush2.msra.mxu1 %v732_v11  ;;  %1392 = vmatprep.subr.mxu0 %v469_v12  ;;  %v3169_v11 = vcombine.high %v3155_v3, %v3155_v3 }
  0x7f   : > { %v461_v16 = vld [vmem:[%s3018_s21 + $0x6c8] sm:$0xff]  ;;  %1463 = vmatprep.subr.mxu1 %v725_v13  ;;  %v460_v18 = vld [vmem:[%s3018_s21 + $0x6c0] sm:$0xff]  ;;  %1393 = vmatpush2.msra.mxu0 %v468_v14 }
  0x80   : > { %v717_v17 = vld [vmem:[%s3018_s21 + $0xec8] sm:$0xff]  ;;  %v716_v19 = vld [vmem:[%s3018_s21 + $0xec0] sm:$0xff]  ;;  %1464 = vmatpush2.msra.mxu1 %v724_v15  ;;  %1394 = vmatprep.subr.mxu0 %v461_v16 }
  0x81   : > { %v453_v20 = vld [vmem:[%s3018_s21 + $0x688] sm:$0xff]  ;;  %1465 = vmatprep.subr.mxu1 %v717_v17  ;;  %v452_v22 = vld [vmem:[%s3018_s21 + $0x680] sm:$0xff]  ;;  %1395 = vmatpush2.msra.mxu0 %v460_v18 }
  0x82   : > { %v709_v21 = vld [vmem:[%s3018_s21 + $0xe88] sm:$0xff]  ;;  %v708_v23 = vld [vmem:[%s3018_s21 + $0xe80] sm:$0xff]  ;;  %1466 = vmatpush2.msra.mxu1 %v716_v19  ;;  %1396 = vmatprep.subr.mxu0 %v453_v20 }
  0x83   : > { %v445_v24 = vld [vmem:[%s3018_s21 + $0x648] sm:$0xff]  ;;  %1467 = vmatprep.subr.mxu1 %v709_v21  ;;  %v444_v26 = vld [vmem:[%s3018_s21 + $0x640] sm:$0xff]  ;;  %1397 = vmatpush2.msra.mxu0 %v452_v22 }
  0x84   : > { %v701_v25 = vld [vmem:[%s3018_s21 + $0xe48] sm:$0xff]  ;;  %v700_v27 = vld [vmem:[%s3018_s21 + $0xe40] sm:$0xff]  ;;  %1468 = vmatpush2.msra.mxu1 %v708_v23  ;;  %1398 = vmatprep.subr.mxu0 %v445_v24 }
  0x85   : > { %v437_v28 = vld [vmem:[%s3018_s21 + $0x608] sm:$0xff]  ;;  %1469 = vmatprep.subr.mxu1 %v701_v25  ;;  %v436_v33 = vld [vmem:[%s3018_s21 + $0x600] sm:$0xff]  ;;  %1399 = vmatpush2.msra.mxu0 %v444_v26 }
  0x86   : > { %v693_v29 = vld [vmem:[%s3018_s21 + $0xe08] sm:$0xff]  ;;  %v692_v34 = vld [vmem:[%s3018_s21 + $0xe00] sm:$0xff]  ;;  %1470 = vmatpush2.msra.mxu1 %v700_v27  ;;  %1400 = vmatprep.subr.mxu0 %v437_v28 }
  0x87   : > { %v429_v35 = vld [vmem:[%s3018_s21 + $0x5c8] sm:$0xff]  ;;  %1471 = vmatprep.subr.mxu1 %v693_v29  ;;  %v428_v37 = vld [vmem:[%s3018_s21 + $0x5c0] sm:$0xff]  ;;  %1401 = vmatpush2.msra.mxu0 %v436_v33 }
  0x88   : > { %v685_v36 = vld [vmem:[%s3018_s21 + $0xdc8] sm:$0xff]  ;;  %v684_v38 = vld [vmem:[%s3018_s21 + $0xdc0] sm:$0xff]  ;;  %1472 = vmatpush2.msra.mxu1 %v692_v34  ;;  %1402 = vmatprep.subr.mxu0 %v429_v35 }
  0x89   : > { %v421_v39 = vld [vmem:[%s3018_s21 + $0x588] sm:$0xff]  ;;  %1473 = vmatprep.subr.mxu1 %v685_v36  ;;  %v420_v43 = vld [vmem:[%s3018_s21 + $0x580] sm:$0xff]  ;;  %1403 = vmatpush2.msra.mxu0 %v428_v37 }
  0x8a   : > { %v677_v40 = vld [vmem:[%s3018_s21 + $0xd88] sm:$0xff]  ;;  %v676_v44 = vld [vmem:[%s3018_s21 + $0xd80] sm:$0xff]  ;;  %1474 = vmatpush2.msra.mxu1 %v684_v38  ;;  %1404 = vmatprep.subr.mxu0 %v421_v39 }
  0x8b   : > { %v413_v45 = vld [vmem:[%s3018_s21 + $0x548] sm:$0xff]  ;;  %1475 = vmatprep.subr.mxu1 %v677_v40  ;;  %v412_v47 = vld [vmem:[%s3018_s21 + $0x540] sm:$0xff]  ;;  %1405 = vmatpush2.msra.mxu0 %v420_v43 }
  0x8c   : > { %v669_v46 = vld [vmem:[%s3018_s21 + $0xd48] sm:$0xff]  ;;  %v668_v48 = vld [vmem:[%s3018_s21 + $0xd40] sm:$0xff]  ;;  %1476 = vmatpush2.msra.mxu1 %v676_v44  ;;  %1406 = vmatprep.subr.mxu0 %v413_v45 }
  0x8d   : > { %v405_v50 = vld [vmem:[%s3018_s21 + $0x508] sm:$0xff]  ;;  %1477 = vmatprep.subr.mxu1 %v669_v46  ;;  %v404_v53 = vld [vmem:[%s3018_s21 + $0x500] sm:$0xff]  ;;  %1407 = vmatpush2.msra.mxu0 %v412_v47 }
  0x8e   : > { %v661_v51 = vld [vmem:[%s3018_s21 + $0xd08] sm:$0xff]  ;;  %v660_v54 = vld [vmem:[%s3018_s21 + $0xd00] sm:$0xff]  ;;  %1478 = vmatpush2.msra.mxu1 %v668_v48  ;;  %1408 = vmatprep.subr.mxu0 %v405_v50 }
  0x8f   : > { %v397_v55 = vld [vmem:[%s3018_s21 + $0x4c8] sm:$0xff]  ;;  %1479 = vmatprep.subr.mxu1 %v661_v51  ;;  %v396_v58 = vld [vmem:[%s3018_s21 + $0x4c0] sm:$0xff]  ;;  %1409 = vmatpush2.msra.mxu0 %v404_v53 }
  0x90   : > { %v653_v56 = vld [vmem:[%s3018_s21 + $0xcc8] sm:$0xff]  ;;  %v652_v59 = vld [vmem:[%s3018_s21 + $0xcc0] sm:$0xff]  ;;  %1480 = vmatpush2.msra.mxu1 %v660_v54  ;;  %1410 = vmatprep.subr.mxu0 %v397_v55 }
  0x91   : > { %v389_v60 = vld [vmem:[%s3018_s21 + $0x488] sm:$0xff]  ;;  %1481 = vmatprep.subr.mxu1 %v653_v56  ;;  %v388_v63 = vld [vmem:[%s3018_s21 + $0x480] sm:$0xff]  ;;  %1411 = vmatpush2.msra.mxu0 %v396_v58 }
  0x92   : > { %v645_v61 = vld [vmem:[%s3018_s21 + $0xc88] sm:$0xff]  ;;  %v644_v0 = vld [vmem:[%s3018_s21 + $0xc80] sm:$0xff]  ;;  %1482 = vmatpush2.msra.mxu1 %v652_v59  ;;  %1412 = vmatprep.subr.mxu0 %v389_v60 }
  0x93   : > { %v381_v1 = vld [vmem:[%s3018_s21 + $0x448] sm:$0xff]  ;;  %1483 = vmatprep.subr.mxu1 %v645_v61  ;;  %v380_v4 = vld [vmem:[%s3018_s21 + $0x440] sm:$0xff]  ;;  %1413 = vmatpush2.msra.mxu0 %v388_v63 }
  0x94   : > { %v637_v2 = vld [vmem:[%s3018_s21 + $0xc48] sm:$0xff]  ;;  %v636_v5 = vld [vmem:[%s3018_s21 + $0xc40] sm:$0xff]  ;;  %1484 = vmatpush2.msra.mxu1 %v644_v0  ;;  %1414 = vmatprep.subr.mxu0 %v381_v1 }
  0x95   : > { %v373_v6 = vld [vmem:[%s3018_s21 + $0x408] sm:$0xff]  ;;  %1485 = vmatprep.subr.mxu1 %v637_v2  ;;  %v372_v9 = vld [vmem:[%s3018_s21 + $0x400] sm:$0xff]  ;;  %1415 = vmatpush2.msra.mxu0 %v380_v4 }
  0x96   : > { %v629_v7 = vld [vmem:[%s3018_s21 + $0xc08] sm:$0xff]  ;;  %1486 = vmatpush2.msra.mxu1 %v636_v5  ;;  %v628_v10 = vld [vmem:[%s3018_s21 + $0xc00] sm:$0xff]  ;;  %1416 = vmatprep.subr.mxu0 %v373_v6 }
  0x97   : > { %1487 = vmatprep.subr.mxu1 %v629_v7  ;;  %v877_v12 = vld [vmem:[%s3018_s21 + $0x13c8] sm:$0xff]  ;;  %1417 = vmatpush2.msra.mxu0 %v372_v9  ;;  %v876_v14 = vld [vmem:[%s3018_s21 + $0x13c0] sm:$0xff] }
  0x98   : > { %1418 = vmatprep.mubr.f32.mxu0 %v3163_v8  ;;  %v1133_v13 = vld [vmem:[%s3018_s21 + $0x1bc8] sm:$0xff]  ;;  %1488 = vmatpush2.msra.mxu1 %v628_v10  ;;  %v1132_v15 = vld [vmem:[%s3018_s21 + $0x1bc0] sm:$0xff] }
  0x99   : > { %1419 = vmatmul.mubr.f32.vlgmr.msra.gmra.mxu0 %v3148_v62  ;;  %1489 = vmatprep.mubr.f32.mxu1 %v3169_v11  ;;  %v869_v16 = vld [vmem:[%s3018_s21 + $0x1388] sm:$0xff]  ;;  %v868_v18 = vld [vmem:[%s3018_s21 + $0x1380] sm:$0xff] }
  0x9a   : > { %1496 = vmatprep.subr.mxu0 %v877_v12  ;;  %v1125_v17 = vld [vmem:[%s3018_s21 + $0x1b88] sm:$0xff]  ;;  %1567 = vmatprep.subr.mxu1 %v1133_v13  ;;  %v1124_v19 = vld [vmem:[%s3018_s21 + $0x1b80] sm:$0xff] }
  0x9b   : > { %1490 = vmatmul.mubr.f32.vlgmr.msra.gmra.mxu1 %v3155_v3  ;;  %1497 = vmatpush1.msra.mxu0 %v876_v14  ;;  %v861_v20 = vld [vmem:[%s3018_s21 + $0x1348] sm:$0xff]  ;;  %v860_v22 = vld [vmem:[%s3018_s21 + $0x1340] sm:$0xff] }
  0x9c   : > { %1568 = vmatpush1.msra.mxu1 %v1132_v15  ;;  %v1117_v21 = vld [vmem:[%s3018_s21 + $0x1b48] sm:$0xff]  ;;  %1498 = vmatprep.subr.mxu0 %v869_v16  ;;  %v1116_v23 = vld [vmem:[%s3018_s21 + $0x1b40] sm:$0xff] }
  0x9d   : > { %1569 = vmatprep.subr.mxu1 %v1125_v17  ;;  %1499 = vmatpush1.msra.mxu0 %v868_v18  ;;  %v853_v24 = vld [vmem:[%s3018_s21 + $0x1308] sm:$0xff]  ;;  %v852_v26 = vld [vmem:[%s3018_s21 + $0x1300] sm:$0xff] }
  0x9e   : > { %1570 = vmatpush1.msra.mxu1 %v1124_v19  ;;  %v1109_v25 = vld [vmem:[%s3018_s21 + $0x1b08] sm:$0xff]  ;;  %1500 = vmatprep.subr.mxu0 %v861_v20  ;;  %v1108_v27 = vld [vmem:[%s3018_s21 + $0x1b00] sm:$0xff] }
  0x9f   : > { %1571 = vmatprep.subr.mxu1 %v1117_v21  ;;  %1501 = vmatpush1.msra.mxu0 %v860_v22  ;;  %v845_v28 = vld [vmem:[%s3018_s21 + $0x12c8] sm:$0xff]  ;;  %v844_v30 = vld [vmem:[%s3018_s21 + $0x12c0] sm:$0xff] }
  0xa0   : > { %1572 = vmatpush1.msra.mxu1 %v1116_v23  ;;  %v1101_v29 = vld [vmem:[%s3018_s21 + $0x1ac8] sm:$0xff]  ;;  %1502 = vmatprep.subr.mxu0 %v853_v24  ;;  %v1100_v31 = vld [vmem:[%s3018_s21 + $0x1ac0] sm:$0xff] }
  0xa1   : > { %1573 = vmatprep.subr.mxu1 %v1109_v25  ;;  %1503 = vmatpush1.msra.mxu0 %v852_v26  ;;  %v837_v32 = vld [vmem:[%s3018_s21 + $0x1288] sm:$0xff]  ;;  %v836_v34 = vld [vmem:[%s3018_s21 + $0x1280] sm:$0xff] }
  0xa2   : > { %1574 = vmatpush1.msra.mxu1 %v1108_v27  ;;  %v1093_v33 = vld [vmem:[%s3018_s21 + $0x1a88] sm:$0xff]  ;;  %1504 = vmatprep.subr.mxu0 %v845_v28  ;;  %v1092_v35 = vld [vmem:[%s3018_s21 + $0x1a80] sm:$0xff] }
  0xa3   : > { %1575 = vmatprep.subr.mxu1 %v1101_v29  ;;  %1505 = vmatpush1.msra.mxu0 %v844_v30  ;;  %v829_v36 = vld [vmem:[%s3018_s21 + $0x1248] sm:$0xff]  ;;  %v828_v38 = vld [vmem:[%s3018_s21 + $0x1240] sm:$0xff] }
  0xa4   : > { %1576 = vmatpush1.msra.mxu1 %v1100_v31  ;;  %v1085_v37 = vld [vmem:[%s3018_s21 + $0x1a48] sm:$0xff]  ;;  %1506 = vmatprep.subr.mxu0 %v837_v32  ;;  %v1084_v39 = vld [vmem:[%s3018_s21 + $0x1a40] sm:$0xff] }
  0xa5   : > { %1577 = vmatprep.subr.mxu1 %v1093_v33  ;;  %1507 = vmatpush1.msra.mxu0 %v836_v34  ;;  %v821_v40 = vld [vmem:[%s3018_s21 + $0x1208] sm:$0xff]  ;;  %v820_v43 = vld [vmem:[%s3018_s21 + $0x1200] sm:$0xff] }
  0xa6   : > { %1578 = vmatpush1.msra.mxu1 %v1092_v35  ;;  %v1077_v42 = vld [vmem:[%s3018_s21 + $0x1a08] sm:$0xff]  ;;  %1508 = vmatprep.subr.mxu0 %v829_v36  ;;  %v1076_v44 = vld [vmem:[%s3018_s21 + $0x1a00] sm:$0xff] }
  0xa7   : > { %1579 = vmatprep.subr.mxu1 %v1085_v37  ;;  %1509 = vmatpush1.msra.mxu0 %v828_v38  ;;  %v813_v45 = vld [vmem:[%s3018_s21 + $0x11c8] sm:$0xff]  ;;  %v812_v47 = vld [vmem:[%s3018_s21 + $0x11c0] sm:$0xff] }
  0xa8   : > { %1580 = vmatpush1.msra.mxu1 %v1084_v39  ;;  %v1069_v46 = vld [vmem:[%s3018_s21 + $0x19c8] sm:$0xff]  ;;  %1510 = vmatprep.subr.mxu0 %v821_v40  ;;  %v1068_v48 = vld [vmem:[%s3018_s21 + $0x19c0] sm:$0xff] }
  0xa9   : > { %1581 = vmatprep.subr.mxu1 %v1077_v42  ;;  %1511 = vmatpush1.msra.mxu0 %v820_v43  ;;  %v805_v49 = vld [vmem:[%s3018_s21 + $0x1188] sm:$0xff]  ;;  %v804_v51 = vld [vmem:[%s3018_s21 + $0x1180] sm:$0xff] }
  0xaa   : > { %1582 = vmatpush1.msra.mxu1 %v1076_v44  ;;  %v1061_v50 = vld [vmem:[%s3018_s21 + $0x1988] sm:$0xff]  ;;  %1512 = vmatprep.subr.mxu0 %v813_v45  ;;  %v1060_v53 = vld [vmem:[%s3018_s21 + $0x1980] sm:$0xff] }
  0xab   : > { %1583 = vmatprep.subr.mxu1 %v1069_v46  ;;  %1513 = vmatpush1.msra.mxu0 %v812_v47  ;;  %v797_v54 = vld [vmem:[%s3018_s21 + $0x1148] sm:$0xff]  ;;  %v796_v56 = vld [vmem:[%s3018_s21 + $0x1140] sm:$0xff] }
  0xac   : > { %1584 = vmatpush1.msra.mxu1 %v1068_v48  ;;  %v1053_v55 = vld [vmem:[%s3018_s21 + $0x1948] sm:$0xff]  ;;  %1514 = vmatprep.subr.mxu0 %v805_v49  ;;  %v1052_v57 = vld [vmem:[%s3018_s21 + $0x1940] sm:$0xff] }
  0xad   : > { %1585 = vmatprep.subr.mxu1 %v1061_v50  ;;  %1515 = vmatpush1.msra.mxu0 %v804_v51  ;;  %v789_v58 = vld [vmem:[%s3018_s21 + $0x1108] sm:$0xff]  ;;  %v788_v60 = vld [vmem:[%s3018_s21 + $0x1100] sm:$0xff] }
  0xae   : > { %1586 = vmatpush1.msra.mxu1 %v1060_v53  ;;  %v1045_v59 = vld [vmem:[%s3018_s21 + $0x1908] sm:$0xff]  ;;  %1516 = vmatprep.subr.mxu0 %v797_v54  ;;  %v1044_v61 = vld [vmem:[%s3018_s21 + $0x1900] sm:$0xff] }
  0xaf   : > { %1587 = vmatprep.subr.mxu1 %v1053_v55  ;;  %1517 = vmatpush1.msra.mxu0 %v796_v56  ;;  %v781_v63 = vld [vmem:[%s3018_s21 + $0x10c8] sm:$0xff]  ;;  %v780_v1 = vld [vmem:[%s3018_s21 + $0x10c0] sm:$0xff] }
  0xb0   : > { %1588 = vmatpush1.msra.mxu1 %v1052_v57  ;;  %v1037_v0 = vld [vmem:[%s3018_s21 + $0x18c8] sm:$0xff]  ;;  %1518 = vmatprep.subr.mxu0 %v789_v58  ;;  %v1036_v2 = vld [vmem:[%s3018_s21 + $0x18c0] sm:$0xff] }
  0xb1   : > { %1589 = vmatprep.subr.mxu1 %v1045_v59  ;;  %1519 = vmatpush1.msra.mxu0 %v788_v60  ;;  %v773_v4 = vld [vmem:[%s3018_s21 + $0x1088] sm:$0xff]  ;;  %v772_v6 = vld [vmem:[%s3018_s21 + $0x1080] sm:$0xff] }
  0xb2   : > { %1590 = vmatpush1.msra.mxu1 %v1044_v61  ;;  %v1029_v5 = vld [vmem:[%s3018_s21 + $0x1888] sm:$0xff]  ;;  %1520 = vmatprep.subr.mxu0 %v781_v63  ;;  %v1028_v7 = vld [vmem:[%s3018_s21 + $0x1880] sm:$0xff] }
  0xb3   : > { %1591 = vmatprep.subr.mxu1 %v1037_v0  ;;  %1521 = vmatpush1.msra.mxu0 %v780_v1  ;;  %v765_v9 = vld [vmem:[%s3018_s21 + $0x1048] sm:$0xff]  ;;  %v764_v12 = vld [vmem:[%s3018_s21 + $0x1040] sm:$0xff]  ;;  %v243_v1 = vld [vmem:[#allocation2 + $0x8] sm:$0xff] }
  0xb4   : > { %1592 = vmatpush1.msra.mxu1 %v1036_v2  ;;  %v1021_v10 = vld [vmem:[%s3018_s21 + $0x1848] sm:$0xff]  ;;  %1522 = vmatprep.subr.mxu0 %v773_v4  ;;  %v1020_v13 = vld [vmem:[%s3018_s21 + $0x1840] sm:$0xff] }
  0xb5   : > { %1593 = vmatprep.subr.mxu1 %v1029_v5  ;;  %1523 = vmatpush1.msra.mxu0 %v772_v6  ;;  %v757_v14 = vld [vmem:[%s3018_s21 + $0x1008] sm:$0xff]  ;;  %v756_v16 = vld [vmem:[%s3018_s21 + $0x1000] sm:$0xff] }
  0xb6   : > { %1594 = vmatpush1.msra.mxu1 %v1028_v7  ;;  %v1013_v15 = vld [vmem:[%s3018_s21 + $0x1808] sm:$0xff]  ;;  %1524 = vmatprep.subr.mxu0 %v765_v9  ;;  %v1012_v17 = vld [vmem:[%s3018_s21 + $0x1800] sm:$0xff] }
  0xb7   : > { %1595 = vmatprep.subr.mxu1 %v1021_v10  ;;  %1525 = vmatpush1.msra.mxu0 %v764_v12  ;;  %v1005_v18 = vld [vmem:[%s3018_s21 + $0x17c8] sm:$0xff]  ;;  %v1004_v20 = vld [vmem:[%s3018_s21 + $0x17c0] sm:$0xff]  ;;  %v1329_v10 = vcombine.high %v243_v1, %v243_v1 }
  0xb8   : > { %1596 = vmatpush1.msra.mxu1 %v1020_v13  ;;  %v1261_v19 = vld [vmem:[%s3018_s21 + $0x1fc8] sm:$0xff]  ;;  %1526 = vmatprep.subr.mxu0 %v757_v14  ;;  %v1260_v21 = vld [vmem:[%s3018_s21 + $0x1fc0] sm:$0xff] }
  0xb9   : > { %1597 = vmatprep.subr.mxu1 %v1013_v15  ;;  %1527 = vmatpush1.msra.mxu0 %v756_v16  ;;  %v997_v22 = vld [vmem:[%s3018_s21 + $0x1788] sm:$0xff]  ;;  %v996_v24 = vld [vmem:[%s3018_s21 + $0x1780] sm:$0xff]  ;;  %v3294_v16 = vrot.slane %v243_v1, %v3137_v52  ;;  %v303_v1 = vld [vmem:[%s3018_s21 + $0x1d8] sm:$0xff] }
  0xba   : > { %1598 = vmatpush1.msra.mxu1 %v1012_v17  ;;  %v1253_v23 = vld [vmem:[%s3018_s21 + $0x1f88] sm:$0xff]  ;;  %1528 = vmatprep.subr.mxu0 %v1005_v18  ;;  %v1252_v25 = vld [vmem:[%s3018_s21 + $0x1f80] sm:$0xff] }
  0xbb   : > { %1599 = vmatprep.subr.mxu1 %v1261_v19  ;;  %1529 = vmatpush2.msra.mxu0 %v1004_v20  ;;  %v989_v26 = vld [vmem:[%s3018_s21 + $0x1748] sm:$0xff]  ;;  %v988_v28 = vld [vmem:[%s3018_s21 + $0x1740] sm:$0xff] }
  0xbc   : > { %1600 = vmatpush2.msra.mxu1 %v1260_v21  ;;  %v1245_v27 = vld [vmem:[%s3018_s21 + $0x1f48] sm:$0xff]  ;;  %1530 = vmatprep.subr.mxu0 %v997_v22  ;;  %v1244_v29 = vld [vmem:[%s3018_s21 + $0x1f40] sm:$0xff]  ;;  %v3301_v21 = vrot.slane %v1329_v10, %v3137_v52  ;;  %v550_v10 = vld [vmem:[%s3018_s21 + $0x990] sm:$0xff] }
  0xbd   : > { %1601 = vmatprep.subr.mxu1 %v1253_v23  ;;  %1531 = vmatpush2.msra.mxu0 %v996_v24  ;;  %v981_v30 = vld [vmem:[%s3018_s21 + $0x1708] sm:$0xff]  ;;  %v980_v32 = vld [vmem:[%s3018_s21 + $0x1700] sm:$0xff] }
  0xbe   : > { %1602 = vmatpush2.msra.mxu1 %v1252_v25  ;;  %v1237_v31 = vld [vmem:[%s3018_s21 + $0x1f08] sm:$0xff]  ;;  %1532 = vmatprep.subr.mxu0 %v989_v26  ;;  %v1236_v33 = vld [vmem:[%s3018_s21 + $0x1f00] sm:$0xff]  ;;  %v3309_v26 = vcombine.high %v3294_v16, %v3294_v16 }
  0xbf   : > { %1603 = vmatprep.subr.mxu1 %v1245_v27  ;;  %1533 = vmatpush2.msra.mxu0 %v988_v28  ;;  %v973_v34 = vld [vmem:[%s3018_s21 + $0x16c8] sm:$0xff]  ;;  %v972_v36 = vld [vmem:[%s3018_s21 + $0x16c0] sm:$0xff] }
  0xc0   : > { %1604 = vmatpush2.msra.mxu1 %v1244_v29  ;;  %v1229_v35 = vld [vmem:[%s3018_s21 + $0x1ec8] sm:$0xff]  ;;  %1534 = vmatprep.subr.mxu0 %v981_v30  ;;  %v1228_v37 = vld [vmem:[%s3018_s21 + $0x1ec0] sm:$0xff]  ;;  %v3315_v29 = vcombine.high %v3301_v21, %v3301_v21  ;;  %v367_v30 = vld [vmem:[%s3018_s21 + $0x3d8] sm:$0xff] }
  0xc1   : > { %1605 = vmatprep.subr.mxu1 %v1237_v31  ;;  %1535 = vmatpush2.msra.mxu0 %v980_v32  ;;  %v965_v38 = vld [vmem:[%s3018_s21 + $0x1688] sm:$0xff]  ;;  %v964_v40 = vld [vmem:[%s3018_s21 + $0x1680] sm:$0xff]  ;;  %v623_v31 = vld [vmem:[%s3018_s21 + $0xbd8] sm:$0xff] }
  0xc2   : > { %1606 = vmatpush2.msra.mxu1 %v1236_v33  ;;  %v1221_v39 = vld [vmem:[%s3018_s21 + $0x1e88] sm:$0xff]  ;;  %1536 = vmatprep.subr.mxu0 %v973_v34  ;;  %v1220_v42 = vld [vmem:[%s3018_s21 + $0x1e80] sm:$0xff]  ;;  %v366_v32 = vld [vmem:[%s3018_s21 + $0x3d0] sm:$0xff] }
  0xc3   : > { %1607 = vmatprep.subr.mxu1 %v1229_v35  ;;  %1537 = vmatpush2.msra.mxu0 %v972_v36  ;;  %v957_v43 = vld [vmem:[%s3018_s21 + $0x1648] sm:$0xff]  ;;  %v956_v45 = vld [vmem:[%s3018_s21 + $0x1640] sm:$0xff]  ;;  %v622_v33 = vld [vmem:[%s3018_s21 + $0xbd0] sm:$0xff] }
  0xc4   : > { %1608 = vmatpush2.msra.mxu1 %v1228_v37  ;;  %v1213_v44 = vld [vmem:[%s3018_s21 + $0x1e48] sm:$0xff]  ;;  %1538 = vmatprep.subr.mxu0 %v965_v38  ;;  %v1212_v46 = vld [vmem:[%s3018_s21 + $0x1e40] sm:$0xff]  ;;  %v359_v34 = vld [vmem:[%s3018_s21 + $0x398] sm:$0xff] }
  0xc5   : > { %1609 = vmatprep.subr.mxu1 %v1221_v39  ;;  %1539 = vmatpush2.msra.mxu0 %v964_v40  ;;  %v949_v47 = vld [vmem:[%s3018_s21 + $0x1608] sm:$0xff]  ;;  %v948_v49 = vld [vmem:[%s3018_s21 + $0x1600] sm:$0xff]  ;;  %v615_v35 = vld [vmem:[%s3018_s21 + $0xb98] sm:$0xff] }
  0xc6   : > { %1610 = vmatpush2.msra.mxu1 %v1220_v42  ;;  %v1205_v48 = vld [vmem:[%s3018_s21 + $0x1e08] sm:$0xff]  ;;  %1540 = vmatprep.subr.mxu0 %v957_v43  ;;  %v1204_v50 = vld [vmem:[%s3018_s21 + $0x1e00] sm:$0xff]  ;;  %v358_v36 = vld [vmem:[%s3018_s21 + $0x390] sm:$0xff] }
  0xc7   : > { %1611 = vmatprep.subr.mxu1 %v1213_v44  ;;  %1541 = vmatpush2.msra.mxu0 %v956_v45  ;;  %v941_v51 = vld [vmem:[%s3018_s21 + $0x15c8] sm:$0xff]  ;;  %v940_v54 = vld [vmem:[%s3018_s21 + $0x15c0] sm:$0xff]  ;;  %v614_v37 = vld [vmem:[%s3018_s21 + $0xb90] sm:$0xff] }
  0xc8   : > { %1612 = vmatpush2.msra.mxu1 %v1212_v46  ;;  %v1197_v53 = vld [vmem:[%s3018_s21 + $0x1dc8] sm:$0xff]  ;;  %1542 = vmatprep.subr.mxu0 %v949_v47  ;;  %v1196_v55 = vld [vmem:[%s3018_s21 + $0x1dc0] sm:$0xff]  ;;  %v351_v38 = vld [vmem:[%s3018_s21 + $0x358] sm:$0xff] }
  0xc9   : > { %1613 = vmatprep.subr.mxu1 %v1205_v48  ;;  %1543 = vmatpush2.msra.mxu0 %v948_v49  ;;  %v933_v56 = vld [vmem:[%s3018_s21 + $0x1588] sm:$0xff]  ;;  %v932_v58 = vld [vmem:[%s3018_s21 + $0x1580] sm:$0xff]  ;;  %v607_v39 = vld [vmem:[%s3018_s21 + $0xb58] sm:$0xff] }
  0xca   : > { %1614 = vmatpush2.msra.mxu1 %v1204_v50  ;;  %v1189_v57 = vld [vmem:[%s3018_s21 + $0x1d88] sm:$0xff]  ;;  %1544 = vmatprep.subr.mxu0 %v941_v51  ;;  %v1188_v59 = vld [vmem:[%s3018_s21 + $0x1d80] sm:$0xff]  ;;  %v350_v40 = vld [vmem:[%s3018_s21 + $0x350] sm:$0xff] }
  0xcb   : > { %1615 = vmatprep.subr.mxu1 %v1197_v53  ;;  %1545 = vmatpush2.msra.mxu0 %v940_v54  ;;  %v925_v60 = vld [vmem:[%s3018_s21 + $0x1548] sm:$0xff]  ;;  %v924_v63 = vld [vmem:[%s3018_s21 + $0x1540] sm:$0xff]  ;;  %v606_v42 = vld [vmem:[%s3018_s21 + $0xb50] sm:$0xff] }
  0xcc   : > { %1616 = vmatpush2.msra.mxu1 %v1196_v55  ;;  %v1181_v61 = vld [vmem:[%s3018_s21 + $0x1d48] sm:$0xff]  ;;  %1546 = vmatprep.subr.mxu0 %v933_v56  ;;  %v1180_v0 = vld [vmem:[%s3018_s21 + $0x1d40] sm:$0xff]  ;;  %v343_v43 = vld [vmem:[%s3018_s21 + $0x318] sm:$0xff] }
  0xcd   : > { %1617 = vmatprep.subr.mxu1 %v1189_v57  ;;  %1547 = vmatpush2.msra.mxu0 %v932_v58  ;;  %v917_v2 = vld [vmem:[%s3018_s21 + $0x1508] sm:$0xff]  ;;  %v916_v5 = vld [vmem:[%s3018_s21 + $0x1500] sm:$0xff]  ;;  %v599_v44 = vld [vmem:[%s3018_s21 + $0xb18] sm:$0xff] }
  0xce   : > { %1618 = vmatpush2.msra.mxu1 %v1188_v59  ;;  %v1173_v4 = vld [vmem:[%s3018_s21 + $0x1d08] sm:$0xff]  ;;  %1548 = vmatprep.subr.mxu0 %v925_v60  ;;  %v1172_v6 = vld [vmem:[%s3018_s21 + $0x1d00] sm:$0xff]  ;;  %v342_v45 = vld [vmem:[%s3018_s21 + $0x310] sm:$0xff] }
  0xcf   : > { %1619 = vmatprep.subr.mxu1 %v1181_v61  ;;  %1549 = vmatpush2.msra.mxu0 %v924_v63  ;;  %v909_v7 = vld [vmem:[%s3018_s21 + $0x14c8] sm:$0xff]  ;;  %v908_v12 = vld [vmem:[%s3018_s21 + $0x14c0] sm:$0xff]  ;;  %v598_v46 = vld [vmem:[%s3018_s21 + $0xb10] sm:$0xff] }
  0xd0   : > { %1620 = vmatpush2.msra.mxu1 %v1180_v0  ;;  %v1165_v9 = vld [vmem:[%s3018_s21 + $0x1cc8] sm:$0xff]  ;;  %1550 = vmatprep.subr.mxu0 %v917_v2  ;;  %v1164_v13 = vld [vmem:[%s3018_s21 + $0x1cc0] sm:$0xff]  ;;  %v335_v47 = vld [vmem:[%s3018_s21 + $0x2d8] sm:$0xff] }
  0xd1   : > { %1621 = vmatprep.subr.mxu1 %v1173_v4  ;;  %1551 = vmatpush2.msra.mxu0 %v916_v5  ;;  %v901_v14 = vld [vmem:[%s3018_s21 + $0x1488] sm:$0xff]  ;;  %v900_v17 = vld [vmem:[%s3018_s21 + $0x1480] sm:$0xff]  ;;  %v591_v48 = vld [vmem:[%s3018_s21 + $0xad8] sm:$0xff] }
  0xd2   : > { %1622 = vmatpush2.msra.mxu1 %v1172_v6  ;;  %v1157_v15 = vld [vmem:[%s3018_s21 + $0x1c88] sm:$0xff]  ;;  %1552 = vmatprep.subr.mxu0 %v909_v7  ;;  %v1156_v18 = vld [vmem:[%s3018_s21 + $0x1c80] sm:$0xff]  ;;  %v334_v49 = vld [vmem:[%s3018_s21 + $0x2d0] sm:$0xff] }
  0xd3   : > { %1623 = vmatprep.subr.mxu1 %v1165_v9  ;;  %1553 = vmatpush2.msra.mxu0 %v908_v12  ;;  %v893_v19 = vld [vmem:[%s3018_s21 + $0x1448] sm:$0xff]  ;;  %v892_v22 = vld [vmem:[%s3018_s21 + $0x1440] sm:$0xff]  ;;  %v590_v50 = vld [vmem:[%s3018_s21 + $0xad0] sm:$0xff] }
  0xd4   : > { %1624 = vmatpush2.msra.mxu1 %v1164_v13  ;;  %v1149_v20 = vld [vmem:[%s3018_s21 + $0x1c48] sm:$0xff]  ;;  %1554 = vmatprep.subr.mxu0 %v901_v14  ;;  %v1148_v23 = vld [vmem:[%s3018_s21 + $0x1c40] sm:$0xff]  ;;  %v327_v51 = vld [vmem:[%s3018_s21 + $0x298] sm:$0xff] }
  0xd5   : > { %1625 = vmatprep.subr.mxu1 %v1157_v15  ;;  %1555 = vmatpush2.msra.mxu0 %v900_v17  ;;  %v885_v24 = vld [vmem:[%s3018_s21 + $0x1408] sm:$0xff]  ;;  %v884_v27 = vld [vmem:[%s3018_s21 + $0x1400] sm:$0xff]  ;;  %v583_v53 = vld [vmem:[%s3018_s21 + $0xa98] sm:$0xff] }
  0xd6   : > { %1626 = vmatpush2.msra.mxu1 %v1156_v18  ;;  %v1141_v25 = vld [vmem:[%s3018_s21 + $0x1c08] sm:$0xff]  ;;  %1556 = vmatprep.subr.mxu0 %v893_v19  ;;  %v1140_v28 = vld [vmem:[%s3018_s21 + $0x1c00] sm:$0xff]  ;;  %v326_v54 = vld [vmem:[%s3018_s21 + $0x290] sm:$0xff] }
  0xd7   : > { %1627 = vmatprep.subr.mxu1 %v1149_v20  ;;  %1557 = vmatpush2.msra.mxu0 %v892_v22  ;;  %v582_v55 = vld [vmem:[%s3018_s21 + $0xa90] sm:$0xff]  ;;  %v319_v56 = vld [vmem:[%s3018_s21 + $0x258] sm:$0xff] }
  0xd8   : > { %1628 = vmatpush2.msra.mxu1 %v1148_v23  ;;  %1558 = vmatprep.subr.mxu0 %v885_v24  ;;  %v575_v57 = vld [vmem:[%s3018_s21 + $0xa58] sm:$0xff]  ;;  %v318_v58 = vld [vmem:[%s3018_s21 + $0x250] sm:$0xff] }
  0xd9   : > { %1629 = vmatprep.subr.mxu1 %v1141_v25  ;;  %1559 = vmatpush2.msra.mxu0 %v884_v27  ;;  %v574_v59 = vld [vmem:[%s3018_s21 + $0xa50] sm:$0xff]  ;;  %v311_v60 = vld [vmem:[%s3018_s21 + $0x218] sm:$0xff] }
  0xda   : > { %1560 = vmatprep.mubr.f32.mxu0 %v3309_v26  ;;  %1630 = vmatpush2.msra.mxu1 %v1140_v28  ;;  %v567_v61 = vld [vmem:[%s3018_s21 + $0xa18] sm:$0xff]  ;;  %v310_v63 = vld [vmem:[%s3018_s21 + $0x210] sm:$0xff] }
  0xdb   : > { %1561 = vmatmul.mubr.f32.vlgmr.msra.gmra.mxu0 %v3294_v16  ;;  %1631 = vmatprep.mubr.f32.mxu1 %v3315_v29  ;;  %v566_v0 = vld [vmem:[%s3018_s21 + $0xa10] sm:$0xff]  ;;  %v559_v2 = vld [vmem:[%s3018_s21 + $0x9d8] sm:$0xff] }
  0xdc   : > { %1638 = vmatprep.subr.mxu0 %v367_v30  ;;  %1709 = vmatprep.subr.mxu1 %v623_v31  ;;  %v302_v4 = vld [vmem:[%s3018_s21 + $0x1d0] sm:$0xff]  ;;  %v295_v6 = vld [vmem:[%s3018_s21 + $0x198] sm:$0xff] }
  0xdd   : > { %1632 = vmatmul.mubr.f32.vlgmr.msra.gmra.mxu1 %v3301_v21  ;;  %1639 = vmatpush1.msra.mxu0 %v366_v32  ;;  %v558_v5 = vld [vmem:[%s3018_s21 + $0x9d0] sm:$0xff]  ;;  %v551_v7 = vld [vmem:[%s3018_s21 + $0x998] sm:$0xff] }
  0xde   : > { %1710 = vmatpush1.msra.mxu1 %v622_v33  ;;  %1640 = vmatprep.subr.mxu0 %v359_v34  ;;  %v294_v9 = vld [vmem:[%s3018_s21 + $0x190] sm:$0xff]  ;;  %v287_v12 = vld [vmem:[%s3018_s21 + $0x158] sm:$0xff] }
  0xdf   : > { %1711 = vmatprep.subr.mxu1 %v615_v35  ;;  %1641 = vmatpush1.msra.mxu0 %v358_v36  ;;  %v543_v13 = vld [vmem:[%s3018_s21 + $0x958] sm:$0xff]  ;;  %v286_v14 = vld [vmem:[%s3018_s21 + $0x150] sm:$0xff] }
  0xe0   : > { %1712 = vmatpush1.msra.mxu1 %v614_v37  ;;  %1642 = vmatprep.subr.mxu0 %v351_v38  ;;  %v542_v15 = vld [vmem:[%s3018_s21 + $0x950] sm:$0xff]  ;;  %v279_v17 = vld [vmem:[%s3018_s21 + $0x118] sm:$0xff] }
  0xe1   : > { %1713 = vmatprep.subr.mxu1 %v607_v39  ;;  %1643 = vmatpush1.msra.mxu0 %v350_v40  ;;  %v535_v18 = vld [vmem:[%s3018_s21 + $0x918] sm:$0xff]  ;;  %v278_v19 = vld [vmem:[%s3018_s21 + $0x110] sm:$0xff] }
  0xe2   : > { %1714 = vmatpush1.msra.mxu1 %v606_v42  ;;  %1644 = vmatprep.subr.mxu0 %v343_v43  ;;  %v534_v20 = vld [vmem:[%s3018_s21 + $0x910] sm:$0xff]  ;;  %v271_v22 = vld [vmem:[%s3018_s21 + $0xd8] sm:$0xff] }
  0xe3   : > { %1715 = vmatprep.subr.mxu1 %v599_v44  ;;  %1645 = vmatpush1.msra.mxu0 %v342_v45  ;;  %v527_v23 = vld [vmem:[%s3018_s21 + $0x8d8] sm:$0xff]  ;;  %v270_v24 = vld [vmem:[%s3018_s21 + $0xd0] sm:$0xff] }
  0xe4   : > { %1716 = vmatpush1.msra.mxu1 %v598_v46  ;;  %1646 = vmatprep.subr.mxu0 %v335_v47  ;;  %v526_v25 = vld [vmem:[%s3018_s21 + $0x8d0] sm:$0xff]  ;;  %v263_v27 = vld [vmem:[%s3018_s21 + $0x98] sm:$0xff] }
  0xe5   : > { %1717 = vmatprep.subr.mxu1 %v591_v48  ;;  %1647 = vmatpush1.msra.mxu0 %v334_v49  ;;  %v519_v28 = vld [vmem:[%s3018_s21 + $0x898] sm:$0xff]  ;;  %v262_v30 = vld [vmem:[%s3018_s21 + $0x90] sm:$0xff] }
  0xe6   : > { %1718 = vmatpush1.msra.mxu1 %v590_v50  ;;  %1648 = vmatprep.subr.mxu0 %v327_v51  ;;  %v518_v31 = vld [vmem:[%s3018_s21 + $0x890] sm:$0xff]  ;;  %v255_v32 = vld [vmem:[%s3018_s21 + $0x58] sm:$0xff] }
  0xe7   : > { %1719 = vmatprep.subr.mxu1 %v583_v53  ;;  %1649 = vmatpush1.msra.mxu0 %v326_v54  ;;  %v511_v33 = vld [vmem:[%s3018_s21 + $0x858] sm:$0xff]  ;;  %v254_v34 = vld [vmem:[%s3018_s21 + $0x50] sm:$0xff] }
  0xe8   : > { %1720 = vmatpush1.msra.mxu1 %v582_v55  ;;  %1650 = vmatprep.subr.mxu0 %v319_v56  ;;  %v510_v35 = vld [vmem:[%s3018_s21 + $0x850] sm:$0xff]  ;;  %v247_v36 = vld [vmem:[%s3018_s21 + $0x18] sm:$0xff] }
  0xe9   : > { %1721 = vmatprep.subr.mxu1 %v575_v57  ;;  %1651 = vmatpush1.msra.mxu0 %v318_v58  ;;  %v503_v37 = vld [vmem:[%s3018_s21 + $0x818] sm:$0xff]  ;;  %v246_v38 = vld [vmem:[%s3018_s21 + $0x10] sm:$0xff] }
  0xea   : > { %1722 = vmatpush1.msra.mxu1 %v574_v59  ;;  %1652 = vmatprep.subr.mxu0 %v311_v60  ;;  %v502_v39 = vld [vmem:[%s3018_s21 + $0x810] sm:$0xff]  ;;  %v495_v40 = vld [vmem:[%s3018_s21 + $0x7d8] sm:$0xff] }
  0xeb   : > { %1723 = vmatprep.subr.mxu1 %v567_v61  ;;  %1653 = vmatpush1.msra.mxu0 %v310_v63  ;;  %v751_v42 = vld [vmem:[%s3018_s21 + $0xfd8] sm:$0xff]  ;;  %v494_v43 = vld [vmem:[%s3018_s21 + $0x7d0] sm:$0xff] }
  0xec   : > { %1724 = vmatpush1.msra.mxu1 %v566_v0  ;;  %1654 = vmatprep.subr.mxu0 %v303_v1  ;;  %v750_v44 = vld [vmem:[%s3018_s21 + $0xfd0] sm:$0xff]  ;;  %v487_v45 = vld [vmem:[%s3018_s21 + $0x798] sm:$0xff] }
  0xed   : > { %1725 = vmatprep.subr.mxu1 %v559_v2  ;;  %1655 = vmatpush1.msra.mxu0 %v302_v4  ;;  %v743_v46 = vld [vmem:[%s3018_s21 + $0xf98] sm:$0xff]  ;;  %v486_v47 = vld [vmem:[%s3018_s21 + $0x790] sm:$0xff] }
  0xee   : > { %1726 = vmatpush1.msra.mxu1 %v558_v5  ;;  %1656 = vmatprep.subr.mxu0 %v295_v6  ;;  %v742_v48 = vld [vmem:[%s3018_s21 + $0xf90] sm:$0xff]  ;;  %v479_v49 = vld [vmem:[%s3018_s21 + $0x758] sm:$0xff] }
  0xef   : > { %1727 = vmatprep.subr.mxu1 %v551_v7  ;;  %1657 = vmatpush1.msra.mxu0 %v294_v9  ;;  %v735_v50 = vld [vmem:[%s3018_s21 + $0xf58] sm:$0xff]  ;;  %v478_v51 = vld [vmem:[%s3018_s21 + $0x750] sm:$0xff] }
  0xf0   : > { %1728 = vmatpush1.msra.mxu1 %v550_v10  ;;  %1658 = vmatprep.subr.mxu0 %v287_v12  ;;  %v734_v53 = vld [vmem:[%s3018_s21 + $0xf50] sm:$0xff]  ;;  %v471_v54 = vld [vmem:[%s3018_s21 + $0x718] sm:$0xff] }
  0xf1   : > { %1729 = vmatprep.subr.mxu1 %v543_v13  ;;  %1659 = vmatpush1.msra.mxu0 %v286_v14  ;;  %v727_v55 = vld [vmem:[%s3018_s21 + $0xf18] sm:$0xff]  ;;  %v470_v56 = vld [vmem:[%s3018_s21 + $0x710] sm:$0xff] }
  0xf2   : > { %1730 = vmatpush1.msra.mxu1 %v542_v15  ;;  %1660 = vmatprep.subr.mxu0 %v279_v17  ;;  %v726_v57 = vld [vmem:[%s3018_s21 + $0xf10] sm:$0xff]  ;;  %v463_v58 = vld [vmem:[%s3018_s21 + $0x6d8] sm:$0xff] }
  0xf3   : > { %1731 = vmatprep.subr.mxu1 %v535_v18  ;;  %1661 = vmatpush1.msra.mxu0 %v278_v19  ;;  %v719_v59 = vld [vmem:[%s3018_s21 + $0xed8] sm:$0xff]  ;;  %v462_v60 = vld [vmem:[%s3018_s21 + $0x6d0] sm:$0xff] }
  0xf4   : > { %1732 = vmatpush1.msra.mxu1 %v534_v20  ;;  %1662 = vmatprep.subr.mxu0 %v271_v22  ;;  %v718_v61 = vld [vmem:[%s3018_s21 + $0xed0] sm:$0xff]  ;;  %v455_v63 = vld [vmem:[%s3018_s21 + $0x698] sm:$0xff] }
  0xf5   : > { %1733 = vmatprep.subr.mxu1 %v527_v23  ;;  %1663 = vmatpush1.msra.mxu0 %v270_v24  ;;  %v711_v0 = vld [vmem:[%s3018_s21 + $0xe98] sm:$0xff]  ;;  %v454_v1 = vld [vmem:[%s3018_s21 + $0x690] sm:$0xff] }
  0xf6   : > { %1734 = vmatpush1.msra.mxu1 %v526_v25  ;;  %1664 = vmatprep.subr.mxu0 %v263_v27  ;;  %v710_v2 = vld [vmem:[%s3018_s21 + $0xe90] sm:$0xff]  ;;  %v447_v4 = vld [vmem:[%s3018_s21 + $0x658] sm:$0xff] }
  0xf7   : > { %1735 = vmatprep.subr.mxu1 %v519_v28  ;;  %1665 = vmatpush1.msra.mxu0 %v262_v30  ;;  %v703_v5 = vld [vmem:[%s3018_s21 + $0xe58] sm:$0xff]  ;;  %v446_v6 = vld [vmem:[%s3018_s21 + $0x650] sm:$0xff] }
  0xf8   : > { %1736 = vmatpush1.msra.mxu1 %v518_v31  ;;  %1666 = vmatprep.subr.mxu0 %v255_v32  ;;  %v702_v7 = vld [vmem:[%s3018_s21 + $0xe50] sm:$0xff]  ;;  %v439_v9 = vld [vmem:[%s3018_s21 + $0x618] sm:$0xff] }
  0xf9   : > { %1737 = vmatprep.subr.mxu1 %v511_v33  ;;  %1667 = vmatpush1.msra.mxu0 %v254_v34  ;;  %v695_v10 = vld [vmem:[%s3018_s21 + $0xe18] sm:$0xff]  ;;  %v438_v12 = vld [vmem:[%s3018_s21 + $0x610] sm:$0xff] }
  0xfa   : > { %1738 = vmatpush1.msra.mxu1 %v510_v35  ;;  %1668 = vmatprep.subr.mxu0 %v247_v36  ;;  %v694_v13 = vld [vmem:[%s3018_s21 + $0xe10] sm:$0xff]  ;;  %v431_v14 = vld [vmem:[%s3018_s21 + $0x5d8] sm:$0xff] }
  0xfb   : > { %1739 = vmatprep.subr.mxu1 %v503_v37  ;;  %1669 = vmatpush1.msra.mxu0 %v246_v38  ;;  %v687_v15 = vld [vmem:[%s3018_s21 + $0xdd8] sm:$0xff]  ;;  %v430_v17 = vld [vmem:[%s3018_s21 + $0x5d0] sm:$0xff] }
  0xfc   : > { %1740 = vmatpush1.msra.mxu1 %v502_v39  ;;  %1670 = vmatprep.subr.mxu0 %v495_v40  ;;  %v686_v18 = vld [vmem:[%s3018_s21 + $0xdd0] sm:$0xff]  ;;  %v423_v19 = vld [vmem:[%s3018_s21 + $0x598] sm:$0xff] }
  0xfd   : > { %1741 = vmatprep.subr.mxu1 %v751_v42  ;;  %1671 = vmatpush2.msra.mxu0 %v494_v43  ;;  %v679_v20 = vld [vmem:[%s3018_s21 + $0xd98] sm:$0xff]  ;;  %v422_v22 = vld [vmem:[%s3018_s21 + $0x590] sm:$0xff] }
  0xfe   : > { %1742 = vmatpush2.msra.mxu1 %v750_v44  ;;  %1672 = vmatprep.subr.mxu0 %v487_v45  ;;  %v678_v23 = vld [vmem:[%s3018_s21 + $0xd90] sm:$0xff]  ;;  %v415_v24 = vld [vmem:[%s3018_s21 + $0x558] sm:$0xff] }
  0xff   : > { %1743 = vmatprep.subr.mxu1 %v743_v46  ;;  %1673 = vmatpush2.msra.mxu0 %v486_v47  ;;  %v671_v25 = vld [vmem:[%s3018_s21 + $0xd58] sm:$0xff]  ;;  %v414_v27 = vld [vmem:[%s3018_s21 + $0x550] sm:$0xff] }
 0x100   : > { %1744 = vmatpush2.msra.mxu1 %v742_v48  ;;  %1674 = vmatprep.subr.mxu0 %v479_v49  ;;  %v670_v28 = vld [vmem:[%s3018_s21 + $0xd50] sm:$0xff]  ;;  %v407_v30 = vld [vmem:[%s3018_s21 + $0x518] sm:$0xff] }
 0x101   : > { %1745 = vmatprep.subr.mxu1 %v735_v50  ;;  %1675 = vmatpush2.msra.mxu0 %v478_v51  ;;  %v663_v31 = vld [vmem:[%s3018_s21 + $0xd18] sm:$0xff]  ;;  %v406_v32 = vld [vmem:[%s3018_s21 + $0x510] sm:$0xff] }
 0x102   : > { %1746 = vmatpush2.msra.mxu1 %v734_v53  ;;  %1676 = vmatprep.subr.mxu0 %v471_v54  ;;  %v662_v33 = vld [vmem:[%s3018_s21 + $0xd10] sm:$0xff]  ;;  %v399_v34 = vld [vmem:[%s3018_s21 + $0x4d8] sm:$0xff] }
 0x103   : > { %1747 = vmatprep.subr.mxu1 %v727_v55  ;;  %1677 = vmatpush2.msra.mxu0 %v470_v56  ;;  %v655_v35 = vld [vmem:[%s3018_s21 + $0xcd8] sm:$0xff]  ;;  %v398_v36 = vld [vmem:[%s3018_s21 + $0x4d0] sm:$0xff] }
 0x104   : > { %1748 = vmatpush2.msra.mxu1 %v726_v57  ;;  %1678 = vmatprep.subr.mxu0 %v463_v58  ;;  %v654_v37 = vld [vmem:[%s3018_s21 + $0xcd0] sm:$0xff]  ;;  %v391_v38 = vld [vmem:[%s3018_s21 + $0x498] sm:$0xff] }
 0x105   : > { %1749 = vmatprep.subr.mxu1 %v719_v59  ;;  %1679 = vmatpush2.msra.mxu0 %v462_v60  ;;  %v647_v39 = vld [vmem:[%s3018_s21 + $0xc98] sm:$0xff]  ;;  %v390_v40 = vld [vmem:[%s3018_s21 + $0x490] sm:$0xff] }
 0x106   : > { %1750 = vmatpush2.msra.mxu1 %v718_v61  ;;  %1680 = vmatprep.subr.mxu0 %v455_v63  ;;  %v646_v42 = vld [vmem:[%s3018_s21 + $0xc90] sm:$0xff]  ;;  %v383_v43 = vld [vmem:[%s3018_s21 + $0x458] sm:$0xff] }
 0x107   : > { %1751 = vmatprep.subr.mxu1 %v711_v0  ;;  %1681 = vmatpush2.msra.mxu0 %v454_v1  ;;  %v639_v44 = vld [vmem:[%s3018_s21 + $0xc58] sm:$0xff]  ;;  %v382_v45 = vld [vmem:[%s3018_s21 + $0x450] sm:$0xff] }
 0x108   : > { %1752 = vmatpush2.msra.mxu1 %v710_v2  ;;  %1682 = vmatprep.subr.mxu0 %v447_v4  ;;  %v638_v46 = vld [vmem:[%s3018_s21 + $0xc50] sm:$0xff]  ;;  %v375_v47 = vld [vmem:[%s3018_s21 + $0x418] sm:$0xff] }
 0x109   : > { %1753 = vmatprep.subr.mxu1 %v703_v5  ;;  %1683 = vmatpush2.msra.mxu0 %v446_v6  ;;  %v631_v48 = vld [vmem:[%s3018_s21 + $0xc18] sm:$0xff]  ;;  %v374_v49 = vld [vmem:[%s3018_s21 + $0x410] sm:$0xff] }
 0x10a   : > { %1754 = vmatpush2.msra.mxu1 %v702_v7  ;;  %1684 = vmatprep.subr.mxu0 %v439_v9  ;;  %v630_v50 = vld [vmem:[%s3018_s21 + $0xc10] sm:$0xff]  ;;  %v879_v51 = vld [vmem:[%s3018_s21 + $0x13d8] sm:$0xff] }
 0x10b   : > { %1755 = vmatprep.subr.mxu1 %v695_v10  ;;  %1685 = vmatpush2.msra.mxu0 %v438_v12  ;;  %v1135_v53 = vld [vmem:[%s3018_s21 + $0x1bd8] sm:$0xff]  ;;  %v878_v54 = vld [vmem:[%s3018_s21 + $0x13d0] sm:$0xff] }
 0x10c   : > { %1756 = vmatpush2.msra.mxu1 %v694_v13  ;;  %1686 = vmatprep.subr.mxu0 %v431_v14  ;;  %v1134_v55 = vld [vmem:[%s3018_s21 + $0x1bd0] sm:$0xff]  ;;  %v871_v56 = vld [vmem:[%s3018_s21 + $0x1398] sm:$0xff] }
 0x10d   : > { %1757 = vmatprep.subr.mxu1 %v687_v15  ;;  %1687 = vmatpush2.msra.mxu0 %v430_v17  ;;  %v1127_v57 = vld [vmem:[%s3018_s21 + $0x1b98] sm:$0xff]  ;;  %v870_v58 = vld [vmem:[%s3018_s21 + $0x1390] sm:$0xff] }
 0x10e   : > { %1758 = vmatpush2.msra.mxu1 %v686_v18  ;;  %1688 = vmatprep.subr.mxu0 %v423_v19  ;;  %v1126_v59 = vld [vmem:[%s3018_s21 + $0x1b90] sm:$0xff]  ;;  %v863_v60 = vld [vmem:[%s3018_s21 + $0x1358] sm:$0xff] }
 0x10f   : > { %1759 = vmatprep.subr.mxu1 %v679_v20  ;;  %1689 = vmatpush2.msra.mxu0 %v422_v22  ;;  %v1119_v61 = vld [vmem:[%s3018_s21 + $0x1b58] sm:$0xff]  ;;  %v862_v63 = vld [vmem:[%s3018_s21 + $0x1350] sm:$0xff] }
 0x110   : > { %1760 = vmatpush2.msra.mxu1 %v678_v23  ;;  %1690 = vmatprep.subr.mxu0 %v415_v24  ;;  %v1118_v0 = vld [vmem:[%s3018_s21 + $0x1b50] sm:$0xff]  ;;  %v855_v1 = vld [vmem:[%s3018_s21 + $0x1318] sm:$0xff] }
 0x111   : > { %1761 = vmatprep.subr.mxu1 %v671_v25  ;;  %1691 = vmatpush2.msra.mxu0 %v414_v27  ;;  %v1111_v2 = vld [vmem:[%s3018_s21 + $0x1b18] sm:$0xff]  ;;  %v854_v4 = vld [vmem:[%s3018_s21 + $0x1310] sm:$0xff] }
 0x112   : > { %1762 = vmatpush2.msra.mxu1 %v670_v28  ;;  %1692 = vmatprep.subr.mxu0 %v407_v30  ;;  %v1110_v5 = vld [vmem:[%s3018_s21 + $0x1b10] sm:$0xff]  ;;  %v847_v6 = vld [vmem:[%s3018_s21 + $0x12d8] sm:$0xff] }
 0x113   : > { %1763 = vmatprep.subr.mxu1 %v663_v31  ;;  %1693 = vmatpush2.msra.mxu0 %v406_v32  ;;  %v1103_v7 = vld [vmem:[%s3018_s21 + $0x1ad8] sm:$0xff]  ;;  %v846_v9 = vld [vmem:[%s3018_s21 + $0x12d0] sm:$0xff] }
 0x114   : > { %1764 = vmatpush2.msra.mxu1 %v662_v33  ;;  %1694 = vmatprep.subr.mxu0 %v399_v34  ;;  %v1102_v10 = vld [vmem:[%s3018_s21 + $0x1ad0] sm:$0xff]  ;;  %v839_v12 = vld [vmem:[%s3018_s21 + $0x1298] sm:$0xff] }
 0x115   : > { %1765 = vmatprep.subr.mxu1 %v655_v35  ;;  %1695 = vmatpush2.msra.mxu0 %v398_v36  ;;  %v1095_v13 = vld [vmem:[%s3018_s21 + $0x1a98] sm:$0xff]  ;;  %v838_v14 = vld [vmem:[%s3018_s21 + $0x1290] sm:$0xff] }
 0x116   : > { %1766 = vmatpush2.msra.mxu1 %v654_v37  ;;  %1696 = vmatprep.subr.mxu0 %v391_v38  ;;  %v1094_v15 = vld [vmem:[%s3018_s21 + $0x1a90] sm:$0xff]  ;;  %v831_v17 = vld [vmem:[%s3018_s21 + $0x1258] sm:$0xff] }
 0x117   : > { %1767 = vmatprep.subr.mxu1 %v647_v39  ;;  %1697 = vmatpush2.msra.mxu0 %v390_v40  ;;  %v1087_v18 = vld [vmem:[%s3018_s21 + $0x1a58] sm:$0xff]  ;;  %v830_v19 = vld [vmem:[%s3018_s21 + $0x1250] sm:$0xff] }
 0x118   : > { %1768 = vmatpush2.msra.mxu1 %v646_v42  ;;  %1698 = vmatprep.subr.mxu0 %v383_v43  ;;  %v1086_v20 = vld [vmem:[%s3018_s21 + $0x1a50] sm:$0xff]  ;;  %v823_v22 = vld [vmem:[%s3018_s21 + $0x1218] sm:$0xff] }
 0x119   : > { %1769 = vmatprep.subr.mxu1 %v639_v44  ;;  %1699 = vmatpush2.msra.mxu0 %v382_v45  ;;  %v1079_v23 = vld [vmem:[%s3018_s21 + $0x1a18] sm:$0xff]  ;;  %v822_v24 = vld [vmem:[%s3018_s21 + $0x1210] sm:$0xff] }
 0x11a   : > { %1770 = vmatpush2.msra.mxu1 %v638_v46  ;;  %1700 = vmatprep.subr.mxu0 %v375_v47  ;;  %v1078_v25 = vld [vmem:[%s3018_s21 + $0x1a10] sm:$0xff]  ;;  %v815_v27 = vld [vmem:[%s3018_s21 + $0x11d8] sm:$0xff] }
 0x11b   : > { %1771 = vmatprep.subr.mxu1 %v631_v48  ;;  %1701 = vmatpush2.msra.mxu0 %v374_v49  ;;  %v1071_v28 = vld [vmem:[%s3018_s21 + $0x19d8] sm:$0xff]  ;;  %v814_v30 = vld [vmem:[%s3018_s21 + $0x11d0] sm:$0xff] }
 0x11c   : > { %1702 = vmatprep.mubr.f32.mxu0 %v3163_v8  ;;  %1772 = vmatpush2.msra.mxu1 %v630_v50  ;;  %v1070_v31 = vld [vmem:[%s3018_s21 + $0x19d0] sm:$0xff]  ;;  %v807_v32 = vld [vmem:[%s3018_s21 + $0x1198] sm:$0xff] }
 0x11d   : > { %1703 = vmatmul.mubr.f32.vlgmr.msra.gmra.mxu0 %v3148_v62  ;;  %1773 = vmatprep.mubr.f32.mxu1 %v3169_v11  ;;  %v1063_v33 = vld [vmem:[%s3018_s21 + $0x1998] sm:$0xff]  ;;  %v806_v34 = vld [vmem:[%s3018_s21 + $0x1190] sm:$0xff] }
 0x11e   : > { %1780 = vmatprep.subr.mxu0 %v879_v51  ;;  %1851 = vmatprep.subr.mxu1 %v1135_v53  ;;  %v1062_v35 = vld [vmem:[%s3018_s21 + $0x1990] sm:$0xff]  ;;  %v799_v36 = vld [vmem:[%s3018_s21 + $0x1158] sm:$0xff] }
 0x11f   : > { %1774 = vmatmul.mubr.f32.vlgmr.msra.gmra.mxu1 %v3155_v3  ;;  %1781 = vmatpush1.msra.mxu0 %v878_v54  ;;  %v1055_v37 = vld [vmem:[%s3018_s21 + $0x1958] sm:$0xff]  ;;  %v798_v38 = vld [vmem:[%s3018_s21 + $0x1150] sm:$0xff] }
 0x120   : > { %1852 = vmatpush1.msra.mxu1 %v1134_v55  ;;  %1782 = vmatprep.subr.mxu0 %v871_v56  ;;  %v1054_v39 = vld [vmem:[%s3018_s21 + $0x1950] sm:$0xff]  ;;  %v791_v40 = vld [vmem:[%s3018_s21 + $0x1118] sm:$0xff] }
 0x121   : > { %1853 = vmatprep.subr.mxu1 %v1127_v57  ;;  %1783 = vmatpush1.msra.mxu0 %v870_v58  ;;  %v1047_v42 = vld [vmem:[%s3018_s21 + $0x1918] sm:$0xff]  ;;  %v790_v43 = vld [vmem:[%s3018_s21 + $0x1110] sm:$0xff] }
 0x122   : > { %1854 = vmatpush1.msra.mxu1 %v1126_v59  ;;  %1784 = vmatprep.subr.mxu0 %v863_v60  ;;  %v1046_v44 = vld [vmem:[%s3018_s21 + $0x1910] sm:$0xff]  ;;  %v783_v45 = vld [vmem:[%s3018_s21 + $0x10d8] sm:$0xff] }
 0x123   : > { %1855 = vmatprep.subr.mxu1 %v1119_v61  ;;  %1785 = vmatpush1.msra.mxu0 %v862_v63  ;;  %v1039_v46 = vld [vmem:[%s3018_s21 + $0x18d8] sm:$0xff]  ;;  %v782_v47 = vld [vmem:[%s3018_s21 + $0x10d0] sm:$0xff] }
 0x124   : > { %1856 = vmatpush1.msra.mxu1 %v1118_v0  ;;  %1786 = vmatprep.subr.mxu0 %v855_v1  ;;  %v1038_v48 = vld [vmem:[%s3018_s21 + $0x18d0] sm:$0xff]  ;;  %v775_v49 = vld [vmem:[%s3018_s21 + $0x1098] sm:$0xff] }
 0x125   : > { %1857 = vmatprep.subr.mxu1 %v1111_v2  ;;  %1787 = vmatpush1.msra.mxu0 %v854_v4  ;;  %v1031_v50 = vld [vmem:[%s3018_s21 + $0x1898] sm:$0xff]  ;;  %v774_v51 = vld [vmem:[%s3018_s21 + $0x1090] sm:$0xff] }
 0x126   : > { %1858 = vmatpush1.msra.mxu1 %v1110_v5  ;;  %1788 = vmatprep.subr.mxu0 %v847_v6  ;;  %v1030_v53 = vld [vmem:[%s3018_s21 + $0x1890] sm:$0xff]  ;;  %v767_v54 = vld [vmem:[%s3018_s21 + $0x1058] sm:$0xff] }
 0x127   : > { %1859 = vmatprep.subr.mxu1 %v1103_v7  ;;  %1789 = vmatpush1.msra.mxu0 %v846_v9  ;;  %v1023_v55 = vld [vmem:[%s3018_s21 + $0x1858] sm:$0xff]  ;;  %v766_v56 = vld [vmem:[%s3018_s21 + $0x1050] sm:$0xff] }
 0x128   : > { %1860 = vmatpush1.msra.mxu1 %v1102_v10  ;;  %1790 = vmatprep.subr.mxu0 %v839_v12  ;;  %v1022_v57 = vld [vmem:[%s3018_s21 + $0x1850] sm:$0xff]  ;;  %v759_v58 = vld [vmem:[%s3018_s21 + $0x1018] sm:$0xff] }
 0x129   : > { %1861 = vmatprep.subr.mxu1 %v1095_v13  ;;  %1791 = vmatpush1.msra.mxu0 %v838_v14  ;;  %v1015_v59 = vld [vmem:[%s3018_s21 + $0x1818] sm:$0xff]  ;;  %v758_v60 = vld [vmem:[%s3018_s21 + $0x1010] sm:$0xff] }
 0x12a   : > { %1862 = vmatpush1.msra.mxu1 %v1094_v15  ;;  %1792 = vmatprep.subr.mxu0 %v831_v17  ;;  %v1014_v61 = vld [vmem:[%s3018_s21 + $0x1810] sm:$0xff]  ;;  %v1007_v63 = vld [vmem:[%s3018_s21 + $0x17d8] sm:$0xff] }
 0x12b   : > { %1863 = vmatprep.subr.mxu1 %v1087_v18  ;;  %1793 = vmatpush1.msra.mxu0 %v830_v19  ;;  %v1263_v0 = vld [vmem:[%s3018_s21 + $0x1fd8] sm:$0xff]  ;;  %v1006_v1 = vld [vmem:[%s3018_s21 + $0x17d0] sm:$0xff] }
 0x12c   : > { %1864 = vmatpush1.msra.mxu1 %v1086_v20  ;;  %1794 = vmatprep.subr.mxu0 %v823_v22  ;;  %v1262_v2 = vld [vmem:[%s3018_s21 + $0x1fd0] sm:$0xff]  ;;  %v999_v4 = vld [vmem:[%s3018_s21 + $0x1798] sm:$0xff] }
 0x12d   : > { %1865 = vmatprep.subr.mxu1 %v1079_v23  ;;  %1795 = vmatpush1.msra.mxu0 %v822_v24  ;;  %v1255_v5 = vld [vmem:[%s3018_s21 + $0x1f98] sm:$0xff]  ;;  %v998_v6 = vld [vmem:[%s3018_s21 + $0x1790] sm:$0xff] }
 0x12e   : > { %1866 = vmatpush1.msra.mxu1 %v1078_v25  ;;  %1796 = vmatprep.subr.mxu0 %v815_v27  ;;  %v1254_v7 = vld [vmem:[%s3018_s21 + $0x1f90] sm:$0xff]  ;;  %v991_v9 = vld [vmem:[%s3018_s21 + $0x1758] sm:$0xff] }
 0x12f   : > { %1867 = vmatprep.subr.mxu1 %v1071_v28  ;;  %1797 = vmatpush1.msra.mxu0 %v814_v30  ;;  %v1247_v10 = vld [vmem:[%s3018_s21 + $0x1f58] sm:$0xff]  ;;  %v990_v12 = vld [vmem:[%s3018_s21 + $0x1750] sm:$0xff] }
 0x130   : > { %1868 = vmatpush1.msra.mxu1 %v1070_v31  ;;  %1798 = vmatprep.subr.mxu0 %v807_v32  ;;  %v1246_v13 = vld [vmem:[%s3018_s21 + $0x1f50] sm:$0xff]  ;;  %v983_v14 = vld [vmem:[%s3018_s21 + $0x1718] sm:$0xff] }
 0x131   : > { %1869 = vmatprep.subr.mxu1 %v1063_v33  ;;  %1799 = vmatpush1.msra.mxu0 %v806_v34  ;;  %v1239_v15 = vld [vmem:[%s3018_s21 + $0x1f18] sm:$0xff]  ;;  %v982_v17 = vld [vmem:[%s3018_s21 + $0x1710] sm:$0xff] }
 0x132   : > { %1870 = vmatpush1.msra.mxu1 %v1062_v35  ;;  %1800 = vmatprep.subr.mxu0 %v799_v36  ;;  %v1238_v18 = vld [vmem:[%s3018_s21 + $0x1f10] sm:$0xff]  ;;  %v975_v19 = vld [vmem:[%s3018_s21 + $0x16d8] sm:$0xff] }
 0x133   : > { %1871 = vmatprep.subr.mxu1 %v1055_v37  ;;  %1801 = vmatpush1.msra.mxu0 %v798_v38  ;;  %v1231_v20 = vld [vmem:[%s3018_s21 + $0x1ed8] sm:$0xff]  ;;  %v974_v22 = vld [vmem:[%s3018_s21 + $0x16d0] sm:$0xff] }
 0x134   : > { %1872 = vmatpush1.msra.mxu1 %v1054_v39  ;;  %1802 = vmatprep.subr.mxu0 %v791_v40  ;;  %v1230_v23 = vld [vmem:[%s3018_s21 + $0x1ed0] sm:$0xff]  ;;  %v967_v24 = vld [vmem:[%s3018_s21 + $0x1698] sm:$0xff] }
 0x135   : > { %1873 = vmatprep.subr.mxu1 %v1047_v42  ;;  %1803 = vmatpush1.msra.mxu0 %v790_v43  ;;  %v1223_v25 = vld [vmem:[%s3018_s21 + $0x1e98] sm:$0xff]  ;;  %v966_v27 = vld [vmem:[%s3018_s21 + $0x1690] sm:$0xff] }
 0x136   : > { %1874 = vmatpush1.msra.mxu1 %v1046_v44  ;;  %1804 = vmatprep.subr.mxu0 %v783_v45  ;;  %v1222_v28 = vld [vmem:[%s3018_s21 + $0x1e90] sm:$0xff]  ;;  %v959_v30 = vld [vmem:[%s3018_s21 + $0x1658] sm:$0xff] }
 0x137   : > { %1875 = vmatprep.subr.mxu1 %v1039_v46  ;;  %1805 = vmatpush1.msra.mxu0 %v782_v47  ;;  %v1215_v31 = vld [vmem:[%s3018_s21 + $0x1e58] sm:$0xff]  ;;  %v958_v32 = vld [vmem:[%s3018_s21 + $0x1650] sm:$0xff] }
 0x138   : > { %1876 = vmatpush1.msra.mxu1 %v1038_v48  ;;  %1806 = vmatprep.subr.mxu0 %v775_v49  ;;  %v1214_v33 = vld [vmem:[%s3018_s21 + $0x1e50] sm:$0xff]  ;;  %v951_v34 = vld [vmem:[%s3018_s21 + $0x1618] sm:$0xff] }
 0x139   : > { %1877 = vmatprep.subr.mxu1 %v1031_v50  ;;  %1807 = vmatpush1.msra.mxu0 %v774_v51  ;;  %v1207_v35 = vld [vmem:[%s3018_s21 + $0x1e18] sm:$0xff]  ;;  %v950_v36 = vld [vmem:[%s3018_s21 + $0x1610] sm:$0xff] }
 0x13a   : > { %1878 = vmatpush1.msra.mxu1 %v1030_v53  ;;  %1808 = vmatprep.subr.mxu0 %v767_v54  ;;  %v1206_v37 = vld [vmem:[%s3018_s21 + $0x1e10] sm:$0xff]  ;;  %v943_v38 = vld [vmem:[%s3018_s21 + $0x15d8] sm:$0xff] }
 0x13b   : > { %1879 = vmatprep.subr.mxu1 %v1023_v55  ;;  %1809 = vmatpush1.msra.mxu0 %v766_v56  ;;  %v1199_v39 = vld [vmem:[%s3018_s21 + $0x1dd8] sm:$0xff]  ;;  %v942_v40 = vld [vmem:[%s3018_s21 + $0x15d0] sm:$0xff] }
 0x13c   : > { %1880 = vmatpush1.msra.mxu1 %v1022_v57  ;;  %1810 = vmatprep.subr.mxu0 %v759_v58  ;;  %v1198_v42 = vld [vmem:[%s3018_s21 + $0x1dd0] sm:$0xff]  ;;  %v935_v43 = vld [vmem:[%s3018_s21 + $0x1598] sm:$0xff] }
 0x13d   : > { %1881 = vmatprep.subr.mxu1 %v1015_v59  ;;  %1811 = vmatpush1.msra.mxu0 %v758_v60  ;;  %v1191_v44 = vld [vmem:[%s3018_s21 + $0x1d98] sm:$0xff]  ;;  %v934_v45 = vld [vmem:[%s3018_s21 + $0x1590] sm:$0xff] }
 0x13e   : > { %1882 = vmatpush1.msra.mxu1 %v1014_v61  ;;  %1812 = vmatprep.subr.mxu0 %v1007_v63  ;;  %v1190_v46 = vld [vmem:[%s3018_s21 + $0x1d90] sm:$0xff]  ;;  %v927_v47 = vld [vmem:[%s3018_s21 + $0x1558] sm:$0xff] }
 0x13f   : > { %1883 = vmatprep.subr.mxu1 %v1263_v0  ;;  %1813 = vmatpush2.msra.mxu0 %v1006_v1  ;;  %v1183_v48 = vld [vmem:[%s3018_s21 + $0x1d58] sm:$0xff]  ;;  %v926_v49 = vld [vmem:[%s3018_s21 + $0x1550] sm:$0xff] }
 0x140   : > { %1884 = vmatpush2.msra.mxu1 %v1262_v2  ;;  %1814 = vmatprep.subr.mxu0 %v999_v4  ;;  %v1182_v50 = vld [vmem:[%s3018_s21 + $0x1d50] sm:$0xff]  ;;  %v919_v51 = vld [vmem:[%s3018_s21 + $0x1518] sm:$0xff] }
 0x141   : > { %1885 = vmatprep.subr.mxu1 %v1255_v5  ;;  %1815 = vmatpush2.msra.mxu0 %v998_v6  ;;  %v1175_v53 = vld [vmem:[%s3018_s21 + $0x1d18] sm:$0xff]  ;;  %v918_v54 = vld [vmem:[%s3018_s21 + $0x1510] sm:$0xff] }
 0x142   : > { %1886 = vmatpush2.msra.mxu1 %v1254_v7  ;;  %1816 = vmatprep.subr.mxu0 %v991_v9  ;;  %v1174_v55 = vld [vmem:[%s3018_s21 + $0x1d10] sm:$0xff]  ;;  %v911_v56 = vld [vmem:[%s3018_s21 + $0x14d8] sm:$0xff] }
 0x143   : > { %1887 = vmatprep.subr.mxu1 %v1247_v10  ;;  %1817 = vmatpush2.msra.mxu0 %v990_v12  ;;  %v1167_v57 = vld [vmem:[%s3018_s21 + $0x1cd8] sm:$0xff]  ;;  %v910_v58 = vld [vmem:[%s3018_s21 + $0x14d0] sm:$0xff]  ;;  %v369_v12 = vld [vmem:[%s3018_s21 + $0x3e8] sm:$0xff] }
 0x144   : > { %1888 = vmatpush2.msra.mxu1 %v1246_v13  ;;  %1818 = vmatprep.subr.mxu0 %v983_v14  ;;  %v1166_v59 = vld [vmem:[%s3018_s21 + $0x1cd0] sm:$0xff]  ;;  %v903_v60 = vld [vmem:[%s3018_s21 + $0x1498] sm:$0xff]  ;;  %v625_v13 = vld [vmem:[%s3018_s21 + $0xbe8] sm:$0xff] }
 0x145   : > { %1889 = vmatprep.subr.mxu1 %v1239_v15  ;;  %1819 = vmatpush2.msra.mxu0 %v982_v17  ;;  %v1159_v61 = vld [vmem:[%s3018_s21 + $0x1c98] sm:$0xff]  ;;  %v902_v63 = vld [vmem:[%s3018_s21 + $0x1490] sm:$0xff]  ;;  %v368_v14 = vld [vmem:[%s3018_s21 + $0x3e0] sm:$0xff] }
 0x146   : > { %1890 = vmatpush2.msra.mxu1 %v1238_v18  ;;  %1820 = vmatprep.subr.mxu0 %v975_v19  ;;  %v1158_v0 = vld [vmem:[%s3018_s21 + $0x1c90] sm:$0xff]  ;;  %v895_v1 = vld [vmem:[%s3018_s21 + $0x1458] sm:$0xff]  ;;  %v624_v15 = vld [vmem:[%s3018_s21 + $0xbe0] sm:$0xff] }
 0x147   : > { %1891 = vmatprep.subr.mxu1 %v1231_v20  ;;  %1821 = vmatpush2.msra.mxu0 %v974_v22  ;;  %v1151_v2 = vld [vmem:[%s3018_s21 + $0x1c58] sm:$0xff]  ;;  %v894_v4 = vld [vmem:[%s3018_s21 + $0x1450] sm:$0xff]  ;;  %v361_v17 = vld [vmem:[%s3018_s21 + $0x3a8] sm:$0xff] }
 0x148   : > { %1892 = vmatpush2.msra.mxu1 %v1230_v23  ;;  %1822 = vmatprep.subr.mxu0 %v967_v24  ;;  %v1150_v5 = vld [vmem:[%s3018_s21 + $0x1c50] sm:$0xff]  ;;  %v887_v6 = vld [vmem:[%s3018_s21 + $0x1418] sm:$0xff]  ;;  %v617_v18 = vld [vmem:[%s3018_s21 + $0xba8] sm:$0xff] }
 0x149   : > { %1893 = vmatprep.subr.mxu1 %v1223_v25  ;;  %1823 = vmatpush2.msra.mxu0 %v966_v27  ;;  %v1143_v7 = vld [vmem:[%s3018_s21 + $0x1c18] sm:$0xff]  ;;  %v886_v9 = vld [vmem:[%s3018_s21 + $0x1410] sm:$0xff]  ;;  %v360_v19 = vld [vmem:[%s3018_s21 + $0x3a0] sm:$0xff] }
 0x14a   : > { %1894 = vmatpush2.msra.mxu1 %v1222_v28  ;;  %1824 = vmatprep.subr.mxu0 %v959_v30  ;;  %v1142_v10 = vld [vmem:[%s3018_s21 + $0x1c10] sm:$0xff]  ;;  %v616_v20 = vld [vmem:[%s3018_s21 + $0xba0] sm:$0xff]  ;;  %v353_v22 = vld [vmem:[%s3018_s21 + $0x368] sm:$0xff] }
 0x14b   : > { %1895 = vmatprep.subr.mxu1 %v1215_v31  ;;  %1825 = vmatpush2.msra.mxu0 %v958_v32  ;;  %v609_v23 = vld [vmem:[%s3018_s21 + $0xb68] sm:$0xff]  ;;  %v352_v24 = vld [vmem:[%s3018_s21 + $0x360] sm:$0xff] }
 0x14c   : > { %1896 = vmatpush2.msra.mxu1 %v1214_v33  ;;  %1826 = vmatprep.subr.mxu0 %v951_v34  ;;  %v608_v25 = vld [vmem:[%s3018_s21 + $0xb60] sm:$0xff]  ;;  %v345_v27 = vld [vmem:[%s3018_s21 + $0x328] sm:$0xff] }
 0x14d   : > { %1897 = vmatprep.subr.mxu1 %v1207_v35  ;;  %1827 = vmatpush2.msra.mxu0 %v950_v36  ;;  %v601_v28 = vld [vmem:[%s3018_s21 + $0xb28] sm:$0xff]  ;;  %v344_v30 = vld [vmem:[%s3018_s21 + $0x320] sm:$0xff] }
 0x14e   : > { %1898 = vmatpush2.msra.mxu1 %v1206_v37  ;;  %1828 = vmatprep.subr.mxu0 %v943_v38  ;;  %v600_v31 = vld [vmem:[%s3018_s21 + $0xb20] sm:$0xff]  ;;  %v337_v32 = vld [vmem:[%s3018_s21 + $0x2e8] sm:$0xff] }
 0x14f   : > { %1899 = vmatprep.subr.mxu1 %v1199_v39  ;;  %1829 = vmatpush2.msra.mxu0 %v942_v40  ;;  %v593_v33 = vld [vmem:[%s3018_s21 + $0xae8] sm:$0xff]  ;;  %v336_v34 = vld [vmem:[%s3018_s21 + $0x2e0] sm:$0xff] }
 0x150   : > { %1900 = vmatpush2.msra.mxu1 %v1198_v42  ;;  %1830 = vmatprep.subr.mxu0 %v935_v43  ;;  %v592_v35 = vld [vmem:[%s3018_s21 + $0xae0] sm:$0xff]  ;;  %v329_v36 = vld [vmem:[%s3018_s21 + $0x2a8] sm:$0xff] }
 0x151   : > { %1901 = vmatprep.subr.mxu1 %v1191_v44  ;;  %1831 = vmatpush2.msra.mxu0 %v934_v45  ;;  %v585_v37 = vld [vmem:[%s3018_s21 + $0xaa8] sm:$0xff]  ;;  %v328_v38 = vld [vmem:[%s3018_s21 + $0x2a0] sm:$0xff] }
 0x152   : > { %1902 = vmatpush2.msra.mxu1 %v1190_v46  ;;  %1832 = vmatprep.subr.mxu0 %v927_v47  ;;  %v584_v39 = vld [vmem:[%s3018_s21 + $0xaa0] sm:$0xff]  ;;  %v321_v40 = vld [vmem:[%s3018_s21 + $0x268] sm:$0xff] }
 0x153   : > { %1903 = vmatprep.subr.mxu1 %v1183_v48  ;;  %1833 = vmatpush2.msra.mxu0 %v926_v49  ;;  %v577_v42 = vld [vmem:[%s3018_s21 + $0xa68] sm:$0xff]  ;;  %v320_v43 = vld [vmem:[%s3018_s21 + $0x260] sm:$0xff] }
 0x154   : > { %1904 = vmatpush2.msra.mxu1 %v1182_v50  ;;  %1834 = vmatprep.subr.mxu0 %v919_v51  ;;  %v576_v44 = vld [vmem:[%s3018_s21 + $0xa60] sm:$0xff]  ;;  %v313_v45 = vld [vmem:[%s3018_s21 + $0x228] sm:$0xff] }
 0x155   : > { %1905 = vmatprep.subr.mxu1 %v1175_v53  ;;  %1835 = vmatpush2.msra.mxu0 %v918_v54  ;;  %v569_v46 = vld [vmem:[%s3018_s21 + $0xa28] sm:$0xff]  ;;  %v312_v47 = vld [vmem:[%s3018_s21 + $0x220] sm:$0xff] }
 0x156   : > { %1906 = vmatpush2.msra.mxu1 %v1174_v55  ;;  %1836 = vmatprep.subr.mxu0 %v911_v56  ;;  %v568_v48 = vld [vmem:[%s3018_s21 + $0xa20] sm:$0xff]  ;;  %v305_v49 = vld [vmem:[%s3018_s21 + $0x1e8] sm:$0xff] }
 0x157   : > { %1907 = vmatprep.subr.mxu1 %v1167_v57  ;;  %1837 = vmatpush2.msra.mxu0 %v910_v58  ;;  %v561_v50 = vld [vmem:[%s3018_s21 + $0x9e8] sm:$0xff]  ;;  %v304_v51 = vld [vmem:[%s3018_s21 + $0x1e0] sm:$0xff] }
 0x158   : > { %1908 = vmatpush2.msra.mxu1 %v1166_v59  ;;  %1838 = vmatprep.subr.mxu0 %v903_v60  ;;  %v560_v53 = vld [vmem:[%s3018_s21 + $0x9e0] sm:$0xff]  ;;  %v297_v54 = vld [vmem:[%s3018_s21 + $0x1a8] sm:$0xff] }
 0x159   : > { %1909 = vmatprep.subr.mxu1 %v1159_v61  ;;  %1839 = vmatpush2.msra.mxu0 %v902_v63  ;;  %v553_v55 = vld [vmem:[%s3018_s21 + $0x9a8] sm:$0xff]  ;;  %v296_v56 = vld [vmem:[%s3018_s21 + $0x1a0] sm:$0xff] }
 0x15a   : > { %1910 = vmatpush2.msra.mxu1 %v1158_v0  ;;  %1840 = vmatprep.subr.mxu0 %v895_v1  ;;  %v552_v57 = vld [vmem:[%s3018_s21 + $0x9a0] sm:$0xff]  ;;  %v289_v58 = vld [vmem:[%s3018_s21 + $0x168] sm:$0xff] }
 0x15b   : > { %1911 = vmatprep.subr.mxu1 %v1151_v2  ;;  %1841 = vmatpush2.msra.mxu0 %v894_v4  ;;  %v545_v59 = vld [vmem:[%s3018_s21 + $0x968] sm:$0xff]  ;;  %v288_v60 = vld [vmem:[%s3018_s21 + $0x160] sm:$0xff] }
 0x15c   : > { %1912 = vmatpush2.msra.mxu1 %v1150_v5  ;;  %1842 = vmatprep.subr.mxu0 %v887_v6  ;;  %v544_v61 = vld [vmem:[%s3018_s21 + $0x960] sm:$0xff]  ;;  %v281_v63 = vld [vmem:[%s3018_s21 + $0x128] sm:$0xff] }
 0x15d   : > { %1913 = vmatprep.subr.mxu1 %v1143_v7  ;;  %1843 = vmatpush2.msra.mxu0 %v886_v9  ;;  %v537_v0 = vld [vmem:[%s3018_s21 + $0x928] sm:$0xff]  ;;  %v280_v1 = vld [vmem:[%s3018_s21 + $0x120] sm:$0xff] }
 0x15e   : > { %1844 = vmatprep.mubr.f32.mxu0 %v3309_v26  ;;  %1914 = vmatpush2.msra.mxu1 %v1142_v10  ;;  %v536_v2 = vld [vmem:[%s3018_s21 + $0x920] sm:$0xff]  ;;  %v273_v4 = vld [vmem:[%s3018_s21 + $0xe8] sm:$0xff] }
 0x15f   : > { %1845 = vmatmul.mubr.f32.vlgmr.msra.gmra.mxu0 %v3294_v16  ;;  %1915 = vmatprep.mubr.f32.mxu1 %v3315_v29  ;;  %v529_v5 = vld [vmem:[%s3018_s21 + $0x8e8] sm:$0xff]  ;;  %v272_v6 = vld [vmem:[%s3018_s21 + $0xe0] sm:$0xff] }
 0x160   : > { %1922 = vmatprep.subr.mxu0 %v369_v12  ;;  %1993 = vmatprep.subr.mxu1 %v625_v13  ;;  %v528_v7 = vld [vmem:[%s3018_s21 + $0x8e0] sm:$0xff]  ;;  %v265_v9 = vld [vmem:[%s3018_s21 + $0xa8] sm:$0xff] }
 0x161   : > { %1916 = vmatmul.mubr.f32.vlgmr.msra.gmra.mxu1 %v3301_v21  ;;  %1923 = vmatpush1.msra.mxu0 %v368_v14  ;;  %v521_v10 = vld [vmem:[%s3018_s21 + $0x8a8] sm:$0xff]  ;;  %v264_v12 = vld [vmem:[%s3018_s21 + $0xa0] sm:$0xff] }
 0x162   : > { %1994 = vmatpush1.msra.mxu1 %v624_v15  ;;  %1924 = vmatprep.subr.mxu0 %v361_v17  ;;  %v520_v13 = vld [vmem:[%s3018_s21 + $0x8a0] sm:$0xff]  ;;  %v257_v14 = vld [vmem:[%s3018_s21 + $0x68] sm:$0xff] }
 0x163   : > { %1995 = vmatprep.subr.mxu1 %v617_v18  ;;  %1925 = vmatpush1.msra.mxu0 %v360_v19  ;;  %v513_v15 = vld [vmem:[%s3018_s21 + $0x868] sm:$0xff]  ;;  %v256_v17 = vld [vmem:[%s3018_s21 + $0x60] sm:$0xff] }
 0x164   : > { %1996 = vmatpush1.msra.mxu1 %v616_v20  ;;  %1926 = vmatprep.subr.mxu0 %v353_v22  ;;  %v512_v18 = vld [vmem:[%s3018_s21 + $0x860] sm:$0xff]  ;;  %v249_v19 = vld [vmem:[%s3018_s21 + $0x28] sm:$0xff] }
 0x165   : > { %1997 = vmatprep.subr.mxu1 %v609_v23  ;;  %1927 = vmatpush1.msra.mxu0 %v352_v24  ;;  %v505_v20 = vld [vmem:[%s3018_s21 + $0x828] sm:$0xff]  ;;  %v248_v22 = vld [vmem:[%s3018_s21 + $0x20] sm:$0xff] }
 0x166   : > { %1998 = vmatpush1.msra.mxu1 %v608_v25  ;;  %1928 = vmatprep.subr.mxu0 %v345_v27  ;;  %v504_v23 = vld [vmem:[%s3018_s21 + $0x820] sm:$0xff]  ;;  %v497_v24 = vld [vmem:[%s3018_s21 + $0x7e8] sm:$0xff] }
 0x167   : > { %1999 = vmatprep.subr.mxu1 %v601_v28  ;;  %1929 = vmatpush1.msra.mxu0 %v344_v30  ;;  %v753_v25 = vld [vmem:[%s3018_s21 + $0xfe8] sm:$0xff]  ;;  %v496_v27 = vld [vmem:[%s3018_s21 + $0x7e0] sm:$0xff] }
 0x168   : > { %2000 = vmatpush1.msra.mxu1 %v600_v31  ;;  %1930 = vmatprep.subr.mxu0 %v337_v32  ;;  %v752_v28 = vld [vmem:[%s3018_s21 + $0xfe0] sm:$0xff]  ;;  %v489_v30 = vld [vmem:[%s3018_s21 + $0x7a8] sm:$0xff] }
 0x169   : > { %2001 = vmatprep.subr.mxu1 %v593_v33  ;;  %1931 = vmatpush1.msra.mxu0 %v336_v34  ;;  %v745_v31 = vld [vmem:[%s3018_s21 + $0xfa8] sm:$0xff]  ;;  %v488_v32 = vld [vmem:[%s3018_s21 + $0x7a0] sm:$0xff] }
 0x16a   : > { %2002 = vmatpush1.msra.mxu1 %v592_v35  ;;  %1932 = vmatprep.subr.mxu0 %v329_v36  ;;  %v744_v33 = vld [vmem:[%s3018_s21 + $0xfa0] sm:$0xff]  ;;  %v481_v34 = vld [vmem:[%s3018_s21 + $0x768] sm:$0xff] }
 0x16b   : > { %2003 = vmatprep.subr.mxu1 %v585_v37  ;;  %1933 = vmatpush1.msra.mxu0 %v328_v38  ;;  %v737_v35 = vld [vmem:[%s3018_s21 + $0xf68] sm:$0xff]  ;;  %v480_v36 = vld [vmem:[%s3018_s21 + $0x760] sm:$0xff] }
 0x16c   : > { %2004 = vmatpush1.msra.mxu1 %v584_v39  ;;  %1934 = vmatprep.subr.mxu0 %v321_v40  ;;  %v736_v37 = vld [vmem:[%s3018_s21 + $0xf60] sm:$0xff]  ;;  %v473_v38 = vld [vmem:[%s3018_s21 + $0x728] sm:$0xff] }
 0x16d   : > { %2005 = vmatprep.subr.mxu1 %v577_v42  ;;  %1935 = vmatpush1.msra.mxu0 %v320_v43  ;;  %v729_v39 = vld [vmem:[%s3018_s21 + $0xf28] sm:$0xff]  ;;  %v472_v40 = vld [vmem:[%s3018_s21 + $0x720] sm:$0xff] }
 0x16e   : > { %2006 = vmatpush1.msra.mxu1 %v576_v44  ;;  %1936 = vmatprep.subr.mxu0 %v313_v45  ;;  %v728_v42 = vld [vmem:[%s3018_s21 + $0xf20] sm:$0xff]  ;;  %v465_v43 = vld [vmem:[%s3018_s21 + $0x6e8] sm:$0xff] }
 0x16f   : > { %2007 = vmatprep.subr.mxu1 %v569_v46  ;;  %1937 = vmatpush1.msra.mxu0 %v312_v47  ;;  %v721_v44 = vld [vmem:[%s3018_s21 + $0xee8] sm:$0xff]  ;;  %v464_v45 = vld [vmem:[%s3018_s21 + $0x6e0] sm:$0xff] }
 0x170   : > { %2008 = vmatpush1.msra.mxu1 %v568_v48  ;;  %1938 = vmatprep.subr.mxu0 %v305_v49  ;;  %v720_v46 = vld [vmem:[%s3018_s21 + $0xee0] sm:$0xff]  ;;  %v457_v47 = vld [vmem:[%s3018_s21 + $0x6a8] sm:$0xff] }
 0x171   : > { %2009 = vmatprep.subr.mxu1 %v561_v50  ;;  %1939 = vmatpush1.msra.mxu0 %v304_v51  ;;  %v713_v48 = vld [vmem:[%s3018_s21 + $0xea8] sm:$0xff]  ;;  %v456_v49 = vld [vmem:[%s3018_s21 + $0x6a0] sm:$0xff] }
 0x172   : > { %2010 = vmatpush1.msra.mxu1 %v560_v53  ;;  %1940 = vmatprep.subr.mxu0 %v297_v54  ;;  %v712_v50 = vld [vmem:[%s3018_s21 + $0xea0] sm:$0xff]  ;;  %v449_v51 = vld [vmem:[%s3018_s21 + $0x668] sm:$0xff] }
 0x173   : > { %2011 = vmatprep.subr.mxu1 %v553_v55  ;;  %1941 = vmatpush1.msra.mxu0 %v296_v56  ;;  %v705_v53 = vld [vmem:[%s3018_s21 + $0xe68] sm:$0xff]  ;;  %v448_v54 = vld [vmem:[%s3018_s21 + $0x660] sm:$0xff] }
 0x174   : > { %2012 = vmatpush1.msra.mxu1 %v552_v57  ;;  %1942 = vmatprep.subr.mxu0 %v289_v58  ;;  %v704_v55 = vld [vmem:[%s3018_s21 + $0xe60] sm:$0xff]  ;;  %v441_v56 = vld [vmem:[%s3018_s21 + $0x628] sm:$0xff] }
 0x175   : > { %2013 = vmatprep.subr.mxu1 %v545_v59  ;;  %1943 = vmatpush1.msra.mxu0 %v288_v60  ;;  %v697_v57 = vld [vmem:[%s3018_s21 + $0xe28] sm:$0xff]  ;;  %v440_v58 = vld [vmem:[%s3018_s21 + $0x620] sm:$0xff] }
 0x176   : > { %2014 = vmatpush1.msra.mxu1 %v544_v61  ;;  %1944 = vmatprep.subr.mxu0 %v281_v63  ;;  %v696_v59 = vld [vmem:[%s3018_s21 + $0xe20] sm:$0xff]  ;;  %v433_v60 = vld [vmem:[%s3018_s21 + $0x5e8] sm:$0xff] }
 0x177   : > { %2015 = vmatprep.subr.mxu1 %v537_v0  ;;  %1945 = vmatpush1.msra.mxu0 %v280_v1  ;;  %v689_v61 = vld [vmem:[%s3018_s21 + $0xde8] sm:$0xff]  ;;  %v432_v63 = vld [vmem:[%s3018_s21 + $0x5e0] sm:$0xff] }
 0x178   : > { %2016 = vmatpush1.msra.mxu1 %v536_v2  ;;  %1946 = vmatprep.subr.mxu0 %v273_v4  ;;  %v688_v0 = vld [vmem:[%s3018_s21 + $0xde0] sm:$0xff]  ;;  %v425_v1 = vld [vmem:[%s3018_s21 + $0x5a8] sm:$0xff] }
 0x179   : > { %2017 = vmatprep.subr.mxu1 %v529_v5  ;;  %1947 = vmatpush1.msra.mxu0 %v272_v6  ;;  %v681_v2 = vld [vmem:[%s3018_s21 + $0xda8] sm:$0xff]  ;;  %v424_v4 = vld [vmem:[%s3018_s21 + $0x5a0] sm:$0xff] }
 0x17a   : > { %2018 = vmatpush1.msra.mxu1 %v528_v7  ;;  %1948 = vmatprep.subr.mxu0 %v265_v9  ;;  %v680_v5 = vld [vmem:[%s3018_s21 + $0xda0] sm:$0xff]  ;;  %v417_v6 = vld [vmem:[%s3018_s21 + $0x568] sm:$0xff] }
 0x17b   : > { %2019 = vmatprep.subr.mxu1 %v521_v10  ;;  %1949 = vmatpush1.msra.mxu0 %v264_v12  ;;  %v673_v7 = vld [vmem:[%s3018_s21 + $0xd68] sm:$0xff]  ;;  %v416_v9 = vld [vmem:[%s3018_s21 + $0x560] sm:$0xff] }
 0x17c   : > { %2020 = vmatpush1.msra.mxu1 %v520_v13  ;;  %1950 = vmatprep.subr.mxu0 %v257_v14  ;;  %v672_v10 = vld [vmem:[%s3018_s21 + $0xd60] sm:$0xff]  ;;  %v409_v12 = vld [vmem:[%s3018_s21 + $0x528] sm:$0xff] }
 0x17d   : > { %2021 = vmatprep.subr.mxu1 %v513_v15  ;;  %1951 = vmatpush1.msra.mxu0 %v256_v17  ;;  %v665_v13 = vld [vmem:[%s3018_s21 + $0xd28] sm:$0xff]  ;;  %v408_v14 = vld [vmem:[%s3018_s21 + $0x520] sm:$0xff] }
 0x17e   : > { %2022 = vmatpush1.msra.mxu1 %v512_v18  ;;  %1952 = vmatprep.subr.mxu0 %v249_v19  ;;  %v664_v15 = vld [vmem:[%s3018_s21 + $0xd20] sm:$0xff]  ;;  %v401_v17 = vld [vmem:[%s3018_s21 + $0x4e8] sm:$0xff] }
 0x17f   : > { %2023 = vmatprep.subr.mxu1 %v505_v20  ;;  %1953 = vmatpush1.msra.mxu0 %v248_v22  ;;  %v657_v18 = vld [vmem:[%s3018_s21 + $0xce8] sm:$0xff]  ;;  %v400_v19 = vld [vmem:[%s3018_s21 + $0x4e0] sm:$0xff] }
 0x180   : > { %2024 = vmatpush1.msra.mxu1 %v504_v23  ;;  %1954 = vmatprep.subr.mxu0 %v497_v24  ;;  %v656_v20 = vld [vmem:[%s3018_s21 + $0xce0] sm:$0xff]  ;;  %v393_v22 = vld [vmem:[%s3018_s21 + $0x4a8] sm:$0xff] }
 0x181   : > { %2025 = vmatprep.subr.mxu1 %v753_v25  ;;  %1955 = vmatpush2.msra.mxu0 %v496_v27  ;;  %v649_v23 = vld [vmem:[%s3018_s21 + $0xca8] sm:$0xff]  ;;  %v392_v24 = vld [vmem:[%s3018_s21 + $0x4a0] sm:$0xff] }
 0x182   : > { %2026 = vmatpush2.msra.mxu1 %v752_v28  ;;  %1956 = vmatprep.subr.mxu0 %v489_v30  ;;  %v648_v25 = vld [vmem:[%s3018_s21 + $0xca0] sm:$0xff]  ;;  %v385_v27 = vld [vmem:[%s3018_s21 + $0x468] sm:$0xff] }
 0x183   : > { %2027 = vmatprep.subr.mxu1 %v745_v31  ;;  %1957 = vmatpush2.msra.mxu0 %v488_v32  ;;  %v641_v28 = vld [vmem:[%s3018_s21 + $0xc68] sm:$0xff]  ;;  %v384_v30 = vld [vmem:[%s3018_s21 + $0x460] sm:$0xff] }
 0x184   : > { %2028 = vmatpush2.msra.mxu1 %v744_v33  ;;  %1958 = vmatprep.subr.mxu0 %v481_v34  ;;  %v640_v31 = vld [vmem:[%s3018_s21 + $0xc60] sm:$0xff]  ;;  %v377_v32 = vld [vmem:[%s3018_s21 + $0x428] sm:$0xff] }
 0x185   : > { %2029 = vmatprep.subr.mxu1 %v737_v35  ;;  %1959 = vmatpush2.msra.mxu0 %v480_v36  ;;  %v633_v33 = vld [vmem:[%s3018_s21 + $0xc28] sm:$0xff]  ;;  %v376_v34 = vld [vmem:[%s3018_s21 + $0x420] sm:$0xff] }
 0x186   : > { %2030 = vmatpush2.msra.mxu1 %v736_v37  ;;  %1960 = vmatprep.subr.mxu0 %v473_v38  ;;  %v632_v35 = vld [vmem:[%s3018_s21 + $0xc20] sm:$0xff]  ;;  %v881_v36 = vld [vmem:[%s3018_s21 + $0x13e8] sm:$0xff] }
 0x187   : > { %2031 = vmatprep.subr.mxu1 %v729_v39  ;;  %1961 = vmatpush2.msra.mxu0 %v472_v40  ;;  %v1137_v37 = vld [vmem:[%s3018_s21 + $0x1be8] sm:$0xff]  ;;  %v880_v38 = vld [vmem:[%s3018_s21 + $0x13e0] sm:$0xff] }
 0x188   : > { %2032 = vmatpush2.msra.mxu1 %v728_v42  ;;  %1962 = vmatprep.subr.mxu0 %v465_v43  ;;  %v1136_v39 = vld [vmem:[%s3018_s21 + $0x1be0] sm:$0xff]  ;;  %v873_v40 = vld [vmem:[%s3018_s21 + $0x13a8] sm:$0xff] }
 0x189   : > { %2033 = vmatprep.subr.mxu1 %v721_v44  ;;  %1963 = vmatpush2.msra.mxu0 %v464_v45  ;;  %v1129_v42 = vld [vmem:[%s3018_s21 + $0x1ba8] sm:$0xff]  ;;  %v872_v43 = vld [vmem:[%s3018_s21 + $0x13a0] sm:$0xff] }
 0x18a   : > { %2034 = vmatpush2.msra.mxu1 %v720_v46  ;;  %1964 = vmatprep.subr.mxu0 %v457_v47  ;;  %v1128_v44 = vld [vmem:[%s3018_s21 + $0x1ba0] sm:$0xff]  ;;  %v865_v45 = vld [vmem:[%s3018_s21 + $0x1368] sm:$0xff] }
 0x18b   : > { %2035 = vmatprep.subr.mxu1 %v713_v48  ;;  %1965 = vmatpush2.msra.mxu0 %v456_v49  ;;  %v1121_v46 = vld [vmem:[%s3018_s21 + $0x1b68] sm:$0xff]  ;;  %v864_v47 = vld [vmem:[%s3018_s21 + $0x1360] sm:$0xff] }
 0x18c   : > { %2036 = vmatpush2.msra.mxu1 %v712_v50  ;;  %1966 = vmatprep.subr.mxu0 %v449_v51  ;;  %v1120_v48 = vld [vmem:[%s3018_s21 + $0x1b60] sm:$0xff]  ;;  %v857_v49 = vld [vmem:[%s3018_s21 + $0x1328] sm:$0xff] }
 0x18d   : > { %2037 = vmatprep.subr.mxu1 %v705_v53  ;;  %1967 = vmatpush2.msra.mxu0 %v448_v54  ;;  %v1113_v50 = vld [vmem:[%s3018_s21 + $0x1b28] sm:$0xff]  ;;  %v856_v51 = vld [vmem:[%s3018_s21 + $0x1320] sm:$0xff] }
 0x18e   : > { %2038 = vmatpush2.msra.mxu1 %v704_v55  ;;  %1968 = vmatprep.subr.mxu0 %v441_v56  ;;  %v1112_v53 = vld [vmem:[%s3018_s21 + $0x1b20] sm:$0xff]  ;;  %v849_v54 = vld [vmem:[%s3018_s21 + $0x12e8] sm:$0xff] }
 0x18f   : > { %2039 = vmatprep.subr.mxu1 %v697_v57  ;;  %1969 = vmatpush2.msra.mxu0 %v440_v58  ;;  %v1105_v55 = vld [vmem:[%s3018_s21 + $0x1ae8] sm:$0xff]  ;;  %v848_v56 = vld [vmem:[%s3018_s21 + $0x12e0] sm:$0xff] }
 0x190   : > { %2040 = vmatpush2.msra.mxu1 %v696_v59  ;;  %1970 = vmatprep.subr.mxu0 %v433_v60  ;;  %v1104_v57 = vld [vmem:[%s3018_s21 + $0x1ae0] sm:$0xff]  ;;  %v841_v58 = vld [vmem:[%s3018_s21 + $0x12a8] sm:$0xff] }
 0x191   : > { %2041 = vmatprep.subr.mxu1 %v689_v61  ;;  %1971 = vmatpush2.msra.mxu0 %v432_v63  ;;  %v1097_v59 = vld [vmem:[%s3018_s21 + $0x1aa8] sm:$0xff]  ;;  %v840_v60 = vld [vmem:[%s3018_s21 + $0x12a0] sm:$0xff] }
 0x192   : > { %2042 = vmatpush2.msra.mxu1 %v688_v0  ;;  %1972 = vmatprep.subr.mxu0 %v425_v1  ;;  %v1096_v61 = vld [vmem:[%s3018_s21 + $0x1aa0] sm:$0xff]  ;;  %v833_v63 = vld [vmem:[%s3018_s21 + $0x1268] sm:$0xff] }
 0x193   : > { %2043 = vmatprep.subr.mxu1 %v681_v2  ;;  %1973 = vmatpush2.msra.mxu0 %v424_v4  ;;  %v1089_v0 = vld [vmem:[%s3018_s21 + $0x1a68] sm:$0xff]  ;;  %v832_v1 = vld [vmem:[%s3018_s21 + $0x1260] sm:$0xff] }
 0x194   : > { %2044 = vmatpush2.msra.mxu1 %v680_v5  ;;  %1974 = vmatprep.subr.mxu0 %v417_v6  ;;  %v1088_v2 = vld [vmem:[%s3018_s21 + $0x1a60] sm:$0xff]  ;;  %v825_v4 = vld [vmem:[%s3018_s21 + $0x1228] sm:$0xff] }
 0x195   : > { %2045 = vmatprep.subr.mxu1 %v673_v7  ;;  %1975 = vmatpush2.msra.mxu0 %v416_v9  ;;  %v1081_v5 = vld [vmem:[%s3018_s21 + $0x1a28] sm:$0xff]  ;;  %v824_v6 = vld [vmem:[%s3018_s21 + $0x1220] sm:$0xff] }
 0x196   : > { %2046 = vmatpush2.msra.mxu1 %v672_v10  ;;  %1976 = vmatprep.subr.mxu0 %v409_v12  ;;  %v1080_v7 = vld [vmem:[%s3018_s21 + $0x1a20] sm:$0xff]  ;;  %v817_v9 = vld [vmem:[%s3018_s21 + $0x11e8] sm:$0xff] }
 0x197   : > { %2047 = vmatprep.subr.mxu1 %v665_v13  ;;  %1977 = vmatpush2.msra.mxu0 %v408_v14  ;;  %v1073_v10 = vld [vmem:[%s3018_s21 + $0x19e8] sm:$0xff]  ;;  %v816_v12 = vld [vmem:[%s3018_s21 + $0x11e0] sm:$0xff] }
 0x198   : > { %2048 = vmatpush2.msra.mxu1 %v664_v15  ;;  %1978 = vmatprep.subr.mxu0 %v401_v17  ;;  %v1072_v13 = vld [vmem:[%s3018_s21 + $0x19e0] sm:$0xff]  ;;  %v809_v14 = vld [vmem:[%s3018_s21 + $0x11a8] sm:$0xff] }
 0x199   : > { %2049 = vmatprep.subr.mxu1 %v657_v18  ;;  %1979 = vmatpush2.msra.mxu0 %v400_v19  ;;  %v1065_v15 = vld [vmem:[%s3018_s21 + $0x19a8] sm:$0xff]  ;;  %v808_v17 = vld [vmem:[%s3018_s21 + $0x11a0] sm:$0xff] }
 0x19a   : > { %2050 = vmatpush2.msra.mxu1 %v656_v20  ;;  %1980 = vmatprep.subr.mxu0 %v393_v22  ;;  %v1064_v18 = vld [vmem:[%s3018_s21 + $0x19a0] sm:$0xff]  ;;  %v801_v19 = vld [vmem:[%s3018_s21 + $0x1168] sm:$0xff] }
 0x19b   : > { %2051 = vmatprep.subr.mxu1 %v649_v23  ;;  %1981 = vmatpush2.msra.mxu0 %v392_v24  ;;  %v1057_v20 = vld [vmem:[%s3018_s21 + $0x1968] sm:$0xff]  ;;  %v800_v22 = vld [vmem:[%s3018_s21 + $0x1160] sm:$0xff] }
 0x19c   : > { %2052 = vmatpush2.msra.mxu1 %v648_v25  ;;  %1982 = vmatprep.subr.mxu0 %v385_v27  ;;  %v1056_v23 = vld [vmem:[%s3018_s21 + $0x1960] sm:$0xff]  ;;  %v793_v24 = vld [vmem:[%s3018_s21 + $0x1128] sm:$0xff] }
 0x19d   : > { %2053 = vmatprep.subr.mxu1 %v641_v28  ;;  %1983 = vmatpush2.msra.mxu0 %v384_v30  ;;  %v1049_v25 = vld [vmem:[%s3018_s21 + $0x1928] sm:$0xff]  ;;  %v792_v27 = vld [vmem:[%s3018_s21 + $0x1120] sm:$0xff] }
 0x19e   : > { %2054 = vmatpush2.msra.mxu1 %v640_v31  ;;  %1984 = vmatprep.subr.mxu0 %v377_v32  ;;  %v1048_v28 = vld [vmem:[%s3018_s21 + $0x1920] sm:$0xff]  ;;  %v785_v30 = vld [vmem:[%s3018_s21 + $0x10e8] sm:$0xff] }
 0x19f   : > { %2055 = vmatprep.subr.mxu1 %v633_v33  ;;  %1985 = vmatpush2.msra.mxu0 %v376_v34  ;;  %v1041_v31 = vld [vmem:[%s3018_s21 + $0x18e8] sm:$0xff]  ;;  %v784_v32 = vld [vmem:[%s3018_s21 + $0x10e0] sm:$0xff] }
 0x1a0   : > { %1986 = vmatprep.mubr.f32.mxu0 %v3163_v8  ;;  %2056 = vmatpush2.msra.mxu1 %v632_v35  ;;  %v1040_v33 = vld [vmem:[%s3018_s21 + $0x18e0] sm:$0xff]  ;;  %v777_v34 = vld [vmem:[%s3018_s21 + $0x10a8] sm:$0xff] }
 0x1a1   : > { %1987 = vmatmul.mubr.f32.vlgmr.msra.gmra.mxu0 %v3148_v62  ;;  %2057 = vmatprep.mubr.f32.mxu1 %v3169_v11  ;;  %v1033_v35 = vld [vmem:[%s3018_s21 + $0x18a8] sm:$0xff] }
 0x1a2   : > { %2064 = vmatprep.subr.mxu0 %v881_v36  ;;  %2135 = vmatprep.subr.mxu1 %v1137_v37  ;;  %v776_v36 = vld [vmem:[%s3018_s21 + $0x10a0] sm:$0xff] }
 0x1a3   : > { %2058 = vmatmul.mubr.f32.vlgmr.msra.gmra.mxu1 %v3155_v3  ;;  %2065 = vmatpush1.msra.mxu0 %v880_v38  ;;  %v1032_v37 = vld [vmem:[%s3018_s21 + $0x18a0] sm:$0xff]  ;;  %v769_v38 = vld [vmem:[%s3018_s21 + $0x1068] sm:$0xff] }
 0x1a4   : > { %2136 = vmatpush1.msra.mxu1 %v1136_v39  ;;  %2066 = vmatprep.subr.mxu0 %v873_v40  ;;  %v1025_v39 = vld [vmem:[%s3018_s21 + $0x1868] sm:$0xff]  ;;  %v768_v40 = vld [vmem:[%s3018_s21 + $0x1060] sm:$0xff] }
 0x1a5   : > { %2137 = vmatprep.subr.mxu1 %v1129_v42  ;;  %2067 = vmatpush1.msra.mxu0 %v872_v43  ;;  %v1024_v42 = vld [vmem:[%s3018_s21 + $0x1860] sm:$0xff]  ;;  %v761_v43 = vld [vmem:[%s3018_s21 + $0x1028] sm:$0xff] }
 0x1a6   : > { %2138 = vmatpush1.msra.mxu1 %v1128_v44  ;;  %2068 = vmatprep.subr.mxu0 %v865_v45  ;;  %v1017_v44 = vld [vmem:[%s3018_s21 + $0x1828] sm:$0xff]  ;;  %v760_v45 = vld [vmem:[%s3018_s21 + $0x1020] sm:$0xff] }
 0x1a7   : > { %2139 = vmatprep.subr.mxu1 %v1121_v46  ;;  %2069 = vmatpush1.msra.mxu0 %v864_v47  ;;  %v1016_v46 = vld [vmem:[%s3018_s21 + $0x1820] sm:$0xff]  ;;  %v1009_v47 = vld [vmem:[%s3018_s21 + $0x17e8] sm:$0xff] }
 0x1a8   : > { %2140 = vmatpush1.msra.mxu1 %v1120_v48  ;;  %2070 = vmatprep.subr.mxu0 %v857_v49  ;;  %v1265_v48 = vld [vmem:[%s3018_s21 + $0x1fe8] sm:$0xff]  ;;  %v1008_v49 = vld [vmem:[%s3018_s21 + $0x17e0] sm:$0xff] }
 0x1a9   : > { %2141 = vmatprep.subr.mxu1 %v1113_v50  ;;  %2071 = vmatpush1.msra.mxu0 %v856_v51  ;;  %v1264_v50 = vld [vmem:[%s3018_s21 + $0x1fe0] sm:$0xff]  ;;  %v1001_v51 = vld [vmem:[%s3018_s21 + $0x17a8] sm:$0xff] }
 0x1aa   : > { %2142 = vmatpush1.msra.mxu1 %v1112_v53  ;;  %2072 = vmatprep.subr.mxu0 %v849_v54  ;;  %v1257_v53 = vld [vmem:[%s3018_s21 + $0x1fa8] sm:$0xff]  ;;  %v1000_v54 = vld [vmem:[%s3018_s21 + $0x17a0] sm:$0xff] }
 0x1ab   : > { %2143 = vmatprep.subr.mxu1 %v1105_v55  ;;  %2073 = vmatpush1.msra.mxu0 %v848_v56  ;;  %v1256_v55 = vld [vmem:[%s3018_s21 + $0x1fa0] sm:$0xff]  ;;  %v993_v56 = vld [vmem:[%s3018_s21 + $0x1768] sm:$0xff] }
 0x1ac   : > { %2144 = vmatpush1.msra.mxu1 %v1104_v57  ;;  %2074 = vmatprep.subr.mxu0 %v841_v58  ;;  %v1249_v57 = vld [vmem:[%s3018_s21 + $0x1f68] sm:$0xff]  ;;  %v992_v58 = vld [vmem:[%s3018_s21 + $0x1760] sm:$0xff] }
 0x1ad   : > { %2145 = vmatprep.subr.mxu1 %v1097_v59  ;;  %2075 = vmatpush1.msra.mxu0 %v840_v60  ;;  %v1248_v59 = vld [vmem:[%s3018_s21 + $0x1f60] sm:$0xff]  ;;  %v985_v60 = vld [vmem:[%s3018_s21 + $0x1728] sm:$0xff] }
 0x1ae   : > { %2146 = vmatpush1.msra.mxu1 %v1096_v61  ;;  %2076 = vmatprep.subr.mxu0 %v833_v63  ;;  %v1241_v61 = vld [vmem:[%s3018_s21 + $0x1f28] sm:$0xff]  ;;  %v984_v63 = vld [vmem:[%s3018_s21 + $0x1720] sm:$0xff] }
 0x1af   : > { %2147 = vmatprep.subr.mxu1 %v1089_v0  ;;  %2077 = vmatpush1.msra.mxu0 %v832_v1  ;;  %v1240_v0 = vld [vmem:[%s3018_s21 + $0x1f20] sm:$0xff]  ;;  %v977_v1 = vld [vmem:[%s3018_s21 + $0x16e8] sm:$0xff] }
 0x1b0   : > { %2148 = vmatpush1.msra.mxu1 %v1088_v2  ;;  %2078 = vmatprep.subr.mxu0 %v825_v4  ;;  %v1233_v2 = vld [vmem:[%s3018_s21 + $0x1ee8] sm:$0xff]  ;;  %v976_v4 = vld [vmem:[%s3018_s21 + $0x16e0] sm:$0xff] }
 0x1b1   : > { %2149 = vmatprep.subr.mxu1 %v1081_v5  ;;  %2079 = vmatpush1.msra.mxu0 %v824_v6  ;;  %v1232_v5 = vld [vmem:[%s3018_s21 + $0x1ee0] sm:$0xff]  ;;  %v969_v6 = vld [vmem:[%s3018_s21 + $0x16a8] sm:$0xff] }
 0x1b2   : > { %2150 = vmatpush1.msra.mxu1 %v1080_v7  ;;  %2080 = vmatprep.subr.mxu0 %v817_v9  ;;  %v1225_v7 = vld [vmem:[%s3018_s21 + $0x1ea8] sm:$0xff]  ;;  %v968_v9 = vld [vmem:[%s3018_s21 + $0x16a0] sm:$0xff] }
 0x1b3   : > { %2151 = vmatprep.subr.mxu1 %v1073_v10  ;;  %2081 = vmatpush1.msra.mxu0 %v816_v12  ;;  %v1224_v10 = vld [vmem:[%s3018_s21 + $0x1ea0] sm:$0xff]  ;;  %v961_v12 = vld [vmem:[%s3018_s21 + $0x1668] sm:$0xff] }
 0x1b4   : > { %2152 = vmatpush1.msra.mxu1 %v1072_v13  ;;  %2082 = vmatprep.subr.mxu0 %v809_v14  ;;  %v1217_v13 = vld [vmem:[%s3018_s21 + $0x1e68] sm:$0xff]  ;;  %v960_v14 = vld [vmem:[%s3018_s21 + $0x1660] sm:$0xff] }
 0x1b5   : > { %2153 = vmatprep.subr.mxu1 %v1065_v15  ;;  %2083 = vmatpush1.msra.mxu0 %v808_v17  ;;  %v1216_v15 = vld [vmem:[%s3018_s21 + $0x1e60] sm:$0xff]  ;;  %v953_v17 = vld [vmem:[%s3018_s21 + $0x1628] sm:$0xff] }
 0x1b6   : > { %2154 = vmatpush1.msra.mxu1 %v1064_v18  ;;  %2084 = vmatprep.subr.mxu0 %v801_v19  ;;  %v1209_v18 = vld [vmem:[%s3018_s21 + $0x1e28] sm:$0xff]  ;;  %v952_v19 = vld [vmem:[%s3018_s21 + $0x1620] sm:$0xff] }
 0x1b7   : > { %2155 = vmatprep.subr.mxu1 %v1057_v20  ;;  %2085 = vmatpush1.msra.mxu0 %v800_v22  ;;  %v1208_v20 = vld [vmem:[%s3018_s21 + $0x1e20] sm:$0xff]  ;;  %v945_v22 = vld [vmem:[%s3018_s21 + $0x15e8] sm:$0xff] }
 0x1b8   : > { %2156 = vmatpush1.msra.mxu1 %v1056_v23  ;;  %2086 = vmatprep.subr.mxu0 %v793_v24  ;;  %v1201_v23 = vld [vmem:[%s3018_s21 + $0x1de8] sm:$0xff]  ;;  %v944_v24 = vld [vmem:[%s3018_s21 + $0x15e0] sm:$0xff] }
 0x1b9   : > { %2157 = vmatprep.subr.mxu1 %v1049_v25  ;;  %2087 = vmatpush1.msra.mxu0 %v792_v27  ;;  %v1200_v25 = vld [vmem:[%s3018_s21 + $0x1de0] sm:$0xff]  ;;  %v937_v27 = vld [vmem:[%s3018_s21 + $0x15a8] sm:$0xff] }
 0x1ba   : > { %2158 = vmatpush1.msra.mxu1 %v1048_v28  ;;  %2088 = vmatprep.subr.mxu0 %v785_v30  ;;  %v1193_v28 = vld [vmem:[%s3018_s21 + $0x1da8] sm:$0xff]  ;;  %v936_v30 = vld [vmem:[%s3018_s21 + $0x15a0] sm:$0xff] }
 0x1bb   : > { %2159 = vmatprep.subr.mxu1 %v1041_v31  ;;  %2089 = vmatpush1.msra.mxu0 %v784_v32  ;;  %v1192_v31 = vld [vmem:[%s3018_s21 + $0x1da0] sm:$0xff]  ;;  %v929_v32 = vld [vmem:[%s3018_s21 + $0x1568] sm:$0xff] }
 0x1bc   : > { %2160 = vmatpush1.msra.mxu1 %v1040_v33  ;;  %2090 = vmatprep.subr.mxu0 %v777_v34  ;;  %v1185_v33 = vld [vmem:[%s3018_s21 + $0x1d68] sm:$0xff]  ;;  %v928_v34 = vld [vmem:[%s3018_s21 + $0x1560] sm:$0xff] }
 0x1bd   : > { %2161 = vmatprep.subr.mxu1 %v1033_v35  ;;  %2091 = vmatpush1.msra.mxu0 %v776_v36  ;;  %v1184_v35 = vld [vmem:[%s3018_s21 + $0x1d60] sm:$0xff]  ;;  %v921_v36 = vld [vmem:[%s3018_s21 + $0x1528] sm:$0xff] }
 0x1be   : > { %2162 = vmatpush1.msra.mxu1 %v1032_v37  ;;  %2092 = vmatprep.subr.mxu0 %v769_v38  ;;  %v1177_v37 = vld [vmem:[%s3018_s21 + $0x1d28] sm:$0xff]  ;;  %v920_v38 = vld [vmem:[%s3018_s21 + $0x1520] sm:$0xff] }
 0x1bf   : > { %2163 = vmatprep.subr.mxu1 %v1025_v39  ;;  %2093 = vmatpush1.msra.mxu0 %v768_v40  ;;  %v1176_v39 = vld [vmem:[%s3018_s21 + $0x1d20] sm:$0xff]  ;;  %v913_v40 = vld [vmem:[%s3018_s21 + $0x14e8] sm:$0xff] }
 0x1c0   : > { %2164 = vmatpush1.msra.mxu1 %v1024_v42  ;;  %2094 = vmatprep.subr.mxu0 %v761_v43  ;;  %v1169_v42 = vld [vmem:[%s3018_s21 + $0x1ce8] sm:$0xff]  ;;  %v912_v43 = vld [vmem:[%s3018_s21 + $0x14e0] sm:$0xff] }
 0x1c1   : > { %2165 = vmatprep.subr.mxu1 %v1017_v44  ;;  %2095 = vmatpush1.msra.mxu0 %v760_v45  ;;  %v1168_v44 = vld [vmem:[%s3018_s21 + $0x1ce0] sm:$0xff]  ;;  %v905_v45 = vld [vmem:[%s3018_s21 + $0x14a8] sm:$0xff] }
 0x1c2   : > { %2166 = vmatpush1.msra.mxu1 %v1016_v46  ;;  %2096 = vmatprep.subr.mxu0 %v1009_v47  ;;  %v1161_v46 = vld [vmem:[%s3018_s21 + $0x1ca8] sm:$0xff]  ;;  %v904_v47 = vld [vmem:[%s3018_s21 + $0x14a0] sm:$0xff] }
 0x1c3   : > { %2167 = vmatprep.subr.mxu1 %v1265_v48  ;;  %2097 = vmatpush2.msra.mxu0 %v1008_v49  ;;  %v1160_v48 = vld [vmem:[%s3018_s21 + $0x1ca0] sm:$0xff]  ;;  %v897_v49 = vld [vmem:[%s3018_s21 + $0x1468] sm:$0xff] }
 0x1c4   : > { %2168 = vmatpush2.msra.mxu1 %v1264_v50  ;;  %2098 = vmatprep.subr.mxu0 %v1001_v51  ;;  %v1153_v50 = vld [vmem:[%s3018_s21 + $0x1c68] sm:$0xff]  ;;  %v896_v51 = vld [vmem:[%s3018_s21 + $0x1460] sm:$0xff] }
 0x1c5   : > { %2169 = vmatprep.subr.mxu1 %v1257_v53  ;;  %2099 = vmatpush2.msra.mxu0 %v1000_v54  ;;  %v1152_v53 = vld [vmem:[%s3018_s21 + $0x1c60] sm:$0xff]  ;;  %v889_v54 = vld [vmem:[%s3018_s21 + $0x1428] sm:$0xff] }
 0x1c6   : > { %2170 = vmatpush2.msra.mxu1 %v1256_v55  ;;  %2100 = vmatprep.subr.mxu0 %v993_v56  ;;  %v1145_v55 = vld [vmem:[%s3018_s21 + $0x1c28] sm:$0xff]  ;;  %v888_v56 = vld [vmem:[%s3018_s21 + $0x1420] sm:$0xff] }
 0x1c7   : > { %2171 = vmatprep.subr.mxu1 %v1249_v57  ;;  %2101 = vmatpush2.msra.mxu0 %v992_v58  ;;  %v1144_v57 = vld [vmem:[%s3018_s21 + $0x1c20] sm:$0xff]  ;;  %v371_v58 = vld [vmem:[%s3018_s21 + $0x3f8] sm:$0xff] }
 0x1c8   : > { %2172 = vmatpush2.msra.mxu1 %v1248_v59  ;;  %2102 = vmatprep.subr.mxu0 %v985_v60  ;;  %v627_v59 = vld [vmem:[%s3018_s21 + $0xbf8] sm:$0xff]  ;;  %v370_v60 = vld [vmem:[%s3018_s21 + $0x3f0] sm:$0xff] }
 0x1c9   : > { %2173 = vmatprep.subr.mxu1 %v1241_v61  ;;  %2103 = vmatpush2.msra.mxu0 %v984_v63  ;;  %v626_v61 = vld [vmem:[%s3018_s21 + $0xbf0] sm:$0xff]  ;;  %v363_v63 = vld [vmem:[%s3018_s21 + $0x3b8] sm:$0xff] }
 0x1ca   : > { %2174 = vmatpush2.msra.mxu1 %v1240_v0  ;;  %2104 = vmatprep.subr.mxu0 %v977_v1  ;;  %v619_v0 = vld [vmem:[%s3018_s21 + $0xbb8] sm:$0xff]  ;;  %v362_v1 = vld [vmem:[%s3018_s21 + $0x3b0] sm:$0xff] }
 0x1cb   : > { %2175 = vmatprep.subr.mxu1 %v1233_v2  ;;  %2105 = vmatpush2.msra.mxu0 %v976_v4  ;;  %v618_v2 = vld [vmem:[%s3018_s21 + $0xbb0] sm:$0xff]  ;;  %v355_v4 = vld [vmem:[%s3018_s21 + $0x378] sm:$0xff] }
 0x1cc   : > { %2176 = vmatpush2.msra.mxu1 %v1232_v5  ;;  %2106 = vmatprep.subr.mxu0 %v969_v6  ;;  %v611_v5 = vld [vmem:[%s3018_s21 + $0xb78] sm:$0xff]  ;;  %v354_v6 = vld [vmem:[%s3018_s21 + $0x370] sm:$0xff] }
 0x1cd   : > { %2177 = vmatprep.subr.mxu1 %v1225_v7  ;;  %2107 = vmatpush2.msra.mxu0 %v968_v9  ;;  %v610_v7 = vld [vmem:[%s3018_s21 + $0xb70] sm:$0xff]  ;;  %v347_v9 = vld [vmem:[%s3018_s21 + $0x338] sm:$0xff] }
 0x1ce   : > { %2178 = vmatpush2.msra.mxu1 %v1224_v10  ;;  %2108 = vmatprep.subr.mxu0 %v961_v12  ;;  %v603_v10 = vld [vmem:[%s3018_s21 + $0xb38] sm:$0xff]  ;;  %v346_v12 = vld [vmem:[%s3018_s21 + $0x330] sm:$0xff] }
 0x1cf   : > { %2179 = vmatprep.subr.mxu1 %v1217_v13  ;;  %2109 = vmatpush2.msra.mxu0 %v960_v14  ;;  %v602_v13 = vld [vmem:[%s3018_s21 + $0xb30] sm:$0xff]  ;;  %v339_v14 = vld [vmem:[%s3018_s21 + $0x2f8] sm:$0xff] }
 0x1d0   : > { %2180 = vmatpush2.msra.mxu1 %v1216_v15  ;;  %2110 = vmatprep.subr.mxu0 %v953_v17  ;;  %v595_v15 = vld [vmem:[%s3018_s21 + $0xaf8] sm:$0xff]  ;;  %v338_v17 = vld [vmem:[%s3018_s21 + $0x2f0] sm:$0xff] }
 0x1d1   : > { %2181 = vmatprep.subr.mxu1 %v1209_v18  ;;  %2111 = vmatpush2.msra.mxu0 %v952_v19  ;;  %v594_v18 = vld [vmem:[%s3018_s21 + $0xaf0] sm:$0xff]  ;;  %v331_v19 = vld [vmem:[%s3018_s21 + $0x2b8] sm:$0xff] }
 0x1d2   : > { %2182 = vmatpush2.msra.mxu1 %v1208_v20  ;;  %2112 = vmatprep.subr.mxu0 %v945_v22  ;;  %v587_v20 = vld [vmem:[%s3018_s21 + $0xab8] sm:$0xff]  ;;  %v330_v22 = vld [vmem:[%s3018_s21 + $0x2b0] sm:$0xff] }
 0x1d3   : > { %2183 = vmatprep.subr.mxu1 %v1201_v23  ;;  %2113 = vmatpush2.msra.mxu0 %v944_v24  ;;  %v586_v23 = vld [vmem:[%s3018_s21 + $0xab0] sm:$0xff]  ;;  %v323_v24 = vld [vmem:[%s3018_s21 + $0x278] sm:$0xff] }
 0x1d4   : > { %2184 = vmatpush2.msra.mxu1 %v1200_v25  ;;  %2114 = vmatprep.subr.mxu0 %v937_v27  ;;  %v579_v25 = vld [vmem:[%s3018_s21 + $0xa78] sm:$0xff]  ;;  %v322_v27 = vld [vmem:[%s3018_s21 + $0x270] sm:$0xff] }
 0x1d5   : > { %2185 = vmatprep.subr.mxu1 %v1193_v28  ;;  %2115 = vmatpush2.msra.mxu0 %v936_v30  ;;  %v578_v28 = vld [vmem:[%s3018_s21 + $0xa70] sm:$0xff]  ;;  %v315_v30 = vld [vmem:[%s3018_s21 + $0x238] sm:$0xff] }
 0x1d6   : > { %2186 = vmatpush2.msra.mxu1 %v1192_v31  ;;  %2116 = vmatprep.subr.mxu0 %v929_v32  ;;  %v571_v31 = vld [vmem:[%s3018_s21 + $0xa38] sm:$0xff]  ;;  %v314_v32 = vld [vmem:[%s3018_s21 + $0x230] sm:$0xff] }
 0x1d7   : > { %2187 = vmatprep.subr.mxu1 %v1185_v33  ;;  %2117 = vmatpush2.msra.mxu0 %v928_v34  ;;  %v570_v33 = vld [vmem:[%s3018_s21 + $0xa30] sm:$0xff]  ;;  %v307_v34 = vld [vmem:[%s3018_s21 + $0x1f8] sm:$0xff] }
 0x1d8   : > { %2188 = vmatpush2.msra.mxu1 %v1184_v35  ;;  %2118 = vmatprep.subr.mxu0 %v921_v36  ;;  %v563_v35 = vld [vmem:[%s3018_s21 + $0x9f8] sm:$0xff]  ;;  %v306_v36 = vld [vmem:[%s3018_s21 + $0x1f0] sm:$0xff] }
 0x1d9   : > { %2189 = vmatprep.subr.mxu1 %v1177_v37  ;;  %2119 = vmatpush2.msra.mxu0 %v920_v38  ;;  %v562_v37 = vld [vmem:[%s3018_s21 + $0x9f0] sm:$0xff]  ;;  %v299_v38 = vld [vmem:[%s3018_s21 + $0x1b8] sm:$0xff] }
 0x1da   : > { %2190 = vmatpush2.msra.mxu1 %v1176_v39  ;;  %2120 = vmatprep.subr.mxu0 %v913_v40  ;;  %v555_v39 = vld [vmem:[%s3018_s21 + $0x9b8] sm:$0xff]  ;;  %v298_v40 = vld [vmem:[%s3018_s21 + $0x1b0] sm:$0xff] }
 0x1db   : > { %2191 = vmatprep.subr.mxu1 %v1169_v42  ;;  %2121 = vmatpush2.msra.mxu0 %v912_v43  ;;  %v554_v42 = vld [vmem:[%s3018_s21 + $0x9b0] sm:$0xff]  ;;  %v291_v43 = vld [vmem:[%s3018_s21 + $0x178] sm:$0xff] }
 0x1dc   : > { %2192 = vmatpush2.msra.mxu1 %v1168_v44  ;;  %2122 = vmatprep.subr.mxu0 %v905_v45  ;;  %v547_v44 = vld [vmem:[%s3018_s21 + $0x978] sm:$0xff]  ;;  %v290_v45 = vld [vmem:[%s3018_s21 + $0x170] sm:$0xff] }
 0x1dd   : > { %2193 = vmatprep.subr.mxu1 %v1161_v46  ;;  %2123 = vmatpush2.msra.mxu0 %v904_v47  ;;  %v546_v46 = vld [vmem:[%s3018_s21 + $0x970] sm:$0xff]  ;;  %v283_v47 = vld [vmem:[%s3018_s21 + $0x138] sm:$0xff] }
 0x1de   : > { %2194 = vmatpush2.msra.mxu1 %v1160_v48  ;;  %2124 = vmatprep.subr.mxu0 %v897_v49  ;;  %v539_v48 = vld [vmem:[%s3018_s21 + $0x938] sm:$0xff]  ;;  %v282_v49 = vld [vmem:[%s3018_s21 + $0x130] sm:$0xff] }
 0x1df   : > { %2195 = vmatprep.subr.mxu1 %v1153_v50  ;;  %2125 = vmatpush2.msra.mxu0 %v896_v51  ;;  %v538_v50 = vld [vmem:[%s3018_s21 + $0x930] sm:$0xff]  ;;  %v275_v51 = vld [vmem:[%s3018_s21 + $0xf8] sm:$0xff] }
 0x1e0   : > { %2196 = vmatpush2.msra.mxu1 %v1152_v53  ;;  %2126 = vmatprep.subr.mxu0 %v889_v54  ;;  %v531_v53 = vld [vmem:[%s3018_s21 + $0x8f8] sm:$0xff]  ;;  %v274_v54 = vld [vmem:[%s3018_s21 + $0xf0] sm:$0xff] }
 0x1e1   : > { %2197 = vmatprep.subr.mxu1 %v1145_v55  ;;  %2127 = vmatpush2.msra.mxu0 %v888_v56  ;;  %v530_v55 = vld [vmem:[%s3018_s21 + $0x8f0] sm:$0xff]  ;;  %v267_v56 = vld [vmem:[%s3018_s21 + $0xb8] sm:$0xff] }
 0x1e2   : > { %2128 = vmatprep.mubr.f32.mxu0 %v3309_v26  ;;  %2198 = vmatpush2.msra.mxu1 %v1144_v57  ;;  %v523_v57 = vld [vmem:[%s3018_s21 + $0x8b8] sm:$0xff] }
 0x1e3   : > { %2129 = vmatmul.mubr.f32.vlgmr.msra.gmra.mxu0 %v3294_v16  ;;  %2199 = vmatprep.mubr.f32.mxu1 %v3315_v29 }
 0x1e4   : > { %2206 = vmatprep.subr.mxu0 %v371_v58  ;;  %2277 = vmatprep.subr.mxu1 %v627_v59  ;;  %v266_v58 = vld [vmem:[%s3018_s21 + $0xb0] sm:$0xff] }
 0x1e5   : > { %2200 = vmatmul.mubr.f32.vlgmr.msra.gmra.mxu1 %v3301_v21  ;;  %2207 = vmatpush1.msra.mxu0 %v370_v60  ;;  %v522_v59 = vld [vmem:[%s3018_s21 + $0x8b0] sm:$0xff]  ;;  %v259_v60 = vld [vmem:[%s3018_s21 + $0x78] sm:$0xff] }
 0x1e6   : > { %2278 = vmatpush1.msra.mxu1 %v626_v61  ;;  %2208 = vmatprep.subr.mxu0 %v363_v63  ;;  %v515_v61 = vld [vmem:[%s3018_s21 + $0x878] sm:$0xff]  ;;  %v258_v63 = vld [vmem:[%s3018_s21 + $0x70] sm:$0xff] }
 0x1e7   : > { %2279 = vmatprep.subr.mxu1 %v619_v0  ;;  %2209 = vmatpush1.msra.mxu0 %v362_v1  ;;  %v514_v0 = vld [vmem:[%s3018_s21 + $0x870] sm:$0xff]  ;;  %v251_v1 = vld [vmem:[%s3018_s21 + $0x38] sm:$0xff] }
 0x1e8   : > { %2280 = vmatpush1.msra.mxu1 %v618_v2  ;;  %2210 = vmatprep.subr.mxu0 %v355_v4  ;;  %v507_v2 = vld [vmem:[%s3018_s21 + $0x838] sm:$0xff]  ;;  %v250_v4 = vld [vmem:[%s3018_s21 + $0x30] sm:$0xff] }
 0x1e9   : > { %2281 = vmatprep.subr.mxu1 %v611_v5  ;;  %2211 = vmatpush1.msra.mxu0 %v354_v6  ;;  %v506_v5 = vld [vmem:[%s3018_s21 + $0x830] sm:$0xff]  ;;  %v499_v6 = vld [vmem:[%s3018_s21 + $0x7f8] sm:$0xff] }
 0x1ea   : > { %2282 = vmatpush1.msra.mxu1 %v610_v7  ;;  %2212 = vmatprep.subr.mxu0 %v347_v9  ;;  %v755_v7 = vld [vmem:[%s3018_s21 + $0xff8] sm:$0xff]  ;;  %v498_v9 = vld [vmem:[%s3018_s21 + $0x7f0] sm:$0xff] }
 0x1eb   : > { %2283 = vmatprep.subr.mxu1 %v603_v10  ;;  %2213 = vmatpush1.msra.mxu0 %v346_v12  ;;  %v754_v10 = vld [vmem:[%s3018_s21 + $0xff0] sm:$0xff]  ;;  %v491_v12 = vld [vmem:[%s3018_s21 + $0x7b8] sm:$0xff] }
 0x1ec   : > { %2284 = vmatpush1.msra.mxu1 %v602_v13  ;;  %2214 = vmatprep.subr.mxu0 %v339_v14  ;;  %v747_v13 = vld [vmem:[%s3018_s21 + $0xfb8] sm:$0xff]  ;;  %v490_v14 = vld [vmem:[%s3018_s21 + $0x7b0] sm:$0xff] }
 0x1ed   : > { %2285 = vmatprep.subr.mxu1 %v595_v15  ;;  %2215 = vmatpush1.msra.mxu0 %v338_v17  ;;  %v746_v15 = vld [vmem:[%s3018_s21 + $0xfb0] sm:$0xff]  ;;  %v483_v17 = vld [vmem:[%s3018_s21 + $0x778] sm:$0xff] }
 0x1ee   : > { %2286 = vmatpush1.msra.mxu1 %v594_v18  ;;  %2216 = vmatprep.subr.mxu0 %v331_v19  ;;  %v739_v18 = vld [vmem:[%s3018_s21 + $0xf78] sm:$0xff]  ;;  %v482_v19 = vld [vmem:[%s3018_s21 + $0x770] sm:$0xff] }
 0x1ef   : > { %2287 = vmatprep.subr.mxu1 %v587_v20  ;;  %2217 = vmatpush1.msra.mxu0 %v330_v22  ;;  %v738_v20 = vld [vmem:[%s3018_s21 + $0xf70] sm:$0xff]  ;;  %v475_v22 = vld [vmem:[%s3018_s21 + $0x738] sm:$0xff] }
 0x1f0   : > { %2288 = vmatpush1.msra.mxu1 %v586_v23  ;;  %2218 = vmatprep.subr.mxu0 %v323_v24  ;;  %v731_v23 = vld [vmem:[%s3018_s21 + $0xf38] sm:$0xff]  ;;  %v3931_v24 = vpop.f32.mrf.mxu0 }
 0x1f1   : > { %2289 = vmatprep.subr.mxu1 %v579_v25  ;;  %2219 = vmatpush1.msra.mxu0 %v322_v27  ;;  %v474_v25 = vld [vmem:[%s3018_s21 + $0x730] sm:$0xff] }
 0x1f2   : > { %2290 = vmatpush1.msra.mxu1 %v578_v28  ;;  %2220 = vmatprep.subr.mxu0 %v315_v30  ;;  %v730_v27 = vld [vmem:[%s3018_s21 + $0xf30] sm:$0xff]  ;;  %v467_v28 = vld [vmem:[%s3018_s21 + $0x6f8] sm:$0xff] }
 0x1f3   : > { %2291 = vmatprep.subr.mxu1 %v571_v31  ;;  %2221 = vmatpush1.msra.mxu0 %v314_v32  ;;  %v723_v30 = vld [vmem:[%s3018_s21 + $0xef8] sm:$0xff]  ;;  %v466_v31 = vld [vmem:[%s3018_s21 + $0x6f0] sm:$0xff] }
 0x1f4   : > { %2292 = vmatpush1.msra.mxu1 %v570_v33  ;;  %2222 = vmatprep.subr.mxu0 %v307_v34  ;;  %v722_v32 = vld [vmem:[%s3018_s21 + $0xef0] sm:$0xff]  ;;  %v459_v33 = vld [vmem:[%s3018_s21 + $0x6b8] sm:$0xff] }
 0x1f5   : > { %2293 = vmatprep.subr.mxu1 %v563_v35  ;;  %2223 = vmatpush1.msra.mxu0 %v306_v36  ;;  %v715_v34 = vld [vmem:[%s3018_s21 + $0xeb8] sm:$0xff]  ;;  %v3941_v35 = vpop.f32.mrf.mxu1  ;;  %v1422_v36 = vpop.f32.mrf.mxu0 }
 0x1f6   : > { %2294 = vmatpush1.msra.mxu1 %v562_v37  ;;  %2224 = vmatprep.subr.mxu0 %v299_v38  ;;  %v458_v37 = vld [vmem:[%s3018_s21 + $0x6b0] sm:$0xff] }
 0x1f7   : > { %2295 = vmatprep.subr.mxu1 %v555_v39  ;;  %2225 = vmatpush1.msra.mxu0 %v298_v40  ;;  %v714_v38 = vld [vmem:[%s3018_s21 + $0xeb0] sm:$0xff]  ;;  %v1276_v39 = vsub.s32 1, %v3126_v41  ;;  %v451_v40 = vld [vmem:[%s3018_s21 + $0x678] sm:$0xff] }
 0x1f8   : > { %2296 = vmatpush1.msra.mxu1 %v554_v42  ;;  %2226 = vmatprep.subr.mxu0 %v291_v43  ;;  %v707_v42 = vld [vmem:[%s3018_s21 + $0xe78] sm:$0xff]  ;;  %v3949_v43 = vld [vmem:[%s206_s25] sm:$0xff] }
 0x1f9   : > { %2297 = vmatprep.subr.mxu1 %v547_v44  ;;  %2227 = vmatpush1.msra.mxu0 %v290_v45  ;;  %v3951_v44 = vpop.f32.mrf.mxu0  ;;  %v450_v45 = vld [vmem:[%s3018_s21 + $0x670] sm:$0xff] }
 0x1fa   : > { %2298 = vmatpush1.msra.mxu1 %v546_v46  ;;  %2228 = vmatprep.subr.mxu0 %v283_v47  ;;  %v706_v46 = vld [vmem:[%s3018_s21 + $0xe70] sm:$0xff]  ;;  %v1272_v47 = vsub.s32 0, %v3126_v41 }
 0x1fb   : > { %2299 = vmatprep.subr.mxu1 %v539_v48  ;;  %2229 = vmatpush1.msra.mxu0 %v282_v49  ;;  %v443_v48 = vld [vmem:[%s3018_s21 + $0x638] sm:$0xff] }
 0x1fc   : > { %2300 = vmatpush1.msra.mxu1 %v538_v50  ;;  %2230 = vmatprep.subr.mxu0 %v275_v51  ;;  %v699_v49 = vld [vmem:[%s3018_s21 + $0xe38] sm:$0xff]  ;;  %v1493_v50 = vpop.f32.mrf.mxu1  ;;  %v442_v51 = vld [vmem:[%s3018_s21 + $0x630] sm:$0xff] }
 0x1fd   : > { %2301 = vmatprep.subr.mxu1 %v531_v53  ;;  %2231 = vmatpush1.msra.mxu0 %v274_v54  ;;  %v698_v53 = vld [vmem:[%s3018_s21 + $0xe30] sm:$0xff]  ;;  %v1277_v54 = vrot.slane %v3949_v43, %v1276_v39  ;;  %v651_v39 = vld [vmem:[%s3018_s21 + $0xcb8] sm:$0xff] }
 0x1fe   : > { %2302 = vmatpush1.msra.mxu1 %v530_v55  ;;  %2232 = vmatprep.subr.mxu0 %v267_v56  ;;  %v1280_v55 = vsub.s32 2, %v3126_v41  ;;  %v435_v56 = vld [vmem:[%s3018_s21 + $0x5f8] sm:$0xff] }
 0x1ff   : > { %2303 = vmatprep.subr.mxu1 %v523_v57  ;;  %2233 = vmatpush1.msra.mxu0 %v266_v58  ;;  %v691_v57 = vld [vmem:[%s3018_s21 + $0xdf8] sm:$0xff]  ;;  %v3964_v58 = vpop.f32.mrf.mxu1 }
 0x200   : > { %2304 = vmatpush1.msra.mxu1 %v522_v59  ;;  %2234 = vmatprep.subr.mxu0 %v259_v60  ;;  %v1564_v59 = vpop.f32.mrf.mxu0  ;;  %v434_v60 = vld [vmem:[%s3018_s21 + $0x5f0] sm:$0xff] }
 0x201   : > { %2305 = vmatprep.subr.mxu1 %v515_v61  ;;  %2235 = vmatpush1.msra.mxu0 %v258_v63  ;;  %v690_v61 = vld [vmem:[%s3018_s21 + $0xdf0] sm:$0xff]  ;;  %v1273_v63 = vrot.slane %v3949_v43, %v1272_v47  ;;  %v387_v47 = vld [vmem:[%s3018_s21 + $0x478] sm:$0xff] }
 0x202   : > { %2306 = vmatpush1.msra.mxu1 %v514_v0  ;;  %2236 = vmatprep.subr.mxu0 %v251_v1  ;;  %v1284_v0 = vsub.s32 3, %v3126_v41  ;;  %v427_v1 = vld [vmem:[%s3018_s21 + $0x5b8] sm:$0xff] }
 0x203   : > { %2307 = vmatprep.subr.mxu1 %v507_v2  ;;  %2237 = vmatpush1.msra.mxu0 %v250_v4  ;;  %v683_v2 = vld [vmem:[%s3018_s21 + $0xdb8] sm:$0xff]  ;;  %v1704_v4 = vpop.f32.mrf.mxu0 }
 0x204   : > { %2308 = vmatpush1.msra.mxu1 %v506_v5  ;;  %2238 = vmatprep.subr.mxu0 %v499_v6  ;;  %v426_v5 = vld [vmem:[%s3018_s21 + $0x5b0] sm:$0xff] }
 0x205   : > { %2309 = vmatprep.subr.mxu1 %v755_v7  ;;  %2239 = vmatpush2.msra.mxu0 %v498_v9  ;;  %v682_v6 = vld [vmem:[%s3018_s21 + $0xdb0] sm:$0xff]  ;;  %v1423_v7 = vadd.f32 %v1422_v36, %v1277_v54  ;;  %v1281_v9 = vrot.slane %v3949_v43, %v1280_v55  ;;  %v379_v54 = vld [vmem:[%s3018_s21 + $0x438] sm:$0xff] }
 0x206   : > { %2310 = vmatpush2.msra.mxu1 %v754_v10  ;;  %2240 = vmatprep.subr.mxu0 %v491_v12  ;;  %v419_v10 = vld [vmem:[%s3018_s21 + $0x578] sm:$0xff] }
 0x207   : > { %2311 = vmatprep.subr.mxu1 %v747_v13  ;;  %2241 = vmatpush2.msra.mxu0 %v490_v14  ;;  %v675_v12 = vld [vmem:[%s3018_s21 + $0xd78] sm:$0xff]  ;;  %v1635_v13 = vpop.f32.mrf.mxu1  ;;  %v418_v14 = vld [vmem:[%s3018_s21 + $0x570] sm:$0xff] }
 0x208   : > { %2312 = vmatpush2.msra.mxu1 %v746_v15  ;;  %2242 = vmatprep.subr.mxu0 %v483_v17  ;;  %v674_v15 = vld [vmem:[%s3018_s21 + $0xd70] sm:$0xff]  ;;  %v1421_v17 = vadd.f32 %v3931_v24, %v1273_v63  ;;  %v1705_v24 = vadd.f32 %v1704_v4, %v1281_v9  ;;  %v635_v55 = vld [vmem:[%s3018_s21 + $0xc38] sm:$0xff] }
 0x209   : > { %2313 = vmatprep.subr.mxu1 %v739_v18  ;;  %2243 = vmatpush2.msra.mxu0 %v482_v19  ;;  %v1285_v18 = vrot.slane %v3949_v43, %v1284_v0  ;;  %v411_v19 = vld [vmem:[%s3018_s21 + $0x538] sm:$0xff]  ;;  %v634_v63 = vld [vmem:[%s3018_s21 + $0xc30] sm:$0xff] }
 0x20a   : > { %2314 = vmatpush2.msra.mxu1 %v738_v20  ;;  %2244 = vmatprep.subr.mxu0 %v475_v22  ;;  %v667_v20 = vld [vmem:[%s3018_s21 + $0xd38] sm:$0xff]  ;;  %v1775_v22 = vpop.f32.mrf.mxu1  ;;  %v1138_v9 = vld [vmem:[%s3018_s21 + $0x1bf0] sm:$0xff] }
 0x20b   : > { %2315 = vmatprep.subr.mxu1 %v731_v23  ;;  %2245 = vmatpush2.msra.mxu0 %v474_v25  ;;  %v1706_v23 = vpop.f32.mrf.mxu0  ;;  %v410_v25 = vld [vmem:[%s3018_s21 + $0x530] sm:$0xff] }
 0x20c   : > { %2316 = vmatpush2.msra.mxu1 %v730_v27  ;;  %2246 = vmatprep.subr.mxu0 %v467_v28  ;;  %v666_v27 = vld [vmem:[%s3018_s21 + $0xd30] sm:$0xff]  ;;  %v1494_v28 = vadd.f32 %v1493_v50, %v1423_v7 }
 0x20d   : > { %2317 = vmatprep.subr.mxu1 %v723_v30  ;;  %2247 = vmatpush2.msra.mxu0 %v466_v31  ;;  %v403_v30 = vld [vmem:[%s3018_s21 + $0x4f8] sm:$0xff]  ;;  %v642_v50 = vld [vmem:[%s3018_s21 + $0xc70] sm:$0xff] }
 0x20e   : > { %2318 = vmatpush2.msra.mxu1 %v722_v32  ;;  %2248 = vmatprep.subr.mxu0 %v459_v33  ;;  %v659_v31 = vld [vmem:[%s3018_s21 + $0xcf8] sm:$0xff]  ;;  %v402_v32 = vld [vmem:[%s3018_s21 + $0x4f0] sm:$0xff]  ;;  %v1565_v36 = vadd.f32 %v1564_v59, %v1494_v28 }
 0x20f   : > { %2319 = vmatprep.subr.mxu1 %v715_v34  ;;  %2249 = vmatpush2.msra.mxu0 %v458_v37  ;;  %v658_v33 = vld [vmem:[%s3018_s21 + $0xcf0] sm:$0xff]  ;;  %v1492_v34 = vadd.f32 %v3941_v35, %v1421_v17  ;;  %v1707_v37 = vadd.f32 %v1706_v23, %v1285_v18  ;;  %v1776_v35 = vadd.f32 %v1775_v22, %v1705_v24  ;;  %v1123_v17 = vld [vmem:[%s3018_s21 + $0x1b78] sm:$0xff] }
 0x210   : > { %2320 = vmatpush2.msra.mxu1 %v714_v38  ;;  %2250 = vmatprep.subr.mxu0 %v451_v40  ;;  %v395_v38 = vld [vmem:[%s3018_s21 + $0x4b8] sm:$0xff]  ;;  %v1777_v40 = vpop.f32.mrf.mxu1  ;;  %v882_v7 = vld [vmem:[%s3018_s21 + $0x13f0] sm:$0xff] }
 0x211   : > { %2321 = vmatprep.subr.mxu1 %v707_v42  ;;  %2251 = vmatpush2.msra.mxu0 %v450_v45  ;;  %v394_v42 = vld [vmem:[%s3018_s21 + $0x4b0] sm:$0xff]  ;;  %v1115_v22 = vld [vmem:[%s3018_s21 + $0x1b38] sm:$0xff] }
 0x212   : > { %2322 = vmatpush2.msra.mxu1 %v706_v46  ;;  %2252 = vmatprep.subr.mxu0 %v443_v48  ;;  %v650_v45 = vld [vmem:[%s3018_s21 + $0xcb0] sm:$0xff]  ;;  %v1563_v46 = vadd.f32 %v3951_v44, %v1492_v34  ;;  %v643_v48 = vld [vmem:[%s3018_s21 + $0xc78] sm:$0xff]  ;;  %v1636_v44 = vadd.f32 %v1635_v13, %v1565_v36 }
 0x213   : > { %2323 = vmatprep.subr.mxu1 %v699_v49  ;;  %2253 = vmatpush2.msra.mxu0 %v442_v51  ;;  %v386_v49 = vld [vmem:[%s3018_s21 + $0x470] sm:$0xff]  ;;  %v1107_v28 = vld [vmem:[%s3018_s21 + $0x1af8] sm:$0xff] }
 0x214   : > { %2324 = vmatpush2.msra.mxu1 %v698_v53  ;;  %2254 = vmatprep.subr.mxu0 %v435_v56  ;;  %v1778_v53 = vadd.f32 %v1777_v40, %v1707_v37  ;;  %v874_v13 = vld [vmem:[%s3018_s21 + $0x13b0] sm:$0xff]  ;;  %v835_v36 = vld [vmem:[%s3018_s21 + $0x1278] sm:$0xff] }
 0x215   : > { %2325 = vmatprep.subr.mxu1 %v691_v57  ;;  %2255 = vmatpush2.msra.mxu0 %v434_v60  ;;  %v378_v57 = vld [vmem:[%s3018_s21 + $0x430] sm:$0xff]  ;;  %v1091_v37 = vld [vmem:[%s3018_s21 + $0x1a78] sm:$0xff] }
 0x216   : > { %2326 = vmatpush2.msra.mxu1 %v690_v61  ;;  %2256 = vmatprep.subr.mxu0 %v427_v1  ;;  %v1634_v61 = vadd.f32 %v3964_v58, %v1563_v46  ;;  %v883_v1 = vld [vmem:[%s3018_s21 + $0x13f8] sm:$0xff]  ;;  %v1122_v18 = vld [vmem:[%s3018_s21 + $0x1b70] sm:$0xff] }
 0x217   : > { %2327 = vmatprep.subr.mxu1 %v683_v2  ;;  %2257 = vmatpush2.msra.mxu0 %v426_v5  ;;  %v1139_v58 = vld [vmem:[%s3018_s21 + $0x1bf8] sm:$0xff]  ;;  %v858_v23 = vld [vmem:[%s3018_s21 + $0x1330] sm:$0xff] }
 0x218   : > { %2328 = vmatpush2.msra.mxu1 %v682_v6  ;;  %2258 = vmatprep.subr.mxu0 %v419_v10  ;;  %v2498_v4 = vcombine.low %v1634_v61, %v1636_v44  ;;  %v875_v10 = vld [vmem:[%s3018_s21 + $0x13b8] sm:$0xff]  ;;  %v850_v24 = vld [vmem:[%s3018_s21 + $0x12f0] sm:$0xff] }
 0x219   : > { %2329 = vmatprep.subr.mxu1 %v675_v12  ;;  %2259 = vmatpush2.msra.mxu0 %v418_v14  ;;  %v1131_v12 = vld [vmem:[%s3018_s21 + $0x1bb8] sm:$0xff]  ;;  %v1130_v14 = vld [vmem:[%s3018_s21 + $0x1bb0] sm:$0xff] }
 0x21a   : > { %2330 = vmatpush2.msra.mxu1 %v674_v15  ;;  %2260 = vmatprep.subr.mxu0 %v411_v19  ;;  %v867_v15 = vld [vmem:[%s3018_s21 + $0x1378] sm:$0xff]  ;;  %v1098_v34 = vld [vmem:[%s3018_s21 + $0x1ab0] sm:$0xff] }
 0x21b   : > { %2331 = vmatprep.subr.mxu1 %v667_v20  ;;  %2261 = vmatpush2.msra.mxu0 %v410_v25  ;;  %v859_v20 = vld [vmem:[%s3018_s21 + $0x1338] sm:$0xff]  ;;  %v1114_v25 = vld [vmem:[%s3018_s21 + $0x1b30] sm:$0xff] }
 0x21c   : > { %2332 = vmatpush2.msra.mxu1 %v666_v27  ;;  %2262 = vmatprep.subr.mxu0 %v403_v30  ;;  %v851_v27 = vld [vmem:[%s3018_s21 + $0x12f8] sm:$0xff]  ;;  %v1106_v30 = vld [vmem:[%s3018_s21 + $0x1af0] sm:$0xff] }
 0x21d   : > { %2333 = vmatprep.subr.mxu1 %v659_v31  ;;  %2263 = vmatpush2.msra.mxu0 %v402_v32  ;;  %v843_v31 = vld [vmem:[%s3018_s21 + $0x12b8] sm:$0xff]  ;;  %v1082_v46 = vld [vmem:[%s3018_s21 + $0x1a30] sm:$0xff] }
 0x21e   : > { %2334 = vmatpush2.msra.mxu1 %v658_v33  ;;  %2264 = vmatprep.subr.mxu0 %v395_v38  ;;  %v1099_v32 = vld [vmem:[%s3018_s21 + $0x1ab8] sm:$0xff]  ;;  %v842_v33 = vld [vmem:[%s3018_s21 + $0x12b0] sm:$0xff] }
 0x21f   : > { %2335 = vmatprep.subr.mxu1 %v651_v39  ;;  %v1846_v51 = vpop.f32.mrf.mxu0  ;;  %2265 = vmatpush2.msra.mxu0 %v394_v42  ;;  %v834_v38 = vld [vmem:[%s3018_s21 + $0x1270] sm:$0xff]  ;;  %v827_v40 = vld [vmem:[%s3018_s21 + $0x1238] sm:$0xff] }
 0x220   : > { %2336 = vmatpush2.msra.mxu1 %v650_v45  ;;  %v1847_v56 = vadd.f32 %v1846_v51, %v1776_v35  ;;  %2266 = vmatprep.subr.mxu0 %v387_v47  ;;  %v1090_v39 = vld [vmem:[%s3018_s21 + $0x1a70] sm:$0xff]  ;;  %v1083_v42 = vld [vmem:[%s3018_s21 + $0x1a38] sm:$0xff] }
 0x221   : > { %2337 = vmatprep.subr.mxu1 %v643_v48  ;;  %v1917_v59 = vpop.f32.mrf.mxu1  ;;  %v1848_v60 = vpop.f32.mrf.mxu0  ;;  %2267 = vmatpush2.msra.mxu0 %v386_v49  ;;  %v826_v45 = vld [vmem:[%s3018_s21 + $0x1230] sm:$0xff]  ;;  %v819_v35 = vld [vmem:[%s3018_s21 + $0x11f8] sm:$0xff] }
 0x222   : > { %2338 = vmatpush2.msra.mxu1 %v642_v50  ;;  %v1849_v0 = vadd.f32 %v1848_v60, %v1778_v53  ;;  %2268 = vmatprep.subr.mxu0 %v379_v54  ;;  %v1918_v5 = vadd.f32 %v1917_v59, %v1847_v56  ;;  %v1075_v47 = vld [vmem:[%s3018_s21 + $0x19f8] sm:$0xff]  ;;  %v818_v48 = vld [vmem:[%s3018_s21 + $0x11f0] sm:$0xff] }
 0x223   : > { %2339 = vmatprep.subr.mxu1 %v635_v55  ;;  %v1919_v2 = vpop.f32.mrf.mxu1  ;;  %2269 = vmatpush2.msra.mxu0 %v378_v57  ;;  %v1074_v49 = vld [vmem:[%s3018_s21 + $0x19f0] sm:$0xff]  ;;  %v811_v50 = vld [vmem:[%s3018_s21 + $0x11b8] sm:$0xff] }
 0x224   : > { %2270 = vmatprep.mubr.f32.mxu0 %v3163_v8  ;;  %v1920_v6 = vadd.f32 %v1919_v2, %v1849_v0  ;;  %2340 = vmatpush2.msra.mxu1 %v634_v63  ;;  %v1067_v51 = vld [vmem:[%s3018_s21 + $0x19b8] sm:$0xff]  ;;  %v810_v44 = vld [vmem:[%s3018_s21 + $0x11b0] sm:$0xff] }
 0x225   : > { %2271 = vmatmul.mubr.f32.vlgmr.msra.gmra.mxu0 %v3148_v62  ;;  %2341 = vmatprep.mubr.f32.mxu1 %v3169_v11  ;;  %v2506_v62 = vrot.slane %v2498_v4, %v3137_v52  ;;  %v1066_v53 = vld [vmem:[%s3018_s21 + $0x19b0] sm:$0xff]  ;;  %v803_v54 = vld [vmem:[%s3018_s21 + $0x1178] sm:$0xff] }
 0x226   : > { %2348 = vmatprep.subr.mxu0 %v883_v1  ;;  %v2499_v8 = vcombine.low %v1918_v5, %v1920_v6  ;;  %2419 = vmatprep.subr.mxu1 %v1139_v58  ;;  %v1059_v55 = vld [vmem:[%s3018_s21 + $0x1978] sm:$0xff]  ;;  %v802_v56 = vld [vmem:[%s3018_s21 + $0x1170] sm:$0xff] }
 0x227   : > { %2342 = vmatmul.mubr.f32.vlgmr.msra.gmra.mxu1 %v3155_v3  ;;  %2349 = vmatpush1.msra.mxu0 %v882_v7  ;;  %v866_v3 = vld [vmem:[%s3018_s21 + $0x1370] sm:$0xff]  ;;  %v795_v59 = vld [vmem:[%s3018_s21 + $0x1138] sm:$0xff] }
 0x228   : > { %2420 = vmatpush1.msra.mxu1 %v1138_v9  ;;  %v2513_v11 = vrot.slane %v2499_v8, %v3137_v52  ;;  %2350 = vmatprep.subr.mxu0 %v875_v10  ;;  %v1058_v57 = vld [vmem:[%s3018_s21 + $0x1970] sm:$0xff]  ;;  %v1051_v60 = vld [vmem:[%s3018_s21 + $0x1938] sm:$0xff] }
 0x229   : > { %2421 = vmatprep.subr.mxu1 %v1131_v12  ;;  %2351 = vmatpush1.msra.mxu0 %v874_v13  ;;  %v794_v61 = vld [vmem:[%s3018_s21 + $0x1130] sm:$0xff]  ;;  %v787_v0 = vld [vmem:[%s3018_s21 + $0x10f8] sm:$0xff] }
 0x22a   : > { %v2514_v19 = vcombine.low %v2506_v62, %v2513_v11  ;;  %2422 = vmatpush1.msra.mxu1 %v1130_v14  ;;  %2352 = vmatprep.subr.mxu0 %v867_v15  ;;  %v1050_v63 = vld [vmem:[%s3018_s21 + $0x1930] sm:$0xff]  ;;  %v1043_v1 = vld [vmem:[%s3018_s21 + $0x18f8] sm:$0xff] }
 0x22b   : > { %2423 = vmatprep.subr.mxu1 %v1123_v17  ;;  %2353 = vmatpush1.msra.mxu0 %v866_v3  ;;  %v786_v2 = vld [vmem:[%s3018_s21 + $0x10f0] sm:$0xff]  ;;  %v779_v58 = vld [vmem:[%s3018_s21 + $0x10b8] sm:$0xff] }
 0x22c   : > { %2534 = vst [vmem:[%s4037_s11] sm:$0xff] %v2514_v19  ;;  %2424 = vmatpush1.msra.mxu1 %v1122_v18  ;;  %2354 = vmatprep.subr.mxu0 %v859_v20  ;;  %v1042_v4 = vld [vmem:[%s3018_s21 + $0x18f0] sm:$0xff]  ;;  %v1035_v5 = vld [vmem:[%s3018_s21 + $0x18b8] sm:$0xff] }
 0x22d   : > { %2425 = vmatprep.subr.mxu1 %v1115_v22  ;;  %2355 = vmatpush1.msra.mxu0 %v858_v23  ;;  %v778_v6 = vld [vmem:[%s3018_s21 + $0x10b0] sm:$0xff]  ;;  %v771_v9 = vld [vmem:[%s3018_s21 + $0x1078] sm:$0xff] }
 0x22e   : > { %2426 = vmatpush1.msra.mxu1 %v1114_v25  ;;  %2356 = vmatprep.subr.mxu0 %v851_v27  ;;  %v1034_v7 = vld [vmem:[%s3018_s21 + $0x18b0] sm:$0xff]  ;;  %v1027_v10 = vld [vmem:[%s3018_s21 + $0x1878] sm:$0xff] }
 0x22f   : > { %2427 = vmatprep.subr.mxu1 %v1107_v28  ;;  %2357 = vmatpush1.msra.mxu0 %v850_v24  ;;  %v770_v12 = vld [vmem:[%s3018_s21 + $0x1070] sm:$0xff]  ;;  %v763_v13 = vld [vmem:[%s3018_s21 + $0x1038] sm:$0xff] }
 0x230   : > { %2428 = vmatpush1.msra.mxu1 %v1106_v30  ;;  %2358 = vmatprep.subr.mxu0 %v843_v31  ;;  %v1026_v8 = vld [vmem:[%s3018_s21 + $0x1870] sm:$0xff]  ;;  %v1019_v14 = vld [vmem:[%s3018_s21 + $0x1838] sm:$0xff] }
 0x231   : > { %2429 = vmatprep.subr.mxu1 %v1099_v32  ;;  %2359 = vmatpush1.msra.mxu0 %v842_v33  ;;  %v762_v62 = vld [vmem:[%s3018_s21 + $0x1030] sm:$0xff]  ;;  %v1011_v15 = vld [vmem:[%s3018_s21 + $0x17f8] sm:$0xff] }
 0x232   : > { %2430 = vmatpush1.msra.mxu1 %v1098_v34  ;;  %2360 = vmatprep.subr.mxu0 %v835_v36  ;;  %v1018_v11 = vld [vmem:[%s3018_s21 + $0x1830] sm:$0xff]  ;;  %v1267_v17 = vld [vmem:[%s3018_s21 + $0x1ff8] sm:$0xff] }
 0x233   : > { %2431 = vmatprep.subr.mxu1 %v1091_v37  ;;  %2361 = vmatpush1.msra.mxu0 %v834_v38  ;;  %v1010_v3 = vld [vmem:[%s3018_s21 + $0x17f0] sm:$0xff]  ;;  %v1003_v19 = vld [vmem:[%s3018_s21 + $0x17b8] sm:$0xff] }
 0x234   : > { %2432 = vmatpush1.msra.mxu1 %v1090_v39  ;;  %2362 = vmatprep.subr.mxu0 %v827_v40  ;;  %v1266_v18 = vld [vmem:[%s3018_s21 + $0x1ff0] sm:$0xff]  ;;  %v1259_v20 = vld [vmem:[%s3018_s21 + $0x1fb8] sm:$0xff] }
 0x235   : > { %2433 = vmatprep.subr.mxu1 %v1083_v42  ;;  %2363 = vmatpush1.msra.mxu0 %v826_v45  ;;  %v1002_v22 = vld [vmem:[%s3018_s21 + $0x17b0] sm:$0xff]  ;;  %v995_v25 = vld [vmem:[%s3018_s21 + $0x1778] sm:$0xff] }
 0x236   : > { %2434 = vmatpush1.msra.mxu1 %v1082_v46  ;;  %2364 = vmatprep.subr.mxu0 %v819_v35  ;;  %v1258_v23 = vld [vmem:[%s3018_s21 + $0x1fb0] sm:$0xff]  ;;  %v1251_v27 = vld [vmem:[%s3018_s21 + $0x1f78] sm:$0xff] }
 0x237   : > { %2435 = vmatprep.subr.mxu1 %v1075_v47  ;;  %2365 = vmatpush1.msra.mxu0 %v818_v48  ;;  %v994_v28 = vld [vmem:[%s3018_s21 + $0x1770] sm:$0xff]  ;;  %v987_v30 = vld [vmem:[%s3018_s21 + $0x1738] sm:$0xff] }
 0x238   : > { %2436 = vmatpush1.msra.mxu1 %v1074_v49  ;;  %2366 = vmatprep.subr.mxu0 %v811_v50  ;;  %v1250_v24 = vld [vmem:[%s3018_s21 + $0x1f70] sm:$0xff]  ;;  %v1243_v31 = vld [vmem:[%s3018_s21 + $0x1f38] sm:$0xff] }
 0x239   : > { %2437 = vmatprep.subr.mxu1 %v1067_v51  ;;  %2367 = vmatpush1.msra.mxu0 %v810_v44  ;;  %v986_v32 = vld [vmem:[%s3018_s21 + $0x1730] sm:$0xff]  ;;  %v979_v34 = vld [vmem:[%s3018_s21 + $0x16f8] sm:$0xff] }
 0x23a   : > { %2438 = vmatpush1.msra.mxu1 %v1066_v53  ;;  %2368 = vmatprep.subr.mxu0 %v803_v54  ;;  %v1242_v33 = vld [vmem:[%s3018_s21 + $0x1f30] sm:$0xff]  ;;  %v1235_v36 = vld [vmem:[%s3018_s21 + $0x1ef8] sm:$0xff] }
 0x23b   : > { %2439 = vmatprep.subr.mxu1 %v1059_v55  ;;  %2369 = vmatpush1.msra.mxu0 %v802_v56  ;;  %v978_v37 = vld [vmem:[%s3018_s21 + $0x16f0] sm:$0xff]  ;;  %v971_v39 = vld [vmem:[%s3018_s21 + $0x16b8] sm:$0xff] }
 0x23c   : > { %2440 = vmatpush1.msra.mxu1 %v1058_v57  ;;  %2370 = vmatprep.subr.mxu0 %v795_v59  ;;  %v1234_v38 = vld [vmem:[%s3018_s21 + $0x1ef0] sm:$0xff]  ;;  %v1227_v40 = vld [vmem:[%s3018_s21 + $0x1eb8] sm:$0xff] }
 0x23d   : > { %2441 = vmatprep.subr.mxu1 %v1051_v60  ;;  %2371 = vmatpush1.msra.mxu0 %v794_v61  ;;  %v970_v42 = vld [vmem:[%s3018_s21 + $0x16b0] sm:$0xff]  ;;  %v963_v46 = vld [vmem:[%s3018_s21 + $0x1678] sm:$0xff] }
 0x23e   : > { %2442 = vmatpush1.msra.mxu1 %v1050_v63  ;;  %2372 = vmatprep.subr.mxu0 %v787_v0  ;;  %v1226_v45 = vld [vmem:[%s3018_s21 + $0x1eb0] sm:$0xff]  ;;  %v1219_v35 = vld [vmem:[%s3018_s21 + $0x1e78] sm:$0xff] }
 0x23f   : > { %2443 = vmatprep.subr.mxu1 %v1043_v1  ;;  %2373 = vmatpush1.msra.mxu0 %v786_v2  ;;  %v962_v47 = vld [vmem:[%s3018_s21 + $0x1670] sm:$0xff]  ;;  %v955_v49 = vld [vmem:[%s3018_s21 + $0x1638] sm:$0xff] }
 0x240   : > { %2444 = vmatpush1.msra.mxu1 %v1042_v4  ;;  %2374 = vmatprep.subr.mxu0 %v779_v58  ;;  %v1218_v48 = vld [vmem:[%s3018_s21 + $0x1e70] sm:$0xff]  ;;  %v1211_v50 = vld [vmem:[%s3018_s21 + $0x1e38] sm:$0xff] }
 0x241   : > { %2445 = vmatprep.subr.mxu1 %v1035_v5  ;;  %2375 = vmatpush1.msra.mxu0 %v778_v6  ;;  %v954_v51 = vld [vmem:[%s3018_s21 + $0x1630] sm:$0xff]  ;;  %v947_v53 = vld [vmem:[%s3018_s21 + $0x15f8] sm:$0xff] }
 0x242   : > { %2446 = vmatpush1.msra.mxu1 %v1034_v7  ;;  %2376 = vmatprep.subr.mxu0 %v771_v9  ;;  %v1210_v44 = vld [vmem:[%s3018_s21 + $0x1e30] sm:$0xff]  ;;  %v1203_v54 = vld [vmem:[%s3018_s21 + $0x1df8] sm:$0xff] }
 0x243   : > { %2447 = vmatprep.subr.mxu1 %v1027_v10  ;;  %2377 = vmatpush1.msra.mxu0 %v770_v12  ;;  %v946_v55 = vld [vmem:[%s3018_s21 + $0x15f0] sm:$0xff]  ;;  %v939_v57 = vld [vmem:[%s3018_s21 + $0x15b8] sm:$0xff] }
 0x244   : > { %2448 = vmatpush1.msra.mxu1 %v1026_v8  ;;  %2378 = vmatprep.subr.mxu0 %v763_v13  ;;  %v1202_v56 = vld [vmem:[%s3018_s21 + $0x1df0] sm:$0xff]  ;;  %v1195_v59 = vld [vmem:[%s3018_s21 + $0x1db8] sm:$0xff] }
 0x245   : > { %2449 = vmatprep.subr.mxu1 %v1019_v14  ;;  %2379 = vmatpush1.msra.mxu0 %v762_v62  ;;  %v938_v60 = vld [vmem:[%s3018_s21 + $0x15b0] sm:$0xff]  ;;  %v931_v63 = vld [vmem:[%s3018_s21 + $0x1578] sm:$0xff] }
 0x246   : > { %2450 = vmatpush1.msra.mxu1 %v1018_v11  ;;  %2380 = vmatprep.subr.mxu0 %v1011_v15  ;;  %v1194_v61 = vld [vmem:[%s3018_s21 + $0x1db0] sm:$0xff]  ;;  %v1187_v0 = vld [vmem:[%s3018_s21 + $0x1d78] sm:$0xff] }
 0x247   : > { %2451 = vmatprep.subr.mxu1 %v1267_v17  ;;  %2381 = vmatpush2.msra.mxu0 %v1010_v3  ;;  %v930_v1 = vld [vmem:[%s3018_s21 + $0x1570] sm:$0xff]  ;;  %v923_v4 = vld [vmem:[%s3018_s21 + $0x1538] sm:$0xff] }
 0x248   : > { %2452 = vmatpush2.msra.mxu1 %v1266_v18  ;;  %2382 = vmatprep.subr.mxu0 %v1003_v19  ;;  %v1186_v2 = vld [vmem:[%s3018_s21 + $0x1d70] sm:$0xff]  ;;  %v1179_v58 = vld [vmem:[%s3018_s21 + $0x1d38] sm:$0xff] }
 0x249   : > { %2453 = vmatprep.subr.mxu1 %v1259_v20  ;;  %2383 = vmatpush2.msra.mxu0 %v1002_v22  ;;  %v922_v5 = vld [vmem:[%s3018_s21 + $0x1530] sm:$0xff]  ;;  %v915_v7 = vld [vmem:[%s3018_s21 + $0x14f8] sm:$0xff] }
 0x24a   : > { %2454 = vmatpush2.msra.mxu1 %v1258_v23  ;;  %2384 = vmatprep.subr.mxu0 %v995_v25  ;;  %v1178_v6 = vld [vmem:[%s3018_s21 + $0x1d30] sm:$0xff]  ;;  %v1171_v9 = vld [vmem:[%s3018_s21 + $0x1cf8] sm:$0xff] }
 0x24b   : > { %2455 = vmatprep.subr.mxu1 %v1251_v27  ;;  %2385 = vmatpush2.msra.mxu0 %v994_v28  ;;  %v914_v10 = vld [vmem:[%s3018_s21 + $0x14f0] sm:$0xff]  ;;  %v907_v8 = vld [vmem:[%s3018_s21 + $0x14b8] sm:$0xff]  ;;  %v1292_v28 = vsub.s32 5, %v3126_v41 }
 0x24c   : > { %2456 = vmatpush2.msra.mxu1 %v1250_v24  ;;  %2386 = vmatprep.subr.mxu0 %v987_v30  ;;  %v1170_v12 = vld [vmem:[%s3018_s21 + $0x1cf0] sm:$0xff]  ;;  %v1163_v13 = vld [vmem:[%s3018_s21 + $0x1cb8] sm:$0xff]  ;;  %v1288_v30 = vsub.s32 4, %v3126_v41 }
 0x24d   : > { %2457 = vmatprep.subr.mxu1 %v1243_v31  ;;  %2387 = vmatpush2.msra.mxu0 %v986_v32  ;;  %v906_v14 = vld [vmem:[%s3018_s21 + $0x14b0] sm:$0xff]  ;;  %v899_v11 = vld [vmem:[%s3018_s21 + $0x1478] sm:$0xff]  ;;  %v1293_v32 = vrot.slane %v3949_v43, %v1292_v28 }
 0x24e   : > { %2458 = vmatpush2.msra.mxu1 %v1242_v33  ;;  %2388 = vmatprep.subr.mxu0 %v979_v34  ;;  %v1162_v62 = vld [vmem:[%s3018_s21 + $0x1cb0] sm:$0xff]  ;;  %v1155_v15 = vld [vmem:[%s3018_s21 + $0x1c78] sm:$0xff] }
 0x24f   : > { %2459 = vmatprep.subr.mxu1 %v1235_v36  ;;  %2389 = vmatpush2.msra.mxu0 %v978_v37  ;;  %v898_v17 = vld [vmem:[%s3018_s21 + $0x1470] sm:$0xff]  ;;  %v891_v18 = vld [vmem:[%s3018_s21 + $0x1438] sm:$0xff] }
 0x250   : > { %2460 = vmatpush2.msra.mxu1 %v1234_v38  ;;  %2390 = vmatprep.subr.mxu0 %v971_v39  ;;  %v1154_v3 = vld [vmem:[%s3018_s21 + $0x1c70] sm:$0xff]  ;;  %v1147_v19 = vld [vmem:[%s3018_s21 + $0x1c38] sm:$0xff] }
 0x251   : > { %2461 = vmatprep.subr.mxu1 %v1227_v40  ;;  %2391 = vmatpush2.msra.mxu0 %v970_v42  ;;  %v890_v20 = vld [vmem:[%s3018_s21 + $0x1430] sm:$0xff] }
 0x252   : > { %2462 = vmatpush2.msra.mxu1 %v1226_v45  ;;  %2392 = vmatprep.subr.mxu0 %v963_v46  ;;  %v1146_v22 = vld [vmem:[%s3018_s21 + $0x1c30] sm:$0xff] }
 0x253   : > { %2463 = vmatprep.subr.mxu1 %v1219_v35  ;;  %2393 = vmatpush2.msra.mxu0 %v962_v47 }
 0x254   : > { %2464 = vmatpush2.msra.mxu1 %v1218_v48  ;;  %2394 = vmatprep.subr.mxu0 %v955_v49 }
 0x255   : > { %2465 = vmatprep.subr.mxu1 %v1211_v50  ;;  %2395 = vmatpush2.msra.mxu0 %v954_v51 }
 0x256   : > { %2466 = vmatpush2.msra.mxu1 %v1210_v44  ;;  %2396 = vmatprep.subr.mxu0 %v947_v53 }
 0x257   : > { %2467 = vmatprep.subr.mxu1 %v1203_v54  ;;  %2397 = vmatpush2.msra.mxu0 %v946_v55 }
 0x258   : > { %2468 = vmatpush2.msra.mxu1 %v1202_v56  ;;  %2398 = vmatprep.subr.mxu0 %v939_v57 }
 0x259   : > { %2469 = vmatprep.subr.mxu1 %v1195_v59  ;;  %2399 = vmatpush2.msra.mxu0 %v938_v60 }
 0x25a   : > { %2470 = vmatpush2.msra.mxu1 %v1194_v61  ;;  %2400 = vmatprep.subr.mxu0 %v931_v63 }
 0x25b   : > { %2471 = vmatprep.subr.mxu1 %v1187_v0  ;;  %2401 = vmatpush2.msra.mxu0 %v930_v1 }
 0x25c   : > { %2472 = vmatpush2.msra.mxu1 %v1186_v2  ;;  %2402 = vmatprep.subr.mxu0 %v923_v4 }
 0x25d   : > { %2473 = vmatprep.subr.mxu1 %v1179_v58  ;;  %2403 = vmatpush2.msra.mxu0 %v922_v5 }
 0x25e   : > { %2474 = vmatpush2.msra.mxu1 %v1178_v6  ;;  %2404 = vmatprep.subr.mxu0 %v915_v7 }
 0x25f   : > { %2475 = vmatprep.subr.mxu1 %v1171_v9  ;;  %2405 = vmatpush2.msra.mxu0 %v914_v10 }
 0x260   : > { %2476 = vmatpush2.msra.mxu1 %v1170_v12  ;;  %2406 = vmatprep.subr.mxu0 %v907_v8 }
 0x261   : > { %2477 = vmatprep.subr.mxu1 %v1163_v13  ;;  %2407 = vmatpush2.msra.mxu0 %v906_v14  ;;  %v1988_v23 = vpop.f32.mrf.mxu0 }
 0x262   : > { %2478 = vmatpush2.msra.mxu1 %v1162_v62  ;;  %2408 = vmatprep.subr.mxu0 %v899_v11 }
 0x263   : > { %2479 = vmatprep.subr.mxu1 %v1155_v15  ;;  %2409 = vmatpush2.msra.mxu0 %v898_v17  ;;  %v2059_v25 = vpop.f32.mrf.mxu1  ;;  %v1990_v27 = vpop.f32.mrf.mxu0 }
 0x264   : > { %2480 = vmatpush2.msra.mxu1 %v1154_v3  ;;  %2410 = vmatprep.subr.mxu0 %v891_v18  ;;  %v1991_v36 = vadd.f32 %v1990_v27, %v1293_v32 }
 0x265   : > { %2481 = vmatprep.subr.mxu1 %v1147_v19  ;;  %2411 = vmatpush2.msra.mxu0 %v890_v20  ;;  %v2061_v31 = vpop.f32.mrf.mxu1 }
 0x266   : > { %2412 = vmatprep.mubr.f32.mxu0 %v3309_v26  ;;  %2482 = vmatpush2.msra.mxu1 %v1146_v22  ;;  %v1296_v26 = vsub.s32 6, %v3126_v41  ;;  %v2062_v46 = vadd.f32 %v2061_v31, %v1991_v36 }
 0x267   : > { %2483 = vmatprep.mubr.f32.mxu1 %v3315_v29  ;;  %2413 = vmatmul.mubr.f32.vlgmr.msra.gmra.mxu0 %v3294_v16  ;;  %v1289_v29 = vrot.slane %v3949_v43, %v1288_v30  ;;  %v1300_v16 = vsub.s32 7, %v3126_v41 }
 0x268   : > { %2484 = vmatmul.mubr.f32.vlgmr.msra.gmra.mxu1 %v3301_v21  ;;  %v1297_v37 = vrot.slane %v3949_v43, %v1296_v26 }
 0x269   : > { %v1989_v39 = vadd.f32 %v1988_v23, %v1289_v29  ;;  %v1301_v40 = vrot.slane %v3949_v43, %v1300_v16 }
 0x26b   : > { %v2060_v47 = vadd.f32 %v2059_v25, %v1989_v39 }
 0x2a3   : > { %v2130_v24 = vpop.f32.mrf.mxu0 }
 0x2a4   : > { %v2131_v51 = vadd.f32 %v2130_v24, %v2060_v47 }
 0x2a5   : > { %v2201_v33 = vpop.f32.mrf.mxu1  ;;  %v2132_v34 = vpop.f32.mrf.mxu0 }
 0x2a6   : > { %v2133_v48 = vadd.f32 %v2132_v34, %v2062_v46  ;;  %v2202_v59 = vadd.f32 %v2201_v33, %v2131_v51 }
 0x2a7   : > { %v2203_v38 = vpop.f32.mrf.mxu1 }
 0x2a8   : > { %v2204_v54 = vadd.f32 %v2203_v38, %v2133_v48 }
 0x2aa   : > { %v2515_v61 = vcombine.low %v2202_v59, %v2204_v54 }
 0x2ac   : > { %v2523_v2 = vrot.slane %v2515_v61, %v3137_v52 }
 0x2e5   : > { %v2272_v21 = vpop.f32.mrf.mxu0 }
 0x2e6   : > { %v2273_v35 = vadd.f32 %v2272_v21, %v1297_v37 }
 0x2e7   : > { %v2343_v42 = vpop.f32.mrf.mxu1  ;;  %v2274_v45 = vpop.f32.mrf.mxu0 }
 0x2e8   : > { %v2275_v49 = vadd.f32 %v2274_v45, %v1301_v40  ;;  %v2344_v44 = vadd.f32 %v2343_v42, %v2273_v35 }
 0x2e9   : > { %v2345_v50 = vpop.f32.mrf.mxu1 }
 0x2ea   : > { %v2346_v55 = vadd.f32 %v2345_v50, %v2275_v49 }
 0x327   : > { %v2414_v53 = vpop.f32.mrf.mxu0 }
 0x328   : > { %v2485_v41 = vpop.f32.mrf.mxu1  ;;  %v2415_v56 = vadd.f32 %v2414_v53, %v2344_v44 }
 0x329   : > { %v2416_v57 = vpop.f32.mrf.mxu0 }
 0x32a   : > { %v2417_v60 = vadd.f32 %v2416_v57, %v2346_v55  ;;  %v2487_v43 = vpop.f32.mrf.mxu1  ;;  %v2486_v63 = vadd.f32 %v2485_v41, %v2415_v56 }
 0x32c   : > { %v2488_v0 = vadd.f32 %v2487_v43, %v2417_v60 }
 0x32e   : > { %v2516_v1 = vcombine.low %v2486_v63, %v2488_v0 }
 0x330   : > { %v2530_v4 = vrot.slane %v2516_v1, %v3137_v52 }
 0x332   : > { %v2531_v58 = vcombine.low %v2523_v2, %v2530_v4 }
 0x334   : > { %2535 = vst [vmem:[%s4037_s11 + $0x8] sm:$0xff] %v2531_v58 }
 0x335 PF: > { %p14_p0 = scmp.ge.s32.totalorder %s2887_s16, 4   ;;  %s4200_s12 = smov %s2829_s13 }
 0x336   : > { %s4201_s13 = smov %s2833_s14  ;;  %s4202_s14 = smov %s2897_s19 }
 0x337   : > { %s4203_s15 = smov %s2887_s16  ;;  %16 = sbr.rel (!%p14_p0) target bundleno = 4 (0x4), region = 88 }
 0x33c   :  { %2558 = vsyncpa [#allocation3], 1 }
 0x33d   :  { %2560 = vsyncpa [#allocation3 + $0x1], 1 }
 0x33e   :  { %2561 = vsyncpa [#allocation5], 1 }
 0x33f   :  { %2563 = vsyncpa [#allocation5 + $0x1], 1 }

// kernel: cnn_decoder_simple_forward.4
= control target key start
LH: loop header
LB: loop body
LE: loop exit
PB: predicated region body
PF: predicated region fallthrough
CT: control target
= control target key end

     0   :  { %s475_s12 = smov 0   ;;  %s531_s0 = inlined_call_operand.vmem [shape: f32[4,16,128], index: 0, kind: input, shape index: {}]   ;;  %s532_s1 = inlined_call_operand.vmem [shape: f32[4,128,128], index: 1, kind: input, shape index: {}]   ;;  %s533_s2 = inlined_call_operand.vmem [shape: f32[16,1], index: 2, kind: input, shape index: {}]   ;;  %s534_s3 = inlined_call_operand.vmem [shape: f32[4,16,128], index: 3, kind: output, shape index: {}]  }
   0x1 LB: > { %s367_s13 = sadd.s32 4294967295, %s452_s12   ;;  %p371_p0 = scmp.ge.s32.totalorder %s452_s12, 1  ;;  %s452_s12 = sphi %s475_s12, %s13_s12  }
   0x2   : > { %p147_p1 = scmp.lt.s32.totalorder %s452_s12, 5 }
   0x4   : > { %p148_p2 = pnand %p371_p0, %p147_p1 }
   0x5   : > { %p176_p3 = scmp.lt.s32.totalorder (!%p148_p2), %s367_s13, 3 }
   0x6   : > { %151 = sbr.rel (%p148_p2) target bundleno = 247 (0xf7), region = 32 }
   0xb   : > { %v209_v0 = vld [vmem:[%s533_s2] sm:$0xff]  ;;  %v454_v1 = vmov 0   ;;  %s536_s13 = smov (!%p176_p3, %s367_s13), 3  ;;  %v210_v2 = vld [vmem:[%s533_s2 + $0x8] sm:$0xff] }
   0xc   : > { %445 = vset.pattern.permute.xlu0 %v454_v1  ;;  %s381_s18 = sshll.u32 %s536_s13, 7  ;;  %s380_s22 = sshll.u32 %s536_s13, 4 }
   0xd   : > { %213 = vperm.xlu0 %445, %v209_v0   ;;  %s495_s21 = scalar_lea.vmem %s532_s1, %s381_s18  ;;  %s506_s25 = scalar_lea.vmem %s531_s0, %s380_s22 }
   0xe   : > { %v208_v3 = vld [vmem:[%s495_s21 + $0x78] sm:$0xff]  ;;  %v207_v4 = vld [vmem:[%s495_s21 + $0x70] sm:$0xff]  ;;  %v206_v5 = vld [vmem:[%s495_s21 + $0x68] sm:$0xff]  ;;  %s190_s28 = scalar_lea.vmem %s534_s3, %s380_s22 }
   0xf   : > { %401 = vmatprep.subr.mxu0 %v208_v3  ;;  %v205_v6 = vld [vmem:[%s495_s21 + $0x60] sm:$0xff]  ;;  %v204_v8 = vld [vmem:[%s495_s21 + $0x58] sm:$0xff]  ;;  %v203_v9 = vld [vmem:[%s495_s21 + $0x50] sm:$0xff] }
  0x10   : > { %402 = vmatpush3.msra.mxu0 %v208_v3  ;;  %v191_v7 = vld [vmem:[%s506_s25] sm:$0xff]  ;;  %v202_v10 = vld [vmem:[%s495_s21 + $0x48] sm:$0xff]  ;;  %v200_v12 = vld [vmem:[%s495_s21 + $0x38] sm:$0xff] }
  0x11   : > { %218 = vperm.xlu0 %445, %v210_v2   ;;  %403 = vmatprep.subr.mxu0 %v207_v4  ;;  %v201_v11 = vld [vmem:[%s495_s21 + $0x40] sm:$0xff]  ;;  %v199_v13 = vld [vmem:[%s495_s21 + $0x30] sm:$0xff]  ;;  %v198_v14 = vld [vmem:[%s495_s21 + $0x28] sm:$0xff] }
  0x12   : > { %404 = vmatpush3.msra.mxu0 %v207_v4  ;;  %433 = vmatprep.mubr.f32.mxu0 %v191_v7  ;;  %v197_v15 = vld [vmem:[%s495_s21 + $0x20] sm:$0xff]  ;;  %v196_v16 = vld [vmem:[%s495_s21 + $0x18] sm:$0xff]  ;;  %v195_v17 = vld [vmem:[%s495_s21 + $0x10] sm:$0xff] }
  0x13   : > { %405 = vmatprep.subr.mxu0 %v206_v5  ;;  %v194_v18 = vld [vmem:[%s495_s21 + $0x8] sm:$0xff]  ;;  %v193_v19 = vld [vmem:[%s495_s21] sm:$0xff] }
  0x14   : > { %406 = vmatpush3.msra.mxu0 %v206_v5  ;;  %v192_v20 = vld [vmem:[%s506_s25 + $0x8] sm:$0xff] }
  0x15   : > { %407 = vmatprep.subr.mxu0 %v205_v6 }
  0x16   : > { %408 = vmatpush3.msra.mxu0 %v205_v6 }
  0x17   : > { %409 = vmatprep.subr.mxu0 %v204_v8 }
  0x18   : > { %410 = vmatpush3.msra.mxu0 %v204_v8 }
  0x19   : > { %411 = vmatprep.subr.mxu0 %v203_v9 }
  0x1a   : > { %412 = vmatpush3.msra.mxu0 %v203_v9 }
  0x1b   : > { %413 = vmatprep.subr.mxu0 %v202_v10 }
  0x1c   : > { %414 = vmatpush3.msra.mxu0 %v202_v10 }
  0x1d   : > { %415 = vmatprep.subr.mxu0 %v201_v11 }
  0x1e   : > { %416 = vmatpush3.msra.mxu0 %v201_v11 }
  0x1f   : > { %417 = vmatprep.subr.mxu0 %v200_v12 }
  0x20   : > { %418 = vmatpush3.msra.mxu0 %v200_v12 }
  0x21   : > { %419 = vmatprep.subr.mxu0 %v199_v13 }
  0x22   : > { %420 = vmatpush3.msra.mxu0 %v199_v13 }
  0x23   : > { %421 = vmatprep.subr.mxu0 %v198_v14 }
  0x24   : > { %422 = vmatpush3.msra.mxu0 %v198_v14 }
  0x25   : > { %423 = vmatprep.subr.mxu0 %v197_v15 }
  0x26   : > { %424 = vmatpush3.msra.mxu0 %v197_v15 }
  0x27   : > { %425 = vmatprep.subr.mxu0 %v196_v16 }
  0x28   : > { %426 = vmatpush3.msra.mxu0 %v196_v16 }
  0x29   : > { %427 = vmatprep.subr.mxu0 %v195_v17 }
  0x2a   : > { %428 = vmatpush3.msra.mxu0 %v195_v17 }
  0x2b   : > { %429 = vmatprep.subr.mxu0 %v194_v18 }
  0x2c   : > { %430 = vmatpush3.msra.mxu0 %v194_v18 }
  0x2d   : > { %431 = vmatprep.subr.mxu0 %v193_v19 }
  0x2e   : > { %432 = vmatpush3.msra.mxu0 %v193_v19 }
  0x2f   : > { %434 = vmatmul.mubr.f32.vlgmr.msra.gmra.mxu0 %v192_v20 }
  0x88   : > { %v214_v21 = vpop.permute.xlu0 %213 }
  0x8c   : > { %v219_v22 = vpop.permute.xlu0 %218 }
  0xef   : > { %v435_v23 = vpop.f32.mrf.mxu0 }
  0xf0   : > { %v293_v24 = vadd.f32 %v435_v23, %v219_v22 }
  0xf1   : > { %v287_v25 = vpop.f32.mrf.mxu0 }
  0xf2   : > { %v297_v26 = vmax.f32 %v293_v24, 0.0  ;;  %v288_v27 = vadd.f32 %v287_v25, %v214_v21 }
  0xf4   : > { %299 = vst [vmem:[%s190_s28 + $0x8] sm:$0xff] %v297_v26  ;;  %v296_v28 = vmax.f32 %v288_v27, 0.0 }
  0xf6   : > { %298 = vst [vmem:[%s190_s28] sm:$0xff] %v296_v28 }
  0xf7 PF: > { %s13_s12 = sadd.s32 1, %s452_s12  }
  0xf8   : > { %p10_p4 = scmp.ge.s32.totalorder %s13_s12, 6  }
  0xfa   :  { %12 = sbr.rel (!%p10_p4) target bundleno = 1 (0x1), region = 65 }

// kernel: cnn_decoder_simple_forward.5
= control target key start
LH: loop header
LB: loop body
LE: loop exit
PB: predicated region body
PF: predicated region fallthrough
CT: control target
= control target key end

     0   :  { %s551_s12 = smov 0   ;;  %s613_s0 = inlined_call_operand.vmem [shape: f32[4,3,64], index: 0, kind: input, shape index: {}]   ;;  %s614_s1 = inlined_call_operand.vmem [shape: f32[4,64,512], index: 1, kind: input, shape index: {}]   ;;  %s615_s2 = inlined_call_operand.vmem [shape: f32[3,1], index: 2, kind: input, shape index: {}]   ;;  %s616_s3 = inlined_call_operand.vmem [shape: f32[4,3,512], index: 3, kind: output, shape index: {}]  }
   0x1 LB: > { %s474_s13 = sadd.s32 4294967295, %s527_s12   ;;  %p478_p0 = scmp.ge.s32.totalorder %s527_s12, 1  ;;  %s527_s12 = sphi %s551_s12, %s13_s12  }
   0x2   : > { %p146_p1 = scmp.lt.s32.totalorder %s527_s12, 5 }
   0x4   : > { %p147_p2 = pnand %p478_p0, %p146_p1 }
   0x5   : > { %p174_p3 = scmp.lt.s32.totalorder (!%p147_p2), %s474_s13, 3 }
   0x6   : > { %150 = sbr.rel (%p147_p2) target bundleno = 264 (0x108), region = 32 }
   0xb   : > { %v221_v0 = vld [vmem:[%s615_s2] sm:$0x7]  ;;  %v529_v1 = vmov 0.0   ;;  %s618_s13 = smov (!%p174_p3, %s474_s13), 3  ;;  %v530_v2 = vmov 0   ;;  %vm227_vm0 = vcmask 523264  }
   0xc   : > { %295 = vmatprep.mubr.f32.mxu0 %v529_v1  ;;  %366 = vmatprep.mubr.f32.mxu1 %v529_v1  ;;  %s492_s16 = sshll.u32 %s618_s13, 8  ;;  %s479_s20 = sshll.u32 %s618_s13, 2 }
   0xd   : > { %504 = vset.pattern.permute.xlu0 %v530_v2  ;;  %s568_s19 = scalar_lea.vmem %s614_s1, %s492_s16  ;;  %s177_s23 = scalar_lea.vmem %s613_s0, %s479_s20 }
   0xe   : > { %224 = vperm.xlu0 %504, %v221_v0   ;;  %v218_v3 = vld [vmem:[%s568_s19 + $0xe8] sm:$0xff]  ;;  %v220_v4 = vld [vmem:[%s568_s19 + $0xf8] sm:$0xff]  ;;  %v217_v5 = vld [vmem:[%s568_s19 + $0xe0] sm:$0xff]  ;;  %s493_s24 = sshll.u32 %s618_s13, 4 }
   0xf   : > { %247 = vmatprep.subr.mxu0 %v218_v3  ;;  %318 = vmatprep.subr.mxu1 %v220_v4  ;;  %v219_v6 = vld [vmem:[%s568_s19 + $0xf0] sm:$0xff]  ;;  %v214_v7 = vld [vmem:[%s568_s19 + $0xc8] sm:$0xff]  ;;  %v216_v8 = vld [vmem:[%s568_s19 + $0xd8] sm:$0xff]  ;;  %s187_s27 = scalar_lea.vmem %s616_s3, %s493_s24 }
  0x10   : > { %248 = vmatpush1.msra.mxu0 %v217_v5  ;;  %319 = vmatpush1.msra.mxu1 %v219_v6  ;;  %v213_v9 = vld [vmem:[%s568_s19 + $0xc0] sm:$0xff]  ;;  %v215_v10 = vld [vmem:[%s568_s19 + $0xd0] sm:$0xff]  ;;  %v210_v11 = vld [vmem:[%s568_s19 + $0xa8] sm:$0xff] }
  0x11   : > { %249 = vmatprep.subr.mxu0 %v214_v7  ;;  %320 = vmatprep.subr.mxu1 %v216_v8  ;;  %v212_v12 = vld [vmem:[%s568_s19 + $0xb8] sm:$0xff]  ;;  %v209_v13 = vld [vmem:[%s568_s19 + $0xa0] sm:$0xff]  ;;  %v211_v14 = vld [vmem:[%s568_s19 + $0xb0] sm:$0xff] }
  0x12   : > { %250 = vmatpush1.msra.mxu0 %v213_v9  ;;  %321 = vmatpush1.msra.mxu1 %v215_v10  ;;  %v206_v15 = vld [vmem:[%s568_s19 + $0x88] sm:$0xff]  ;;  %v208_v16 = vld [vmem:[%s568_s19 + $0x98] sm:$0xff]  ;;  %v205_v17 = vld [vmem:[%s568_s19 + $0x80] sm:$0xff] }
  0x13   : > { %251 = vmatprep.subr.mxu0 %v210_v11  ;;  %322 = vmatprep.subr.mxu1 %v212_v12  ;;  %v207_v18 = vld [vmem:[%s568_s19 + $0x90] sm:$0xff]  ;;  %v202_v19 = vld [vmem:[%s568_s19 + $0x68] sm:$0xff]  ;;  %v204_v20 = vld [vmem:[%s568_s19 + $0x78] sm:$0xff] }
  0x14   : > { %252 = vmatpush1.msra.mxu0 %v209_v13  ;;  %323 = vmatpush1.msra.mxu1 %v211_v14  ;;  %v201_v21 = vld [vmem:[%s568_s19 + $0x60] sm:$0xff]  ;;  %v203_v22 = vld [vmem:[%s568_s19 + $0x70] sm:$0xff]  ;;  %v198_v23 = vld [vmem:[%s568_s19 + $0x48] sm:$0xff] }
  0x15   : > { %253 = vmatprep.subr.mxu0 %v206_v15  ;;  %324 = vmatprep.subr.mxu1 %v208_v16  ;;  %v200_v24 = vld [vmem:[%s568_s19 + $0x58] sm:$0xff]  ;;  %v197_v25 = vld [vmem:[%s568_s19 + $0x40] sm:$0xff]  ;;  %v199_v26 = vld [vmem:[%s568_s19 + $0x50] sm:$0xff] }
  0x16   : > { %254 = vmatpush1.msra.mxu0 %v205_v17  ;;  %325 = vmatpush1.msra.mxu1 %v207_v18  ;;  %v194_v27 = vld [vmem:[%s568_s19 + $0x28] sm:$0xff]  ;;  %v196_v28 = vld [vmem:[%s568_s19 + $0x38] sm:$0xff]  ;;  %v193_v29 = vld [vmem:[%s568_s19 + $0x20] sm:$0xff] }
  0x17   : > { %255 = vmatprep.subr.mxu0 %v202_v19  ;;  %326 = vmatprep.subr.mxu1 %v204_v20  ;;  %v195_v30 = vld [vmem:[%s568_s19 + $0x30] sm:$0xff]  ;;  %v190_v31 = vld [vmem:[%s568_s19 + $0x8] sm:$0xff]  ;;  %v192_v32 = vld [vmem:[%s568_s19 + $0x18] sm:$0xff] }
  0x18   : > { %256 = vmatpush1.msra.mxu0 %v201_v21  ;;  %327 = vmatpush1.msra.mxu1 %v203_v22  ;;  %v189_v33 = vld [vmem:[%s568_s19] sm:$0xff]  ;;  %v191_v34 = vld [vmem:[%s568_s19 + $0x10] sm:$0xff] }
  0x19   : > { %257 = vmatprep.subr.mxu0 %v198_v23  ;;  %328 = vmatprep.subr.mxu1 %v200_v24  ;;  %v188_v35 = vld [vmem:[%s177_s23] sm:$0x7] }
  0x1a   : > { %258 = vmatpush1.msra.mxu0 %v197_v25  ;;  %329 = vmatpush1.msra.mxu1 %v199_v26 }
  0x1b   : > { %259 = vmatprep.subr.mxu0 %v194_v27  ;;  %330 = vmatprep.subr.mxu1 %v196_v28 }
  0x1c   : > { %260 = vmatpush1.msra.mxu0 %v193_v29  ;;  %331 = vmatpush1.msra.mxu1 %v195_v30 }
  0x1d   : > { %261 = vmatprep.subr.mxu0 %v190_v31  ;;  %332 = vmatprep.subr.mxu1 %v192_v32 }
  0x1e   : > { %262 = vmatpush1.msra.mxu0 %v189_v33  ;;  %333 = vmatpush1.msra.mxu1 %v191_v34 }
  0x1f   : > { %484 = vmatmul.mubr.msk.f32.vlgmr.msra.gmra.mxu0 %vm227_vm0, %v188_v35  ;;  %485 = vmatmul.mubr.msk.f32.vlgmr.msra.gmra.mxu1 %vm227_vm0, %v188_v35 }
  0x89   : > { %v225_v36 = vpop.permute.xlu0 %224 }
  0xdf   : > { %v297_v37 = vpop.f32.mrf.mxu0  ;;  %v368_v38 = vpop.f32.mrf.mxu1 }
  0xe0   : > { %v298_v39 = vadd.f32 %v297_v37, %v225_v36  ;;  %v369_v40 = vadd.f32 %v368_v38, %v225_v36 }
  0xe1   : > { %v299_v41 = vpop.f32.mrf.mxu0  ;;  %v370_v42 = vpop.f32.mrf.mxu1 }
  0xe2   : > { %v486_v43 = vmul.f32 -1.442695, %v298_v39  ;;  %v488_v44 = vmul.f32 -1.442695, %v369_v40  ;;  %v300_v45 = vadd.f32 %v299_v41, %v225_v36  ;;  %v371_v46 = vadd.f32 %v370_v42, %v225_v36 }
  0xe4   : > { %505 = vpow2.f32 %v486_v43  ;;  %v487_v47 = vmul.f32 -1.442695, %v300_v45  ;;  %v489_v48 = vmul.f32 -1.442695, %v371_v46 }
  0xe5   : > { %507 = vpow2.f32 %v488_v44 }
  0xe6   : > { %509 = vpow2.f32 %v487_v47 }
  0xe7   : > { %511 = vpow2.f32 %v489_v48 }
  0xf1   : > { %v506_v49 = vpop.eup %505 }
  0xf2   : > { %v508_v50 = vpop.eup %507  ;;  %v385_v51 = vadd.f32 1.0, %v506_v49 }
  0xf3   : > { %v510_v52 = vpop.eup %509  ;;  %v387_v53 = vadd.f32 1.0, %v508_v50 }
  0xf4   : > { %v512_v54 = vpop.eup %511  ;;  %513 = vrcp.f32 %v385_v51  ;;  %v386_v55 = vadd.f32 1.0, %v510_v52 }
  0xf5   : > { %515 = vrcp.f32 %v387_v53  ;;  %v388_v56 = vadd.f32 1.0, %v512_v54 }
  0xf6   : > { %517 = vrcp.f32 %v386_v55 }
  0xf7   : > { %519 = vrcp.f32 %v388_v56 }
 0x101   : > { %v514_v57 = vpop.eup %513 }
 0x102   : > { %v516_v58 = vpop.eup %515 }
 0x103   : > { %v518_v59 = vpop.eup %517 }
 0x104   : > { %v520_v60 = vpop.eup %519  ;;  %v401_v61 = vcombine.low %v514_v57, %v518_v59 }
 0x105   : > { %v402_v62 = vcombine.low %v516_v58, %v520_v60 }
 0x106   : > { %405 = vst [vmem:[%s187_s27] sm:$0x77] %v401_v61 }
 0x107   : > { %406 = vst [vmem:[%s187_s27 + $0x8] sm:$0x77] %v402_v62 }
 0x108 PF: > { %s13_s12 = sadd.s32 1, %s527_s12  }
 0x109   : > { %p10_p4 = scmp.ge.s32.totalorder %s13_s12, 6  }
 0x10b   :  { %12 = sbr.rel (!%p10_p4) target bundleno = 1 (0x1), region = 65 }

</bundles_post_ra>
